<compile_context>
chip_gen: v6e
topology: v6e:2x2x1
jax: 0.10.0
libtpu: 0.0.40
codegen_flags: <defaults>
</compile_context>

<pallas_src>
import functools

import jax
import jax.numpy as jnp
from jax.experimental import pallas as pl
from jax.experimental.pallas import tpu as pltpu


def _round_up(x, m):
    return ((x + m - 1) // m) * m


def _pad_to(x, shape, dtype):
    """Cast + zero-pad `x` up to `shape`; no copy when already that shape."""
    x = x.astype(dtype)
    if x.shape == tuple(shape):
        return x
    buf = jnp.zeros(shape, dtype)
    return buf.at[tuple(slice(0, d) for d in x.shape)].set(x)


# ----------------------------------------------------------------------------
# Pallas kernels
# ----------------------------------------------------------------------------
def _apply_act(y, act):
    if act == "relu":
        return jnp.maximum(y, 0.0)
    if act == "lrelu":
        return jnp.where(y > 0, y, 0.2 * y)
    if act == "tanh":
        return jnp.tanh(y)
    return y  # "none"


def _make_gemm_kernel(act, with_stats):
    """Tiled GEMM with fused epilogue.

    grid = (M tiles, N tiles, K tiles); K is last and "arbitrary".  The output
    block is revisited across K and accumulated in f32 VMEM scratch.  On the
    last K step we optionally emit per-(M tile, N tile) column sums /
    sum-of-squares (BN batch stats) and apply the activation before the single
    store of the output block.
    """
    def kernel(a_ref, b_ref, *refs):
        if with_stats:
            o_ref, sum_ref, sq_ref, acc_ref = refs
        else:
            o_ref, acc_ref = refs
        kk = pl.program_id(2)

        @pl.when(kk == 0)
        def _():
            acc_ref[...] = jnp.zeros_like(acc_ref)

        acc_ref[...] += jnp.dot(a_ref[...], b_ref[...],
                                preferred_element_type=jnp.float32)

        @pl.when(kk == pl.num_programs(2) - 1)
        def _():
            y = acc_ref[...]
            if with_stats:
                s = jnp.sum(y, axis=0, keepdims=True)           # (1, tn)
                q = jnp.sum(y * y, axis=0, keepdims=True)
                sum_ref[...] = jnp.broadcast_to(s[None], sum_ref.shape)
                sq_ref[...] = jnp.broadcast_to(q[None], sq_ref.shape)
            o_ref[...] = _apply_act(y, act).astype(o_ref.dtype)

    return kernel


def gemm_pallas(a, b, *, act="none", with_stats=False, tm=256, tn=256, tk=512):
    """y = act(a @ b) with optional fused per-column sum / sum-of-squares.

    a: (M, K), b: (K, N).  Operands are cast to bf16 (MXU peak path),
    accumulation is f32.  Returns y (M, N) f32 [+ (col_sum, col_sq) each (N,)].
    """
    M, K = a.shape
    _, N = b.shape

    # Adaptive tile sizes: biggest tile that divides the (minimally) padded
    # extent; keeps VMEM bounded independently of layer size (v7x: 64 MiB).
    if M <= tm:
        Mp = max(_round_up(M, 8), 8); tm = Mp
    else:
        Mp = _round_up(M, tm)
    if N <= tn:
        Np = _round_up(N, 128); tn = Np
    else:
        Np = _round_up(N, tn)
    if K <= tk:
        Kp = _round_up(K, 128); tk = Kp
    else:
        Kp = _round_up(K, tk)
    gm, gn, gk = Mp // tm, Np // tn, Kp // tk

    ap = _pad_to(a, (Mp, Kp), jnp.bfloat16)
    bp = _pad_to(b, (Kp, Np), jnp.bfloat16)

    out_shape = jax.ShapeDtypeStruct((Mp, Np), jnp.float32)
    out_spec = pl.BlockSpec((tm, tn), lambda i, j, k: (i, j))
    if with_stats:
        # Per-M-tile partial stats (parallel-safe on v7x dual-TC: no
        # accumulation across a "parallel" grid axis).
        stat_shape = jax.ShapeDtypeStruct((gm, 8, Np), jnp.float32)
        stat_spec = pl.BlockSpec((1, 8, tn), lambda i, j, k: (i, 0, j))
        out_shape = (out_shape, stat_shape, stat_shape)
        out_spec = (out_spec, stat_spec, stat_spec)

    cost = pl.CostEstimate(
        flops=2 * Mp * Kp * Np,
        transcendentals=Mp * Np if act == "tanh" else 0,
        bytes_accessed=2 * (Mp * Kp * gn + Kp * Np * gm) + 4 * Mp * Np)

    res = pl.pallas_call(
        _make_gemm_kernel(act, with_stats),
        out_shape=out_shape,
        grid=(gm, gn, gk),
        in_specs=[pl.BlockSpec((tm, tk), lambda i, j, k: (i, k)),
                  pl.BlockSpec((tk, tn), lambda i, j, k: (k, j))],
        out_specs=out_spec,
        scratch_shapes=[pltpu.VMEM((tm, tn), jnp.float32)],
        compiler_params=pltpu.CompilerParams(
            dimension_semantics=("parallel", "parallel", "arbitrary"),
            vmem_limit_bytes=32 * 1024 * 1024),
        cost_estimate=cost,
    )(ap, bp)

    if with_stats:
        y, psum, psq = res
    else:
        y = res
    if (Mp, Np) != (M, N):
        y = y[:M, :N]
    if with_stats:
        col_sum = jnp.sum(psum[:, 0, :N], axis=0)
        col_sq = jnp.sum(psq[:, 0, :N], axis=0)
        return y, col_sum, col_sq
    return y


def _make_affine_act_kernel(act):
    def kernel(x_ref, scale_ref, shift_ref, o_ref):
        y = x_ref[...] * scale_ref[...] + shift_ref[...]
        o_ref[...] = _apply_act(y, act)
    return kernel


def affine_act_pallas(x, scale, shift, act, tm=512):
    """x: (M, C); per-channel y = act(x*scale + shift)."""
    M, C = x.shape
    if M <= tm:
        Mp = max(_round_up(M, 8), 8); tm = Mp
    else:
        Mp = _round_up(M, tm)
    Cp = _round_up(C, 128)
    xp = _pad_to(x, (Mp, Cp), jnp.float32)
    sc = _pad_to(scale.reshape(1, C), (1, Cp), jnp.float32)
    sh = _pad_to(shift.reshape(1, C), (1, Cp), jnp.float32)
    out = pl.pallas_call(
        _make_affine_act_kernel(act),
        out_shape=jax.ShapeDtypeStruct((Mp, Cp), jnp.float32),
        grid=(Mp // tm,),
        in_specs=[pl.BlockSpec((tm, Cp), lambda i: (i, 0)),
                  pl.BlockSpec((1, Cp), lambda i: (0, 0)),
                  pl.BlockSpec((1, Cp), lambda i: (0, 0))],
        out_specs=pl.BlockSpec((tm, Cp), lambda i: (i, 0)),
        compiler_params=pltpu.CompilerParams(
            dimension_semantics=("parallel",),
            vmem_limit_bytes=32 * 1024 * 1024),
    )(xp, sc, sh)
    if (Mp, Cp) != (M, C):
        out = out[:M, :C]
    return out


# ----------------------------------------------------------------------------
# BatchNorm (train mode, gamma=1 / beta=0) from fused GEMM column statistics
# ----------------------------------------------------------------------------
def _bn_scale_shift(col_sums, col_sqs, count):
    s = sum(col_sums)
    q = sum(col_sqs)
    mean = s / count
    var = jnp.maximum(q / count - mean * mean, 0.0)   # clamp against cancellation
    inv = jax.lax.rsqrt(var + 1e-5)
    return inv, -mean * inv


# ----------------------------------------------------------------------------
# Conv / ConvTranspose blocks (JAX glue around the Pallas GEMM)
# ----------------------------------------------------------------------------
def _im2col_nhwc(x, k, stride, padding):
    """x: (N,H,W,C) -> (N*OH*OW, k*k*C) patches flattened in (kh, kw, C) order."""
    N, H, W, C = x.shape
    if padding:
        x = jnp.pad(x, ((0, 0), (padding, padding), (padding, padding), (0, 0)))
    OH = (H + 2 * padding - k) // stride + 1
    OW = (W + 2 * padding - k) // stride + 1
    cols = []
    for kh in range(k):
        for kw in range(k):
            cols.append(x[:, kh:kh + (OH - 1) * stride + 1:stride,
                          kw:kw + (OW - 1) * stride + 1:stride, :])
    p = jnp.stack(cols, axis=3)                       # (N, OH, OW, k*k, C)
    return p.reshape(N * OH * OW, k * k * C), (N, OH, OW)


def conv_block(x, w, *, stride, padding, bn, act):
    """Conv2d [+ BatchNorm2d(train)] [+ act]; x NHWC, w (Cout, Cin, k, k)."""
    cout, cin, k, _ = w.shape
    x = x.astype(jnp.bfloat16)
    patches, (N, OH, OW) = _im2col_nhwc(x, k, stride, padding)
    w_mat = w.transpose(2, 3, 1, 0).reshape(k * k * cin, cout)   # (kh,kw,Cin) rows
    if bn:
        y, s, q = gemm_pallas(patches, w_mat, act="none", with_stats=True)
        scale, shift = _bn_scale_shift([s], [q], patches.shape[0])
        y = affine_act_pallas(y, scale, shift, act)
    else:
        y = gemm_pallas(patches, w_mat, act=act)          # fused epilogue
    return y.reshape(N, OH, OW, cout)


def _deconv_s2_subpixel(x, w_t, bn, act):
    """ConvTranspose2d(k=4, stride=2, pad=1) as 4 stride-1 2x2 convs, one per
    output phase (dh, dw) -- avoids the 75%-zero dilated im2col entirely."""
    N, H, W, cin = x.shape
    cout = w_t.shape[1]
    x = x.astype(jnp.bfloat16)
    xp = jnp.pad(x, ((0, 0), (1, 1), (1, 1), (0, 0)))
    phase_patches, phase_w = [], []
    for dh in (0, 1):
        for dw in (0, 1):
            xs = xp[:, dh:dh + H + 1, dw:dw + W + 1, :]
            p, _ = _im2col_nhwc(xs, 2, 1, 0)              # (N*H*W, 4*Cin)
            # kernel tap at window position t is w_t[..., 3-d-2t, ...]
            wsub = w_t[:, :, [3 - dh, 1 - dh], :][:, :, :, [3 - dw, 1 - dw]]
            phase_w.append(wsub.transpose(2, 3, 0, 1).reshape(4 * cin, cout))
            phase_patches.append(p)
    if bn:
        ys, sums, sqs = [], [], []
        for p, wm in zip(phase_patches, phase_w):
            y, s, q = gemm_pallas(p, wm, act="none", with_stats=True)
            ys.append(y); sums.append(s); sqs.append(q)
        scale, shift = _bn_scale_shift(sums, sqs, 4 * N * H * W)
        ys = [affine_act_pallas(y, scale, shift, act) for y in ys]
    else:
        ys = [gemm_pallas(p, wm, act=act)
              for p, wm in zip(phase_patches, phase_w)]
    # Interleave the 4 phases: out[:, 2m+dh, 2n+dw, :] = ys[dh*2+dw]
    ys = [y.reshape(N, H, W, cout) for y in ys]
    out = jnp.stack(ys, axis=0).reshape(2, 2, N, H, W, cout)
    out = out.transpose(2, 3, 0, 4, 1, 5).reshape(N, 2 * H, 2 * W, cout)
    return out


def deconv_block(x, w_t, *, stride, padding, bn, act):
    """ConvTranspose2d [+ BN] [+ act]; x NHWC, w_t (Cin, Cout, k, k)."""
    cin, cout, k, _ = w_t.shape
    if stride == 2 and k == 4 and padding == 1:
        return _deconv_s2_subpixel(x, w_t, bn, act)
    # General fallback (only stride=1 reaches here): dilate + flipped-kernel conv.
    N, H, W, C = x.shape
    if stride > 1:
        Hd, Wd = (H - 1) * stride + 1, (W - 1) * stride + 1
        xd = jnp.zeros((N, Hd, Wd, C), x.dtype).at[:, ::stride, ::stride, :].set(x)
    else:
        xd = x
    w_conv = jnp.flip(w_t, axis=(2, 3)).transpose(1, 0, 2, 3)    # (Cout, Cin, k, k)
    return conv_block(xd, w_conv, stride=1, padding=k - 1 - padding, bn=bn, act=act)


# ----------------------------------------------------------------------------
# Generator: parameters + forward
# ----------------------------------------------------------------------------
def init_generator_params(key, nc, ngf, ndf, embedding_dim):
    def w(k, shape):
        return 0.02 * jax.random.normal(k, shape, jnp.float32)

    keys = jax.random.split(key, 10)
    return {
        # encoder Conv2d weights: (Cout, Cin, 4, 4)
        "e1": w(keys[0], (ndf * 2, nc, 4, 4)),
        "e2": w(keys[1], (ndf * 4, ndf * 2, 4, 4)),
        "e3": w(keys[2], (ndf * 8, ndf * 4, 4, 4)),
        "e4": w(keys[3], (ndf * 8, ndf * 8, 4, 4)),
        "e5": w(keys[4], (embedding_dim, ndf * 8, 4, 4)),
        # decoder ConvTranspose2d weights: (Cin, Cout, 4, 4)
        "d1": w(keys[5], (embedding_dim, ngf * 8, 4, 4)),
        "d2": w(keys[6], (ngf * 8, ngf * 4, 4, 4)),
        "d3": w(keys[7], (ngf * 4, ngf * 2, 4, 4)),
        "d4": w(keys[8], (ngf * 2, ngf * 1, 4, 4)),
        "d5": w(keys[9], (ngf * 1, nc, 4, 4)),
    }


def generator_forward(params, x_nchw):
    h = x_nchw.transpose(0, 2, 3, 1)                    # NCHW -> NHWC (once)
    # ---------------- encoder ----------------
    h = conv_block(h, params["e1"], stride=2, padding=1, bn=False, act="lrelu")
    h = conv_block(h, params["e2"], stride=2, padding=1, bn=True, act="lrelu")
    h = conv_block(h, params["e3"], stride=2, padding=1, bn=True, act="lrelu")
    h = conv_block(h, params["e4"], stride=2, padding=1, bn=True, act="lrelu")
    h = conv_block(h, params["e5"], stride=1, padding=0, bn=False, act="none")
    # ---------------- decoder ----------------
    h = deconv_block(h, params["d1"], stride=1, padding=0, bn=True, act="relu")
    h = deconv_block(h, params["d2"], stride=2, padding=1, bn=True, act="relu")
    h = deconv_block(h, params["d3"], stride=2, padding=1, bn=True, act="relu")
    h = deconv_block(h, params["d4"], stride=2, padding=1, bn=True, act="relu")
    h = deconv_block(h, params["d5"], stride=2, padding=1, bn=False, act="tanh")
    return h.transpose(0, 3, 1, 2)                      # back to NCHW


if __name__ == "__main__":
    # Small but architecture-consistent shapes: the encoder downsamples 64 -> 1,
    # so spatial size must be 64 for the final 4x4 valid conv to land on 1x1.
    nc, ngf, ndf, embedding_dim = 3, 4, 4, 8
    batch, spatial = 2, 64

    key = jax.random.PRNGKey(0)
    pkey, xkey = jax.random.split(key)
    params = init_generator_params(pkey, nc, ngf, ndf, embedding_dim)
    x = jax.random.normal(xkey, (batch, nc, spatial, spatial), jnp.float32)

    fwd = jax.jit(functools.partial(generator_forward, params))
    out = fwd(x)
    jax.block_until_ready(out)

    assert out.shape == (batch, nc, spatial, spatial), out.shape
    assert bool(jnp.all(jnp.isfinite(out)))
    print("KERNEL_OK")
</pallas_src>

<mosaic_0001>
module attributes {stable_mosaic.version = 11 : i64} {
  func.func @kernel(%arg0: i32, %arg1: i32, %arg2: i32, %arg3: memref<256x128xbf16, #tpu.memory_space<vmem>>, %arg4: memref<128x128xbf16, #tpu.memory_space<vmem>>, %arg5: memref<256x128xf32, #tpu.memory_space<vmem>>, %arg6: memref<256x128xf32, #tpu.memory_space<vmem>>) attributes {dimension_semantics = [#tpu.dimension_semantics<parallel>, #tpu.dimension_semantics<parallel>, #tpu.dimension_semantics<arbitrary>], iteration_bounds = array<i64: 8, 1, 1>, scalar_prefetch = 0 : i64, scratch_operands = 1 : i64, tpu.core_type = #tpu.core_type<tc>, window_params = [{transform_indices = @transform_0, window_bounds = array<i64: 256, 128>}, {transform_indices = @transform_1, window_bounds = array<i64: 128, 128>}, {transform_indices = @transform_2, window_bounds = array<i64: 256, 128>}]} {
    %c0_i32 = arith.constant 0 : i32
    %0 = arith.cmpi eq, %arg2, %c0_i32 : i32
    %1 = arith.extui %0 : i1 to i32
    %c0_i32_0 = arith.constant 0 : i32
    %2 = arith.cmpi ne, %1, %c0_i32_0 : i32
    scf.if %2 {
      %cst_10 = arith.constant 0.000000e+00 : f32
      %12 = vector.broadcast %cst_10 : f32 to vector<256x128xf32>
      %c0_11 = arith.constant 0 : index
      %c0_12 = arith.constant 0 : index
      %13 = vector.load %arg6[%c0_11, %c0_12] : memref<256x128xf32, #tpu.memory_space<vmem>>, vector<256x128xf32>
      tpu.vector_store %arg6[%c0_11, %c0_12], %12 {strides = array<i32>} : memref<256x128xf32, #tpu.memory_space<vmem>>, vector<256x128xf32>,
    } else {
    }
    %c0 = arith.constant 0 : index
    %c0_1 = arith.constant 0 : index
    %3 = vector.load %arg6[%c0, %c0_1] : memref<256x128xf32, #tpu.memory_space<vmem>>, vector<256x128xf32>
    %c0_2 = arith.constant 0 : index
    %c0_3 = arith.constant 0 : index
    %4 = vector.load %arg3[%c0_2, %c0_3] : memref<256x128xbf16, #tpu.memory_space<vmem>>, vector<256x128xbf16>
    %c0_4 = arith.constant 0 : index
    %c0_5 = arith.constant 0 : index
    %5 = vector.load %arg4[%c0_4, %c0_5] : memref<128x128xbf16, #tpu.memory_space<vmem>>, vector<128x128xbf16>
    %cst = arith.constant dense<0.000000e+00> : vector<256x128xf32>
    %6 = tpu.matmul %4, %5, %cst {dimension_numbers = #tpu.dot_dimension_numbers<[1], [0], [0], [1], [0, 0, 1, 1], [], []>} : vector<256x128xbf16>, vector<128x128xbf16>, vector<256x128xf32> -> vector<256x128xf32>
    %7 = arith.addf %3, %6 : vector<256x128xf32>
    %c0_6 = arith.constant 0 : index
    %c0_7 = arith.constant 0 : index
    %8 = vector.load %arg6[%c0_6, %c0_7] : memref<256x128xf32, #tpu.memory_space<vmem>>, vector<256x128xf32>
    tpu.vector_store %arg6[%c0_6, %c0_7], %7 {strides = array<i32>} : memref<256x128xf32, #tpu.memory_space<vmem>>, vector<256x128xf32>,
    %c0_i32_8 = arith.constant 0 : i32
    %9 = arith.cmpi eq, %arg2, %c0_i32_8 : i32
    %10 = arith.extui %9 : i1 to i32
    %c0_i32_9 = arith.constant 0 : i32
    %11 = arith.cmpi ne, %10, %c0_i32_9 : i32
    scf.if %11 {
      %c0_10 = arith.constant 0 : index
      %c0_11 = arith.constant 0 : index
      %12 = vector.load %arg6[%c0_10, %c0_11] : memref<256x128xf32, #tpu.memory_space<vmem>>, vector<256x128xf32>
      %cst_12 = arith.constant 0.000000e+00 : f32
      %13 = vector.broadcast %cst_12 : f32 to vector<256x128xf32>
      %14 = arith.cmpf ogt, %12, %13 : vector<256x128xf32>
      %cst_13 = arith.constant 2.000000e-01 : f32
      %15 = vector.broadcast %cst_13 : f32 to vector<256x128xf32>
      %16 = arith.mulf %15, %12 : vector<256x128xf32>
      %17 = arith.select %14, %12, %16 : vector<256x128xi1>, vector<256x128xf32>
      %c0_14 = arith.constant 0 : index
      %c0_15 = arith.constant 0 : index
      %18 = vector.load %arg5[%c0_14, %c0_15] : memref<256x128xf32, #tpu.memory_space<vmem>>, vector<256x128xf32>
      tpu.vector_store %arg5[%c0_14, %c0_15], %17 {strides = array<i32>} : memref<256x128xf32, #tpu.memory_space<vmem>>, vector<256x128xf32>,
    } else {
    }
    return
  }
  func.func @transform_0(%arg0: i32, %arg1: i32, %arg2: i32) -> (i32, i32) {
    %c0_i32 = arith.constant 0 : i32
    return %arg0, %arg2 : i32, i32
  }
  func.func @transform_1(%arg0: i32, %arg1: i32, %arg2: i32) -> (i32, i32) {
    %c0_i32 = arith.constant 0 : i32
    return %arg2, %arg1 : i32, i32
  }
  func.func @transform_2(%arg0: i32, %arg1: i32, %arg2: i32) -> (i32, i32) {
    %c0_i32 = arith.constant 0 : i32
    return %arg0, %arg1 : i32, i32
  }
}

module attributes {stable_mosaic.version = 11 : i64} {
  func.func @kernel(%arg0: i32, %arg1: i32, %arg2: i32, %arg3: memref<256x128xbf16, #tpu.memory_space<vmem>>, %arg4: memref<128x128xbf16, #tpu.memory_space<vmem>>, %arg5: memref<256x128xf32, #tpu.memory_space<vmem>>, %arg6: memref<1x8x128xf32, #tpu.memory_space<vmem>>, %arg7: memref<1x8x128xf32, #tpu.memory_space<vmem>>, %arg8: memref<256x128xf32, #tpu.memory_space<vmem>>) attributes {dimension_semantics = [#tpu.dimension_semantics<parallel>, #tpu.dimension_semantics<parallel>, #tpu.dimension_semantics<arbitrary>], iteration_bounds = array<i64: 2, 1, 1>, scalar_prefetch = 0 : i64, scratch_operands = 1 : i64, tpu.core_type = #tpu.core_type<tc>, window_params = [{transform_indices = @transform_0, window_bounds = array<i64: 256, 128>}, {transform_indices = @transform_1, window_bounds = array<i64: 128, 128>}, {transform_indices = @transform_2, window_bounds = array<i64: 256, 128>}, {transform_indices = @transform_3, window_bounds = array<i64: 1, 8, 128>}, {transform_indices = @transform_4, window_bounds = array<i64: 1, 8, 128>}]} {
    %c0_i32 = arith.constant 0 : i32
    %0 = arith.cmpi eq, %arg2, %c0_i32 : i32
    %1 = arith.extui %0 : i1 to i32
    %c0_i32_0 = arith.constant 0 : i32
    %2 = arith.cmpi ne, %1, %c0_i32_0 : i32
    scf.if %2 {
      %cst_10 = arith.constant 0.000000e+00 : f32
      %12 = vector.broadcast %cst_10 : f32 to vector<256x128xf32>
      %c0_11 = arith.constant 0 : index
      %c0_12 = arith.constant 0 : index
      %13 = vector.load %arg8[%c0_11, %c0_12] : memref<256x128xf32, #tpu.memory_space<vmem>>, vector<256x128xf32>
      tpu.vector_store %arg8[%c0_11, %c0_12], %12 {strides = array<i32>} : memref<256x128xf32, #tpu.memory_space<vmem>>, vector<256x128xf32>,
    } else {
    }
    %c0 = arith.constant 0 : index
    %c0_1 = arith.constant 0 : index
    %3 = vector.load %arg8[%c0, %c0_1] : memref<256x128xf32, #tpu.memory_space<vmem>>, vector<256x128xf32>
    %c0_2 = arith.constant 0 : index
    %c0_3 = arith.constant 0 : index
    %4 = vector.load %arg3[%c0_2, %c0_3] : memref<256x128xbf16, #tpu.memory_space<vmem>>, vector<256x128xbf16>
    %c0_4 = arith.constant 0 : index
    %c0_5 = arith.constant 0 : index
    %5 = vector.load %arg4[%c0_4, %c0_5] : memref<128x128xbf16, #tpu.memory_space<vmem>>, vector<128x128xbf16>
    %cst = arith.constant dense<0.000000e+00> : vector<256x128xf32>
    %6 = tpu.matmul %4, %5, %cst {dimension_numbers = #tpu.dot_dimension_numbers<[1], [0], [0], [1], [0, 0, 1, 1], [], []>} : vector<256x128xbf16>, vector<128x128xbf16>, vector<256x128xf32> -> vector<256x128xf32>
    %7 = arith.addf %3, %6 : vector<256x128xf32>
    %c0_6 = arith.constant 0 : index
    %c0_7 = arith.constant 0 : index
    %8 = vector.load %arg8[%c0_6, %c0_7] : memref<256x128xf32, #tpu.memory_space<vmem>>, vector<256x128xf32>
    tpu.vector_store %arg8[%c0_6, %c0_7], %7 {strides = array<i32>} : memref<256x128xf32, #tpu.memory_space<vmem>>, vector<256x128xf32>,
    %c0_i32_8 = arith.constant 0 : i32
    %9 = arith.cmpi eq, %arg2, %c0_i32_8 : i32
    %10 = arith.extui %9 : i1 to i32
    %c0_i32_9 = arith.constant 0 : i32
    %11 = arith.cmpi ne, %10, %c0_i32_9 : i32
    scf.if %11 {
      %c0_10 = arith.constant 0 : index
      %c0_11 = arith.constant 0 : index
      %12 = vector.load %arg8[%c0_10, %c0_11] : memref<256x128xf32, #tpu.memory_space<vmem>>, vector<256x128xf32>
      %cst_12 = arith.constant dense<0.000000e+00> : vector<128xf32>
      %13 = vector.multi_reduction <add>, %12, %cst_12 [0] : vector<256x128xf32> to vector<128xf32>
      %14 = vector.shape_cast %13 : vector<128xf32> to vector<1x128xf32>
      %15 = arith.mulf %12, %12 : vector<256x128xf32>
      %cst_13 = arith.constant dense<0.000000e+00> : vector<128xf32>
      %16 = vector.multi_reduction <add>, %15, %cst_13 [0] : vector<256x128xf32> to vector<128xf32>
      %17 = vector.shape_cast %16 : vector<128xf32> to vector<1x128xf32>
      %18 = vector.shape_cast %14 : vector<1x128xf32> to vector<1x1x128xf32>
      %19 = vector.shape_cast %18 : vector<1x1x128xf32> to vector<1x1x128xf32>
      %20 = vector.broadcast %19 : vector<1x1x128xf32> to vector<1x8x128xf32>
      %c0_14 = arith.constant 0 : index
      %c0_15 = arith.constant 0 : index
      %c0_16 = arith.constant 0 : index
      %21 = vector.load %arg6[%c0_14, %c0_15, %c0_16] : memref<1x8x128xf32, #tpu.memory_space<vmem>>, vector<1x8x128xf32>
      tpu.vector_store %arg6[%c0_14, %c0_15, %c0_16], %20 {strides = array<i32>} : memref<1x8x128xf32, #tpu.memory_space<vmem>>, vector<1x8x128xf32>,
      %22 = vector.shape_cast %17 : vector<1x128xf32> to vector<1x1x128xf32>
      %23 = vector.shape_cast %22 : vector<1x1x128xf32> to vector<1x1x128xf32>
      %24 = vector.broadcast %23 : vector<1x1x128xf32> to vector<1x8x128xf32>
      %c0_17 = arith.constant 0 : index
      %c0_18 = arith.constant 0 : index
      %c0_19 = arith.constant 0 : index
      %25 = vector.load %arg7[%c0_17, %c0_18, %c0_19] : memref<1x8x128xf32, #tpu.memory_space<vmem>>, vector<1x8x128xf32>
      tpu.vector_store %arg7[%c0_17, %c0_18, %c0_19], %24 {strides = array<i32>} : memref<1x8x128xf32, #tpu.memory_space<vmem>>, vector<1x8x128xf32>,
      %c0_20 = arith.constant 0 : index
      %c0_21 = arith.constant 0 : index
      %26 = vector.load %arg5[%c0_20, %c0_21] : memref<256x128xf32, #tpu.memory_space<vmem>>, vector<256x128xf32>
      tpu.vector_store %arg5[%c0_20, %c0_21], %12 {strides = array<i32>} : memref<256x128xf32, #tpu.memory_space<vmem>>, vector<256x128xf32>,
    } else {
    }
    return
  }
  func.func @transform_0(%arg0: i32, %arg1: i32, %arg2: i32) -> (i32, i32) {
    %c0_i32 = arith.constant 0 : i32
    return %arg0, %arg2 : i32, i32
  }
  func.func @transform_1(%arg0: i32, %arg1: i32, %arg2: i32) -> (i32, i32) {
    %c0_i32 = arith.constant 0 : i32
    return %arg2, %arg1 : i32, i32
  }
  func.func @transform_2(%arg0: i32, %arg1: i32, %arg2: i32) -> (i32, i32) {
    %c0_i32 = arith.constant 0 : i32
    return %arg0, %arg1 : i32, i32
  }
  func.func @transform_3(%arg0: i32, %arg1: i32, %arg2: i32) -> (i32, i32, i32) {
    %c0_i32 = arith.constant 0 : i32
    %c0_i32_0 = arith.constant 0 : i32
    return %arg0, %c0_i32, %arg1 : i32, i32, i32
  }
  func.func @transform_4(%arg0: i32, %arg1: i32, %arg2: i32) -> (i32, i32, i32) {
    %c0_i32 = arith.constant 0 : i32
    %c0_i32_0 = arith.constant 0 : i32
    return %arg0, %c0_i32, %arg1 : i32, i32, i32
  }
}

module attributes {stable_mosaic.version = 11 : i64} {
  func.func @kernel(%arg0: i32, %arg1: memref<512x128xf32, #tpu.memory_space<vmem>>, %arg2: memref<1x128xf32, #tpu.memory_space<vmem>>, %arg3: memref<1x128xf32, #tpu.memory_space<vmem>>, %arg4: memref<512x128xf32, #tpu.memory_space<vmem>>) attributes {dimension_semantics = [#tpu.dimension_semantics<parallel>], iteration_bounds = array<i64: 1>, scalar_prefetch = 0 : i64, scratch_operands = 0 : i64, tpu.core_type = #tpu.core_type<tc>, window_params = [{transform_indices = @transform_0, window_bounds = array<i64: 512, 128>}, {pipeline_mode = #tpu.pipeline_mode<synchronous>, transform_indices = @transform_1, window_bounds = array<i64: 1, 128>}, {pipeline_mode = #tpu.pipeline_mode<synchronous>, transform_indices = @transform_2, window_bounds = array<i64: 1, 128>}, {transform_indices = @transform_3, window_bounds = array<i64: 512, 128>}]} {
    %c0 = arith.constant 0 : index
    %c0_0 = arith.constant 0 : index
    %0 = vector.load %arg1[%c0, %c0_0] : memref<512x128xf32, #tpu.memory_space<vmem>>, vector<512x128xf32>
    %c0_1 = arith.constant 0 : index
    %c0_2 = arith.constant 0 : index
    %1 = vector.load %arg2[%c0_1, %c0_2] : memref<1x128xf32, #tpu.memory_space<vmem>>, vector<1x128xf32>
    %2 = vector.broadcast %1 : vector<1x128xf32> to vector<512x128xf32>
    %3 = arith.mulf %0, %2 : vector<512x128xf32>
    %c0_3 = arith.constant 0 : index
    %c0_4 = arith.constant 0 : index
    %4 = vector.load %arg3[%c0_3, %c0_4] : memref<1x128xf32, #tpu.memory_space<vmem>>, vector<1x128xf32>
    %5 = vector.broadcast %4 : vector<1x128xf32> to vector<512x128xf32>
    %6 = arith.addf %3, %5 : vector<512x128xf32>
    %cst = arith.constant 0.000000e+00 : f32
    %7 = vector.broadcast %cst : f32 to vector<512x128xf32>
    %8 = arith.cmpf ogt, %6, %7 : vector<512x128xf32>
    %cst_5 = arith.constant 2.000000e-01 : f32
    %9 = vector.broadcast %cst_5 : f32 to vector<512x128xf32>
    %10 = arith.mulf %9, %6 : vector<512x128xf32>
    %11 = arith.select %8, %6, %10 : vector<512x128xi1>, vector<512x128xf32>
    %c0_6 = arith.constant 0 : index
    %c0_7 = arith.constant 0 : index
    %12 = vector.load %arg4[%c0_6, %c0_7] : memref<512x128xf32, #tpu.memory_space<vmem>>, vector<512x128xf32>
    tpu.vector_store %arg4[%c0_6, %c0_7], %11 {strides = array<i32>} : memref<512x128xf32, #tpu.memory_space<vmem>>, vector<512x128xf32>,
    return
  }
  func.func @transform_0(%arg0: i32) -> (i32, i32) {
    %c0_i32 = arith.constant 0 : i32
    %c0_i32_0 = arith.constant 0 : i32
    return %arg0, %c0_i32 : i32, i32
  }
  func.func @transform_1(%arg0: i32) -> (i32, i32) {
    %c0_i32 = arith.constant 0 : i32
    %c0_i32_0 = arith.constant 0 : i32
    %c0_i32_1 = arith.constant 0 : i32
    return %c0_i32, %c0_i32_0 : i32, i32
  }
  func.func @transform_2(%arg0: i32) -> (i32, i32) {
    %c0_i32 = arith.constant 0 : i32
    %c0_i32_0 = arith.constant 0 : i32
    %c0_i32_1 = arith.constant 0 : i32
    return %c0_i32, %c0_i32_0 : i32, i32
  }
  func.func @transform_3(%arg0: i32) -> (i32, i32) {
    %c0_i32 = arith.constant 0 : i32
    %c0_i32_0 = arith.constant 0 : i32
    return %arg0, %c0_i32 : i32, i32
  }
}

module attributes {stable_mosaic.version = 11 : i64} {
  func.func @kernel(%arg0: i32, %arg1: i32, %arg2: i32, %arg3: memref<128x256xbf16, #tpu.memory_space<vmem>>, %arg4: memref<256x128xbf16, #tpu.memory_space<vmem>>, %arg5: memref<128x128xf32, #tpu.memory_space<vmem>>, %arg6: memref<1x8x128xf32, #tpu.memory_space<vmem>>, %arg7: memref<1x8x128xf32, #tpu.memory_space<vmem>>, %arg8: memref<128x128xf32, #tpu.memory_space<vmem>>) attributes {dimension_semantics = [#tpu.dimension_semantics<parallel>, #tpu.dimension_semantics<parallel>, #tpu.dimension_semantics<arbitrary>], iteration_bounds = array<i64: 1, 1, 1>, scalar_prefetch = 0 : i64, scratch_operands = 1 : i64, tpu.core_type = #tpu.core_type<tc>, window_params = [{transform_indices = @transform_0, window_bounds = array<i64: 128, 256>}, {transform_indices = @transform_1, window_bounds = array<i64: 256, 128>}, {transform_indices = @transform_2, window_bounds = array<i64: 128, 128>}, {transform_indices = @transform_3, window_bounds = array<i64: 1, 8, 128>}, {transform_indices = @transform_4, window_bounds = array<i64: 1, 8, 128>}]} {
    %c0_i32 = arith.constant 0 : i32
    %0 = arith.cmpi eq, %arg2, %c0_i32 : i32
    %1 = arith.extui %0 : i1 to i32
    %c0_i32_0 = arith.constant 0 : i32
    %2 = arith.cmpi ne, %1, %c0_i32_0 : i32
    scf.if %2 {
      %cst_10 = arith.constant 0.000000e+00 : f32
      %12 = vector.broadcast %cst_10 : f32 to vector<128x128xf32>
      %c0_11 = arith.constant 0 : index
      %c0_12 = arith.constant 0 : index
      %13 = vector.load %arg8[%c0_11, %c0_12] : memref<128x128xf32, #tpu.memory_space<vmem>>, vector<128x128xf32>
      tpu.vector_store %arg8[%c0_11, %c0_12], %12 {strides = array<i32>} : memref<128x128xf32, #tpu.memory_space<vmem>>, vector<128x128xf32>,
    } else {
    }
    %c0 = arith.constant 0 : index
    %c0_1 = arith.constant 0 : index
    %3 = vector.load %arg8[%c0, %c0_1] : memref<128x128xf32, #tpu.memory_space<vmem>>, vector<128x128xf32>
    %c0_2 = arith.constant 0 : index
    %c0_3 = arith.constant 0 : index
    %4 = vector.load %arg3[%c0_2, %c0_3] : memref<128x256xbf16, #tpu.memory_space<vmem>>, vector<128x256xbf16>
    %c0_4 = arith.constant 0 : index
    %c0_5 = arith.constant 0 : index
    %5 = vector.load %arg4[%c0_4, %c0_5] : memref<256x128xbf16, #tpu.memory_space<vmem>>, vector<256x128xbf16>
    %cst = arith.constant dense<0.000000e+00> : vector<128x128xf32>
    %6 = tpu.matmul %4, %5, %cst {dimension_numbers = #tpu.dot_dimension_numbers<[1], [0], [0], [1], [0, 0, 1, 1], [], []>} : vector<128x256xbf16>, vector<256x128xbf16>, vector<128x128xf32> -> vector<128x128xf32>
    %7 = arith.addf %3, %6 : vector<128x128xf32>
    %c0_6 = arith.constant 0 : index
    %c0_7 = arith.constant 0 : index
    %8 = vector.load %arg8[%c0_6, %c0_7] : memref<128x128xf32, #tpu.memory_space<vmem>>, vector<128x128xf32>
    tpu.vector_store %arg8[%c0_6, %c0_7], %7 {strides = array<i32>} : memref<128x128xf32, #tpu.memory_space<vmem>>, vector<128x128xf32>,
    %c0_i32_8 = arith.constant 0 : i32
    %9 = arith.cmpi eq, %arg2, %c0_i32_8 : i32
    %10 = arith.extui %9 : i1 to i32
    %c0_i32_9 = arith.constant 0 : i32
    %11 = arith.cmpi ne, %10, %c0_i32_9 : i32
    scf.if %11 {
      %c0_10 = arith.constant 0 : index
      %c0_11 = arith.constant 0 : index
      %12 = vector.load %arg8[%c0_10, %c0_11] : memref<128x128xf32, #tpu.memory_space<vmem>>, vector<128x128xf32>
      %cst_12 = arith.constant dense<0.000000e+00> : vector<128xf32>
      %13 = vector.multi_reduction <add>, %12, %cst_12 [0] : vector<128x128xf32> to vector<128xf32>
      %14 = vector.shape_cast %13 : vector<128xf32> to vector<1x128xf32>
      %15 = arith.mulf %12, %12 : vector<128x128xf32>
      %cst_13 = arith.constant dense<0.000000e+00> : vector<128xf32>
      %16 = vector.multi_reduction <add>, %15, %cst_13 [0] : vector<128x128xf32> to vector<128xf32>
      %17 = vector.shape_cast %16 : vector<128xf32> to vector<1x128xf32>
      %18 = vector.shape_cast %14 : vector<1x128xf32> to vector<1x1x128xf32>
      %19 = vector.shape_cast %18 : vector<1x1x128xf32> to vector<1x1x128xf32>
      %20 = vector.broadcast %19 : vector<1x1x128xf32> to vector<1x8x128xf32>
      %c0_14 = arith.constant 0 : index
      %c0_15 = arith.constant 0 : index
      %c0_16 = arith.constant 0 : index
      %21 = vector.load %arg6[%c0_14, %c0_15, %c0_16] : memref<1x8x128xf32, #tpu.memory_space<vmem>>, vector<1x8x128xf32>
      tpu.vector_store %arg6[%c0_14, %c0_15, %c0_16], %20 {strides = array<i32>} : memref<1x8x128xf32, #tpu.memory_space<vmem>>, vector<1x8x128xf32>,
      %22 = vector.shape_cast %17 : vector<1x128xf32> to vector<1x1x128xf32>
      %23 = vector.shape_cast %22 : vector<1x1x128xf32> to vector<1x1x128xf32>
      %24 = vector.broadcast %23 : vector<1x1x128xf32> to vector<1x8x128xf32>
      %c0_17 = arith.constant 0 : index
      %c0_18 = arith.constant 0 : index
      %c0_19 = arith.constant 0 : index
      %25 = vector.load %arg7[%c0_17, %c0_18, %c0_19] : memref<1x8x128xf32, #tpu.memory_space<vmem>>, vector<1x8x128xf32>
      tpu.vector_store %arg7[%c0_17, %c0_18, %c0_19], %24 {strides = array<i32>} : memref<1x8x128xf32, #tpu.memory_space<vmem>>, vector<1x8x128xf32>,
      %c0_20 = arith.constant 0 : index
      %c0_21 = arith.constant 0 : index
      %26 = vector.load %arg5[%c0_20, %c0_21] : memref<128x128xf32, #tpu.memory_space<vmem>>, vector<128x128xf32>
      tpu.vector_store %arg5[%c0_20, %c0_21], %12 {strides = array<i32>} : memref<128x128xf32, #tpu.memory_space<vmem>>, vector<128x128xf32>,
    } else {
    }
    return
  }
  func.func @transform_0(%arg0: i32, %arg1: i32, %arg2: i32) -> (i32, i32) {
    %c0_i32 = arith.constant 0 : i32
    return %arg0, %arg2 : i32, i32
  }
  func.func @transform_1(%arg0: i32, %arg1: i32, %arg2: i32) -> (i32, i32) {
    %c0_i32 = arith.constant 0 : i32
    return %arg2, %arg1 : i32, i32
  }
  func.func @transform_2(%arg0: i32, %arg1: i32, %arg2: i32) -> (i32, i32) {
    %c0_i32 = arith.constant 0 : i32
    return %arg0, %arg1 : i32, i32
  }
  func.func @transform_3(%arg0: i32, %arg1: i32, %arg2: i32) -> (i32, i32, i32) {
    %c0_i32 = arith.constant 0 : i32
    %c0_i32_0 = arith.constant 0 : i32
    return %arg0, %c0_i32, %arg1 : i32, i32, i32
  }
  func.func @transform_4(%arg0: i32, %arg1: i32, %arg2: i32) -> (i32, i32, i32) {
    %c0_i32 = arith.constant 0 : i32
    %c0_i32_0 = arith.constant 0 : i32
    return %arg0, %c0_i32, %arg1 : i32, i32, i32
  }
}

module attributes {stable_mosaic.version = 11 : i64} {
  func.func @kernel(%arg0: i32, %arg1: memref<128x128xf32, #tpu.memory_space<vmem>>, %arg2: memref<1x128xf32, #tpu.memory_space<vmem>>, %arg3: memref<1x128xf32, #tpu.memory_space<vmem>>, %arg4: memref<128x128xf32, #tpu.memory_space<vmem>>) attributes {dimension_semantics = [#tpu.dimension_semantics<parallel>], iteration_bounds = array<i64: 1>, scalar_prefetch = 0 : i64, scratch_operands = 0 : i64, tpu.core_type = #tpu.core_type<tc>, window_params = [{transform_indices = @transform_0, window_bounds = array<i64: 128, 128>}, {pipeline_mode = #tpu.pipeline_mode<synchronous>, transform_indices = @transform_1, window_bounds = array<i64: 1, 128>}, {pipeline_mode = #tpu.pipeline_mode<synchronous>, transform_indices = @transform_2, window_bounds = array<i64: 1, 128>}, {transform_indices = @transform_3, window_bounds = array<i64: 128, 128>}]} {
    %c0 = arith.constant 0 : index
    %c0_0 = arith.constant 0 : index
    %0 = vector.load %arg1[%c0, %c0_0] : memref<128x128xf32, #tpu.memory_space<vmem>>, vector<128x128xf32>
    %c0_1 = arith.constant 0 : index
    %c0_2 = arith.constant 0 : index
    %1 = vector.load %arg2[%c0_1, %c0_2] : memref<1x128xf32, #tpu.memory_space<vmem>>, vector<1x128xf32>
    %2 = vector.broadcast %1 : vector<1x128xf32> to vector<128x128xf32>
    %3 = arith.mulf %0, %2 : vector<128x128xf32>
    %c0_3 = arith.constant 0 : index
    %c0_4 = arith.constant 0 : index
    %4 = vector.load %arg3[%c0_3, %c0_4] : memref<1x128xf32, #tpu.memory_space<vmem>>, vector<1x128xf32>
    %5 = vector.broadcast %4 : vector<1x128xf32> to vector<128x128xf32>
    %6 = arith.addf %3, %5 : vector<128x128xf32>
    %cst = arith.constant 0.000000e+00 : f32
    %7 = vector.broadcast %cst : f32 to vector<128x128xf32>
    %8 = arith.cmpf ogt, %6, %7 : vector<128x128xf32>
    %cst_5 = arith.constant 2.000000e-01 : f32
    %9 = vector.broadcast %cst_5 : f32 to vector<128x128xf32>
    %10 = arith.mulf %9, %6 : vector<128x128xf32>
    %11 = arith.select %8, %6, %10 : vector<128x128xi1>, vector<128x128xf32>
    %c0_6 = arith.constant 0 : index
    %c0_7 = arith.constant 0 : index
    %12 = vector.load %arg4[%c0_6, %c0_7] : memref<128x128xf32, #tpu.memory_space<vmem>>, vector<128x128xf32>
    tpu.vector_store %arg4[%c0_6, %c0_7], %11 {strides = array<i32>} : memref<128x128xf32, #tpu.memory_space<vmem>>, vector<128x128xf32>,
    return
  }
  func.func @transform_0(%arg0: i32) -> (i32, i32) {
    %c0_i32 = arith.constant 0 : i32
    %c0_i32_0 = arith.constant 0 : i32
    return %arg0, %c0_i32 : i32, i32
  }
  func.func @transform_1(%arg0: i32) -> (i32, i32) {
    %c0_i32 = arith.constant 0 : i32
    %c0_i32_0 = arith.constant 0 : i32
    %c0_i32_1 = arith.constant 0 : i32
    return %c0_i32, %c0_i32_0 : i32, i32
  }
  func.func @transform_2(%arg0: i32) -> (i32, i32) {
    %c0_i32 = arith.constant 0 : i32
    %c0_i32_0 = arith.constant 0 : i32
    %c0_i32_1 = arith.constant 0 : i32
    return %c0_i32, %c0_i32_0 : i32, i32
  }
  func.func @transform_3(%arg0: i32) -> (i32, i32) {
    %c0_i32 = arith.constant 0 : i32
    %c0_i32_0 = arith.constant 0 : i32
    return %arg0, %c0_i32 : i32, i32
  }
}

module attributes {stable_mosaic.version = 11 : i64} {
  func.func @kernel(%arg0: i32, %arg1: i32, %arg2: i32, %arg3: memref<32x512xbf16, #tpu.memory_space<vmem>>, %arg4: memref<512x128xbf16, #tpu.memory_space<vmem>>, %arg5: memref<32x128xf32, #tpu.memory_space<vmem>>, %arg6: memref<1x8x128xf32, #tpu.memory_space<vmem>>, %arg7: memref<1x8x128xf32, #tpu.memory_space<vmem>>, %arg8: memref<32x128xf32, #tpu.memory_space<vmem>>) attributes {dimension_semantics = [#tpu.dimension_semantics<parallel>, #tpu.dimension_semantics<parallel>, #tpu.dimension_semantics<arbitrary>], iteration_bounds = array<i64: 1, 1, 1>, scalar_prefetch = 0 : i64, scratch_operands = 1 : i64, tpu.core_type = #tpu.core_type<tc>, window_params = [{transform_indices = @transform_0, window_bounds = array<i64: 32, 512>}, {transform_indices = @transform_1, window_bounds = array<i64: 512, 128>}, {transform_indices = @transform_2, window_bounds = array<i64: 32, 128>}, {transform_indices = @transform_3, window_bounds = array<i64: 1, 8, 128>}, {transform_indices = @transform_4, window_bounds = array<i64: 1, 8, 128>}]} {
    %c0_i32 = arith.constant 0 : i32
    %0 = arith.cmpi eq, %arg2, %c0_i32 : i32
    %1 = arith.extui %0 : i1 to i32
    %c0_i32_0 = arith.constant 0 : i32
    %2 = arith.cmpi ne, %1, %c0_i32_0 : i32
    scf.if %2 {
      %cst_10 = arith.constant 0.000000e+00 : f32
      %12 = vector.broadcast %cst_10 : f32 to vector<32x128xf32>
      %c0_11 = arith.constant 0 : index
      %c0_12 = arith.constant 0 : index
      %13 = vector.load %arg8[%c0_11, %c0_12] : memref<32x128xf32, #tpu.memory_space<vmem>>, vector<32x128xf32>
      tpu.vector_store %arg8[%c0_11, %c0_12], %12 {strides = array<i32>} : memref<32x128xf32, #tpu.memory_space<vmem>>, vector<32x128xf32>,
    } else {
    }
    %c0 = arith.constant 0 : index
    %c0_1 = arith.constant 0 : index
    %3 = vector.load %arg8[%c0, %c0_1] : memref<32x128xf32, #tpu.memory_space<vmem>>, vector<32x128xf32>
    %c0_2 = arith.constant 0 : index
    %c0_3 = arith.constant 0 : index
    %4 = vector.load %arg3[%c0_2, %c0_3] : memref<32x512xbf16, #tpu.memory_space<vmem>>, vector<32x512xbf16>
    %c0_4 = arith.constant 0 : index
    %c0_5 = arith.constant 0 : index
    %5 = vector.load %arg4[%c0_4, %c0_5] : memref<512x128xbf16, #tpu.memory_space<vmem>>, vector<512x128xbf16>
    %cst = arith.constant dense<0.000000e+00> : vector<32x128xf32>
    %6 = tpu.matmul %4, %5, %cst {dimension_numbers = #tpu.dot_dimension_numbers<[1], [0], [0], [1], [0, 0, 1, 1], [], []>} : vector<32x512xbf16>, vector<512x128xbf16>, vector<32x128xf32> -> vector<32x128xf32>
    %7 = arith.addf %3, %6 : vector<32x128xf32>
    %c0_6 = arith.constant 0 : index
    %c0_7 = arith.constant 0 : index
    %8 = vector.load %arg8[%c0_6, %c0_7] : memref<32x128xf32, #tpu.memory_space<vmem>>, vector<32x128xf32>
    tpu.vector_store %arg8[%c0_6, %c0_7], %7 {strides = array<i32>} : memref<32x128xf32, #tpu.memory_space<vmem>>, vector<32x128xf32>,
    %c0_i32_8 = arith.constant 0 : i32
    %9 = arith.cmpi eq, %arg2, %c0_i32_8 : i32
    %10 = arith.extui %9 : i1 to i32
    %c0_i32_9 = arith.constant 0 : i32
    %11 = arith.cmpi ne, %10, %c0_i32_9 : i32
    scf.if %11 {
      %c0_10 = arith.constant 0 : index
      %c0_11 = arith.constant 0 : index
      %12 = vector.load %arg8[%c0_10, %c0_11] : memref<32x128xf32, #tpu.memory_space<vmem>>, vector<32x128xf32>
      %cst_12 = arith.constant dense<0.000000e+00> : vector<128xf32>
      %13 = vector.multi_reduction <add>, %12, %cst_12 [0] : vector<32x128xf32> to vector<128xf32>
      %14 = vector.shape_cast %13 : vector<128xf32> to vector<1x128xf32>
      %15 = arith.mulf %12, %12 : vector<32x128xf32>
      %cst_13 = arith.constant dense<0.000000e+00> : vector<128xf32>
      %16 = vector.multi_reduction <add>, %15, %cst_13 [0] : vector<32x128xf32> to vector<128xf32>
      %17 = vector.shape_cast %16 : vector<128xf32> to vector<1x128xf32>
      %18 = vector.shape_cast %14 : vector<1x128xf32> to vector<1x1x128xf32>
      %19 = vector.shape_cast %18 : vector<1x1x128xf32> to vector<1x1x128xf32>
      %20 = vector.broadcast %19 : vector<1x1x128xf32> to vector<1x8x128xf32>
      %c0_14 = arith.constant 0 : index
      %c0_15 = arith.constant 0 : index
      %c0_16 = arith.constant 0 : index
      %21 = vector.load %arg6[%c0_14, %c0_15, %c0_16] : memref<1x8x128xf32, #tpu.memory_space<vmem>>, vector<1x8x128xf32>
      tpu.vector_store %arg6[%c0_14, %c0_15, %c0_16], %20 {strides = array<i32>} : memref<1x8x128xf32, #tpu.memory_space<vmem>>, vector<1x8x128xf32>,
      %22 = vector.shape_cast %17 : vector<1x128xf32> to vector<1x1x128xf32>
      %23 = vector.shape_cast %22 : vector<1x1x128xf32> to vector<1x1x128xf32>
      %24 = vector.broadcast %23 : vector<1x1x128xf32> to vector<1x8x128xf32>
      %c0_17 = arith.constant 0 : index
      %c0_18 = arith.constant 0 : index
      %c0_19 = arith.constant 0 : index
      %25 = vector.load %arg7[%c0_17, %c0_18, %c0_19] : memref<1x8x128xf32, #tpu.memory_space<vmem>>, vector<1x8x128xf32>
      tpu.vector_store %arg7[%c0_17, %c0_18, %c0_19], %24 {strides = array<i32>} : memref<1x8x128xf32, #tpu.memory_space<vmem>>, vector<1x8x128xf32>,
      %c0_20 = arith.constant 0 : index
      %c0_21 = arith.constant 0 : index
      %26 = vector.load %arg5[%c0_20, %c0_21] : memref<32x128xf32, #tpu.memory_space<vmem>>, vector<32x128xf32>
      tpu.vector_store %arg5[%c0_20, %c0_21], %12 {strides = array<i32>} : memref<32x128xf32, #tpu.memory_space<vmem>>, vector<32x128xf32>,
    } else {
    }
    return
  }
  func.func @transform_0(%arg0: i32, %arg1: i32, %arg2: i32) -> (i32, i32) {
    %c0_i32 = arith.constant 0 : i32
    return %arg0, %arg2 : i32, i32
  }
  func.func @transform_1(%arg0: i32, %arg1: i32, %arg2: i32) -> (i32, i32) {
    %c0_i32 = arith.constant 0 : i32
    return %arg2, %arg1 : i32, i32
  }
  func.func @transform_2(%arg0: i32, %arg1: i32, %arg2: i32) -> (i32, i32) {
    %c0_i32 = arith.constant 0 : i32
    return %arg0, %arg1 : i32, i32
  }
  func.func @transform_3(%arg0: i32, %arg1: i32, %arg2: i32) -> (i32, i32, i32) {
    %c0_i32 = arith.constant 0 : i32
    %c0_i32_0 = arith.constant 0 : i32
    return %arg0, %c0_i32, %arg1 : i32, i32, i32
  }
  func.func @transform_4(%arg0: i32, %arg1: i32, %arg2: i32) -> (i32, i32, i32) {
    %c0_i32 = arith.constant 0 : i32
    %c0_i32_0 = arith.constant 0 : i32
    return %arg0, %c0_i32, %arg1 : i32, i32, i32
  }
}

module attributes {stable_mosaic.version = 11 : i64} {
  func.func @kernel(%arg0: i32, %arg1: memref<32x128xf32, #tpu.memory_space<vmem>>, %arg2: memref<1x128xf32, #tpu.memory_space<vmem>>, %arg3: memref<1x128xf32, #tpu.memory_space<vmem>>, %arg4: memref<32x128xf32, #tpu.memory_space<vmem>>) attributes {dimension_semantics = [#tpu.dimension_semantics<parallel>], iteration_bounds = array<i64: 1>, scalar_prefetch = 0 : i64, scratch_operands = 0 : i64, tpu.core_type = #tpu.core_type<tc>, window_params = [{transform_indices = @transform_0, window_bounds = array<i64: 32, 128>}, {pipeline_mode = #tpu.pipeline_mode<synchronous>, transform_indices = @transform_1, window_bounds = array<i64: 1, 128>}, {pipeline_mode = #tpu.pipeline_mode<synchronous>, transform_indices = @transform_2, window_bounds = array<i64: 1, 128>}, {transform_indices = @transform_3, window_bounds = array<i64: 32, 128>}]} {
    %c0 = arith.constant 0 : index
    %c0_0 = arith.constant 0 : index
    %0 = vector.load %arg1[%c0, %c0_0] : memref<32x128xf32, #tpu.memory_space<vmem>>, vector<32x128xf32>
    %c0_1 = arith.constant 0 : index
    %c0_2 = arith.constant 0 : index
    %1 = vector.load %arg2[%c0_1, %c0_2] : memref<1x128xf32, #tpu.memory_space<vmem>>, vector<1x128xf32>
    %2 = vector.broadcast %1 : vector<1x128xf32> to vector<32x128xf32>
    %3 = arith.mulf %0, %2 : vector<32x128xf32>
    %c0_3 = arith.constant 0 : index
    %c0_4 = arith.constant 0 : index
    %4 = vector.load %arg3[%c0_3, %c0_4] : memref<1x128xf32, #tpu.memory_space<vmem>>, vector<1x128xf32>
    %5 = vector.broadcast %4 : vector<1x128xf32> to vector<32x128xf32>
    %6 = arith.addf %3, %5 : vector<32x128xf32>
    %cst = arith.constant 0.000000e+00 : f32
    %7 = vector.broadcast %cst : f32 to vector<32x128xf32>
    %8 = arith.cmpf ogt, %6, %7 : vector<32x128xf32>
    %cst_5 = arith.constant 2.000000e-01 : f32
    %9 = vector.broadcast %cst_5 : f32 to vector<32x128xf32>
    %10 = arith.mulf %9, %6 : vector<32x128xf32>
    %11 = arith.select %8, %6, %10 : vector<32x128xi1>, vector<32x128xf32>
    %c0_6 = arith.constant 0 : index
    %c0_7 = arith.constant 0 : index
    %12 = vector.load %arg4[%c0_6, %c0_7] : memref<32x128xf32, #tpu.memory_space<vmem>>, vector<32x128xf32>
    tpu.vector_store %arg4[%c0_6, %c0_7], %11 {strides = array<i32>} : memref<32x128xf32, #tpu.memory_space<vmem>>, vector<32x128xf32>,
    return
  }
  func.func @transform_0(%arg0: i32) -> (i32, i32) {
    %c0_i32 = arith.constant 0 : i32
    %c0_i32_0 = arith.constant 0 : i32
    return %arg0, %c0_i32 : i32, i32
  }
  func.func @transform_1(%arg0: i32) -> (i32, i32) {
    %c0_i32 = arith.constant 0 : i32
    %c0_i32_0 = arith.constant 0 : i32
    %c0_i32_1 = arith.constant 0 : i32
    return %c0_i32, %c0_i32_0 : i32, i32
  }
  func.func @transform_2(%arg0: i32) -> (i32, i32) {
    %c0_i32 = arith.constant 0 : i32
    %c0_i32_0 = arith.constant 0 : i32
    %c0_i32_1 = arith.constant 0 : i32
    return %c0_i32, %c0_i32_0 : i32, i32
  }
  func.func @transform_3(%arg0: i32) -> (i32, i32) {
    %c0_i32 = arith.constant 0 : i32
    %c0_i32_0 = arith.constant 0 : i32
    return %arg0, %c0_i32 : i32, i32
  }
}

module attributes {stable_mosaic.version = 11 : i64} {
  func.func @kernel(%arg0: i32, %arg1: i32, %arg2: i32, %arg3: memref<8x512xbf16, #tpu.memory_space<vmem>>, %arg4: memref<512x128xbf16, #tpu.memory_space<vmem>>, %arg5: memref<8x128xf32, #tpu.memory_space<vmem>>, %arg6: memref<8x128xf32, #tpu.memory_space<vmem>>) attributes {dimension_semantics = [#tpu.dimension_semantics<parallel>, #tpu.dimension_semantics<parallel>, #tpu.dimension_semantics<arbitrary>], iteration_bounds = array<i64: 1, 1, 1>, scalar_prefetch = 0 : i64, scratch_operands = 1 : i64, tpu.core_type = #tpu.core_type<tc>, window_params = [{transform_indices = @transform_0, window_bounds = array<i64: 8, 512>}, {transform_indices = @transform_1, window_bounds = array<i64: 512, 128>}, {transform_indices = @transform_2, window_bounds = array<i64: 8, 128>}]} {
    %c0_i32 = arith.constant 0 : i32
    %0 = arith.cmpi eq, %arg2, %c0_i32 : i32
    %1 = arith.extui %0 : i1 to i32
    %c0_i32_0 = arith.constant 0 : i32
    %2 = arith.cmpi ne, %1, %c0_i32_0 : i32
    scf.if %2 {
      %cst_10 = arith.constant 0.000000e+00 : f32
      %12 = vector.broadcast %cst_10 : f32 to vector<8x128xf32>
      %c0_11 = arith.constant 0 : index
      %c0_12 = arith.constant 0 : index
      %13 = vector.load %arg6[%c0_11, %c0_12] : memref<8x128xf32, #tpu.memory_space<vmem>>, vector<8x128xf32>
      tpu.vector_store %arg6[%c0_11, %c0_12], %12 {strides = array<i32>} : memref<8x128xf32, #tpu.memory_space<vmem>>, vector<8x128xf32>,
    } else {
    }
    %c0 = arith.constant 0 : index
    %c0_1 = arith.constant 0 : index
    %3 = vector.load %arg6[%c0, %c0_1] : memref<8x128xf32, #tpu.memory_space<vmem>>, vector<8x128xf32>
    %c0_2 = arith.constant 0 : index
    %c0_3 = arith.constant 0 : index
    %4 = vector.load %arg3[%c0_2, %c0_3] : memref<8x512xbf16, #tpu.memory_space<vmem>>, vector<8x512xbf16>
    %c0_4 = arith.constant 0 : index
    %c0_5 = arith.constant 0 : index
    %5 = vector.load %arg4[%c0_4, %c0_5] : memref<512x128xbf16, #tpu.memory_space<vmem>>, vector<512x128xbf16>
    %cst = arith.constant dense<0.000000e+00> : vector<8x128xf32>
    %6 = tpu.matmul %4, %5, %cst {dimension_numbers = #tpu.dot_dimension_numbers<[1], [0], [0], [1], [0, 0, 1, 1], [], []>} : vector<8x512xbf16>, vector<512x128xbf16>, vector<8x128xf32> -> vector<8x128xf32>
    %7 = arith.addf %3, %6 : vector<8x128xf32>
    %c0_6 = arith.constant 0 : index
    %c0_7 = arith.constant 0 : index
    %8 = vector.load %arg6[%c0_6, %c0_7] : memref<8x128xf32, #tpu.memory_space<vmem>>, vector<8x128xf32>
    tpu.vector_store %arg6[%c0_6, %c0_7], %7 {strides = array<i32>} : memref<8x128xf32, #tpu.memory_space<vmem>>, vector<8x128xf32>,
    %c0_i32_8 = arith.constant 0 : i32
    %9 = arith.cmpi eq, %arg2, %c0_i32_8 : i32
    %10 = arith.extui %9 : i1 to i32
    %c0_i32_9 = arith.constant 0 : i32
    %11 = arith.cmpi ne, %10, %c0_i32_9 : i32
    scf.if %11 {
      %c0_10 = arith.constant 0 : index
      %c0_11 = arith.constant 0 : index
      %12 = vector.load %arg6[%c0_10, %c0_11] : memref<8x128xf32, #tpu.memory_space<vmem>>, vector<8x128xf32>
      %c0_12 = arith.constant 0 : index
      %c0_13 = arith.constant 0 : index
      %13 = vector.load %arg5[%c0_12, %c0_13] : memref<8x128xf32, #tpu.memory_space<vmem>>, vector<8x128xf32>
      tpu.vector_store %arg5[%c0_12, %c0_13], %12 {strides = array<i32>} : memref<8x128xf32, #tpu.memory_space<vmem>>, vector<8x128xf32>,
    } else {
    }
    return
  }
  func.func @transform_0(%arg0: i32, %arg1: i32, %arg2: i32) -> (i32, i32) {
    %c0_i32 = arith.constant 0 : i32
    return %arg0, %arg2 : i32, i32
  }
  func.func @transform_1(%arg0: i32, %arg1: i32, %arg2: i32) -> (i32, i32) {
    %c0_i32 = arith.constant 0 : i32
    return %arg2, %arg1 : i32, i32
  }
  func.func @transform_2(%arg0: i32, %arg1: i32, %arg2: i32) -> (i32, i32) {
    %c0_i32 = arith.constant 0 : i32
    return %arg0, %arg1 : i32, i32
  }
}

module attributes {stable_mosaic.version = 11 : i64} {
  func.func @kernel(%arg0: i32, %arg1: i32, %arg2: i32, %arg3: memref<32x128xbf16, #tpu.memory_space<vmem>>, %arg4: memref<128x128xbf16, #tpu.memory_space<vmem>>, %arg5: memref<32x128xf32, #tpu.memory_space<vmem>>, %arg6: memref<1x8x128xf32, #tpu.memory_space<vmem>>, %arg7: memref<1x8x128xf32, #tpu.memory_space<vmem>>, %arg8: memref<32x128xf32, #tpu.memory_space<vmem>>) attributes {dimension_semantics = [#tpu.dimension_semantics<parallel>, #tpu.dimension_semantics<parallel>, #tpu.dimension_semantics<arbitrary>], iteration_bounds = array<i64: 1, 1, 1>, scalar_prefetch = 0 : i64, scratch_operands = 1 : i64, tpu.core_type = #tpu.core_type<tc>, window_params = [{transform_indices = @transform_0, window_bounds = array<i64: 32, 128>}, {transform_indices = @transform_1, window_bounds = array<i64: 128, 128>}, {transform_indices = @transform_2, window_bounds = array<i64: 32, 128>}, {transform_indices = @transform_3, window_bounds = array<i64: 1, 8, 128>}, {transform_indices = @transform_4, window_bounds = array<i64: 1, 8, 128>}]} {
    %c0_i32 = arith.constant 0 : i32
    %0 = arith.cmpi eq, %arg2, %c0_i32 : i32
    %1 = arith.extui %0 : i1 to i32
    %c0_i32_0 = arith.constant 0 : i32
    %2 = arith.cmpi ne, %1, %c0_i32_0 : i32
    scf.if %2 {
      %cst_10 = arith.constant 0.000000e+00 : f32
      %12 = vector.broadcast %cst_10 : f32 to vector<32x128xf32>
      %c0_11 = arith.constant 0 : index
      %c0_12 = arith.constant 0 : index
      %13 = vector.load %arg8[%c0_11, %c0_12] : memref<32x128xf32, #tpu.memory_space<vmem>>, vector<32x128xf32>
      tpu.vector_store %arg8[%c0_11, %c0_12], %12 {strides = array<i32>} : memref<32x128xf32, #tpu.memory_space<vmem>>, vector<32x128xf32>,
    } else {
    }
    %c0 = arith.constant 0 : index
    %c0_1 = arith.constant 0 : index
    %3 = vector.load %arg8[%c0, %c0_1] : memref<32x128xf32, #tpu.memory_space<vmem>>, vector<32x128xf32>
    %c0_2 = arith.constant 0 : index
    %c0_3 = arith.constant 0 : index
    %4 = vector.load %arg3[%c0_2, %c0_3] : memref<32x128xbf16, #tpu.memory_space<vmem>>, vector<32x128xbf16>
    %c0_4 = arith.constant 0 : index
    %c0_5 = arith.constant 0 : index
    %5 = vector.load %arg4[%c0_4, %c0_5] : memref<128x128xbf16, #tpu.memory_space<vmem>>, vector<128x128xbf16>
    %cst = arith.constant dense<0.000000e+00> : vector<32x128xf32>
    %6 = tpu.matmul %4, %5, %cst {dimension_numbers = #tpu.dot_dimension_numbers<[1], [0], [0], [1], [0, 0, 1, 1], [], []>} : vector<32x128xbf16>, vector<128x128xbf16>, vector<32x128xf32> -> vector<32x128xf32>
    %7 = arith.addf %3, %6 : vector<32x128xf32>
    %c0_6 = arith.constant 0 : index
    %c0_7 = arith.constant 0 : index
    %8 = vector.load %arg8[%c0_6, %c0_7] : memref<32x128xf32, #tpu.memory_space<vmem>>, vector<32x128xf32>
    tpu.vector_store %arg8[%c0_6, %c0_7], %7 {strides = array<i32>} : memref<32x128xf32, #tpu.memory_space<vmem>>, vector<32x128xf32>,
    %c0_i32_8 = arith.constant 0 : i32
    %9 = arith.cmpi eq, %arg2, %c0_i32_8 : i32
    %10 = arith.extui %9 : i1 to i32
    %c0_i32_9 = arith.constant 0 : i32
    %11 = arith.cmpi ne, %10, %c0_i32_9 : i32
    scf.if %11 {
      %c0_10 = arith.constant 0 : index
      %c0_11 = arith.constant 0 : index
      %12 = vector.load %arg8[%c0_10, %c0_11] : memref<32x128xf32, #tpu.memory_space<vmem>>, vector<32x128xf32>
      %cst_12 = arith.constant dense<0.000000e+00> : vector<128xf32>
      %13 = vector.multi_reduction <add>, %12, %cst_12 [0] : vector<32x128xf32> to vector<128xf32>
      %14 = vector.shape_cast %13 : vector<128xf32> to vector<1x128xf32>
      %15 = arith.mulf %12, %12 : vector<32x128xf32>
      %cst_13 = arith.constant dense<0.000000e+00> : vector<128xf32>
      %16 = vector.multi_reduction <add>, %15, %cst_13 [0] : vector<32x128xf32> to vector<128xf32>
      %17 = vector.shape_cast %16 : vector<128xf32> to vector<1x128xf32>
      %18 = vector.shape_cast %14 : vector<1x128xf32> to vector<1x1x128xf32>
      %19 = vector.shape_cast %18 : vector<1x1x128xf32> to vector<1x1x128xf32>
      %20 = vector.broadcast %19 : vector<1x1x128xf32> to vector<1x8x128xf32>
      %c0_14 = arith.constant 0 : index
      %c0_15 = arith.constant 0 : index
      %c0_16 = arith.constant 0 : index
      %21 = vector.load %arg6[%c0_14, %c0_15, %c0_16] : memref<1x8x128xf32, #tpu.memory_space<vmem>>, vector<1x8x128xf32>
      tpu.vector_store %arg6[%c0_14, %c0_15, %c0_16], %20 {strides = array<i32>} : memref<1x8x128xf32, #tpu.memory_space<vmem>>, vector<1x8x128xf32>,
      %22 = vector.shape_cast %17 : vector<1x128xf32> to vector<1x1x128xf32>
      %23 = vector.shape_cast %22 : vector<1x1x128xf32> to vector<1x1x128xf32>
      %24 = vector.broadcast %23 : vector<1x1x128xf32> to vector<1x8x128xf32>
      %c0_17 = arith.constant 0 : index
      %c0_18 = arith.constant 0 : index
      %c0_19 = arith.constant 0 : index
      %25 = vector.load %arg7[%c0_17, %c0_18, %c0_19] : memref<1x8x128xf32, #tpu.memory_space<vmem>>, vector<1x8x128xf32>
      tpu.vector_store %arg7[%c0_17, %c0_18, %c0_19], %24 {strides = array<i32>} : memref<1x8x128xf32, #tpu.memory_space<vmem>>, vector<1x8x128xf32>,
      %c0_20 = arith.constant 0 : index
      %c0_21 = arith.constant 0 : index
      %26 = vector.load %arg5[%c0_20, %c0_21] : memref<32x128xf32, #tpu.memory_space<vmem>>, vector<32x128xf32>
      tpu.vector_store %arg5[%c0_20, %c0_21], %12 {strides = array<i32>} : memref<32x128xf32, #tpu.memory_space<vmem>>, vector<32x128xf32>,
    } else {
    }
    return
  }
  func.func @transform_0(%arg0: i32, %arg1: i32, %arg2: i32) -> (i32, i32) {
    %c0_i32 = arith.constant 0 : i32
    return %arg0, %arg2 : i32, i32
  }
  func.func @transform_1(%arg0: i32, %arg1: i32, %arg2: i32) -> (i32, i32) {
    %c0_i32 = arith.constant 0 : i32
    return %arg2, %arg1 : i32, i32
  }
  func.func @transform_2(%arg0: i32, %arg1: i32, %arg2: i32) -> (i32, i32) {
    %c0_i32 = arith.constant 0 : i32
    return %arg0, %arg1 : i32, i32
  }
  func.func @transform_3(%arg0: i32, %arg1: i32, %arg2: i32) -> (i32, i32, i32) {
    %c0_i32 = arith.constant 0 : i32
    %c0_i32_0 = arith.constant 0 : i32
    return %arg0, %c0_i32, %arg1 : i32, i32, i32
  }
  func.func @transform_4(%arg0: i32, %arg1: i32, %arg2: i32) -> (i32, i32, i32) {
    %c0_i32 = arith.constant 0 : i32
    %c0_i32_0 = arith.constant 0 : i32
    return %arg0, %c0_i32, %arg1 : i32, i32, i32
  }
}

module attributes {stable_mosaic.version = 11 : i64} {
  func.func @kernel(%arg0: i32, %arg1: memref<32x128xf32, #tpu.memory_space<vmem>>, %arg2: memref<1x128xf32, #tpu.memory_space<vmem>>, %arg3: memref<1x128xf32, #tpu.memory_space<vmem>>, %arg4: memref<32x128xf32, #tpu.memory_space<vmem>>) attributes {dimension_semantics = [#tpu.dimension_semantics<parallel>], iteration_bounds = array<i64: 1>, scalar_prefetch = 0 : i64, scratch_operands = 0 : i64, tpu.core_type = #tpu.core_type<tc>, window_params = [{transform_indices = @transform_0, window_bounds = array<i64: 32, 128>}, {pipeline_mode = #tpu.pipeline_mode<synchronous>, transform_indices = @transform_1, window_bounds = array<i64: 1, 128>}, {pipeline_mode = #tpu.pipeline_mode<synchronous>, transform_indices = @transform_2, window_bounds = array<i64: 1, 128>}, {transform_indices = @transform_3, window_bounds = array<i64: 32, 128>}]} {
    %c0 = arith.constant 0 : index
    %c0_0 = arith.constant 0 : index
    %0 = vector.load %arg1[%c0, %c0_0] : memref<32x128xf32, #tpu.memory_space<vmem>>, vector<32x128xf32>
    %c0_1 = arith.constant 0 : index
    %c0_2 = arith.constant 0 : index
    %1 = vector.load %arg2[%c0_1, %c0_2] : memref<1x128xf32, #tpu.memory_space<vmem>>, vector<1x128xf32>
    %2 = vector.broadcast %1 : vector<1x128xf32> to vector<32x128xf32>
    %3 = arith.mulf %0, %2 : vector<32x128xf32>
    %c0_3 = arith.constant 0 : index
    %c0_4 = arith.constant 0 : index
    %4 = vector.load %arg3[%c0_3, %c0_4] : memref<1x128xf32, #tpu.memory_space<vmem>>, vector<1x128xf32>
    %5 = vector.broadcast %4 : vector<1x128xf32> to vector<32x128xf32>
    %6 = arith.addf %3, %5 : vector<32x128xf32>
    %cst = arith.constant 0.000000e+00 : f32
    %7 = vector.broadcast %cst : f32 to vector<32x128xf32>
    %8 = arith.maximumf %6, %7 : vector<32x128xf32>
    %c0_5 = arith.constant 0 : index
    %c0_6 = arith.constant 0 : index
    %9 = vector.load %arg4[%c0_5, %c0_6] : memref<32x128xf32, #tpu.memory_space<vmem>>, vector<32x128xf32>
    tpu.vector_store %arg4[%c0_5, %c0_6], %8 {strides = array<i32>} : memref<32x128xf32, #tpu.memory_space<vmem>>, vector<32x128xf32>,
    return
  }
  func.func @transform_0(%arg0: i32) -> (i32, i32) {
    %c0_i32 = arith.constant 0 : i32
    %c0_i32_0 = arith.constant 0 : i32
    return %arg0, %c0_i32 : i32, i32
  }
  func.func @transform_1(%arg0: i32) -> (i32, i32) {
    %c0_i32 = arith.constant 0 : i32
    %c0_i32_0 = arith.constant 0 : i32
    %c0_i32_1 = arith.constant 0 : i32
    return %c0_i32, %c0_i32_0 : i32, i32
  }
  func.func @transform_2(%arg0: i32) -> (i32, i32) {
    %c0_i32 = arith.constant 0 : i32
    %c0_i32_0 = arith.constant 0 : i32
    %c0_i32_1 = arith.constant 0 : i32
    return %c0_i32, %c0_i32_0 : i32, i32
  }
  func.func @transform_3(%arg0: i32) -> (i32, i32) {
    %c0_i32 = arith.constant 0 : i32
    %c0_i32_0 = arith.constant 0 : i32
    return %arg0, %c0_i32 : i32, i32
  }
}

module attributes {stable_mosaic.version = 11 : i64} {
  func.func @kernel(%arg0: i32, %arg1: i32, %arg2: i32, %arg3: memref<128x128xbf16, #tpu.memory_space<vmem>>, %arg4: memref<128x128xbf16, #tpu.memory_space<vmem>>, %arg5: memref<128x128xf32, #tpu.memory_space<vmem>>, %arg6: memref<1x8x128xf32, #tpu.memory_space<vmem>>, %arg7: memref<1x8x128xf32, #tpu.memory_space<vmem>>, %arg8: memref<128x128xf32, #tpu.memory_space<vmem>>) attributes {dimension_semantics = [#tpu.dimension_semantics<parallel>, #tpu.dimension_semantics<parallel>, #tpu.dimension_semantics<arbitrary>], iteration_bounds = array<i64: 1, 1, 1>, scalar_prefetch = 0 : i64, scratch_operands = 1 : i64, tpu.core_type = #tpu.core_type<tc>, window_params = [{transform_indices = @transform_0, window_bounds = array<i64: 128, 128>}, {transform_indices = @transform_1, window_bounds = array<i64: 128, 128>}, {transform_indices = @transform_2, window_bounds = array<i64: 128, 128>}, {transform_indices = @transform_3, window_bounds = array<i64: 1, 8, 128>}, {transform_indices = @transform_4, window_bounds = array<i64: 1, 8, 128>}]} {
    %c0_i32 = arith.constant 0 : i32
    %0 = arith.cmpi eq, %arg2, %c0_i32 : i32
    %1 = arith.extui %0 : i1 to i32
    %c0_i32_0 = arith.constant 0 : i32
    %2 = arith.cmpi ne, %1, %c0_i32_0 : i32
    scf.if %2 {
      %cst_10 = arith.constant 0.000000e+00 : f32
      %12 = vector.broadcast %cst_10 : f32 to vector<128x128xf32>
      %c0_11 = arith.constant 0 : index
      %c0_12 = arith.constant 0 : index
      %13 = vector.load %arg8[%c0_11, %c0_12] : memref<128x128xf32, #tpu.memory_space<vmem>>, vector<128x128xf32>
      tpu.vector_store %arg8[%c0_11, %c0_12], %12 {strides = array<i32>} : memref<128x128xf32, #tpu.memory_space<vmem>>, vector<128x128xf32>,
    } else {
    }
    %c0 = arith.constant 0 : index
    %c0_1 = arith.constant 0 : index
    %3 = vector.load %arg8[%c0, %c0_1] : memref<128x128xf32, #tpu.memory_space<vmem>>, vector<128x128xf32>
    %c0_2 = arith.constant 0 : index
    %c0_3 = arith.constant 0 : index
    %4 = vector.load %arg3[%c0_2, %c0_3] : memref<128x128xbf16, #tpu.memory_space<vmem>>, vector<128x128xbf16>
    %c0_4 = arith.constant 0 : index
    %c0_5 = arith.constant 0 : index
    %5 = vector.load %arg4[%c0_4, %c0_5] : memref<128x128xbf16, #tpu.memory_space<vmem>>, vector<128x128xbf16>
    %cst = arith.constant dense<0.000000e+00> : vector<128x128xf32>
    %6 = tpu.matmul %4, %5, %cst {dimension_numbers = #tpu.dot_dimension_numbers<[1], [0], [0], [1], [0, 0, 1, 1], [], []>} : vector<128x128xbf16>, vector<128x128xbf16>, vector<128x128xf32> -> vector<128x128xf32>
    %7 = arith.addf %3, %6 : vector<128x128xf32>
    %c0_6 = arith.constant 0 : index
    %c0_7 = arith.constant 0 : index
    %8 = vector.load %arg8[%c0_6, %c0_7] : memref<128x128xf32, #tpu.memory_space<vmem>>, vector<128x128xf32>
    tpu.vector_store %arg8[%c0_6, %c0_7], %7 {strides = array<i32>} : memref<128x128xf32, #tpu.memory_space<vmem>>, vector<128x128xf32>,
    %c0_i32_8 = arith.constant 0 : i32
    %9 = arith.cmpi eq, %arg2, %c0_i32_8 : i32
    %10 = arith.extui %9 : i1 to i32
    %c0_i32_9 = arith.constant 0 : i32
    %11 = arith.cmpi ne, %10, %c0_i32_9 : i32
    scf.if %11 {
      %c0_10 = arith.constant 0 : index
      %c0_11 = arith.constant 0 : index
      %12 = vector.load %arg8[%c0_10, %c0_11] : memref<128x128xf32, #tpu.memory_space<vmem>>, vector<128x128xf32>
      %cst_12 = arith.constant dense<0.000000e+00> : vector<128xf32>
      %13 = vector.multi_reduction <add>, %12, %cst_12 [0] : vector<128x128xf32> to vector<128xf32>
      %14 = vector.shape_cast %13 : vector<128xf32> to vector<1x128xf32>
      %15 = arith.mulf %12, %12 : vector<128x128xf32>
      %cst_13 = arith.constant dense<0.000000e+00> : vector<128xf32>
      %16 = vector.multi_reduction <add>, %15, %cst_13 [0] : vector<128x128xf32> to vector<128xf32>
      %17 = vector.shape_cast %16 : vector<128xf32> to vector<1x128xf32>
      %18 = vector.shape_cast %14 : vector<1x128xf32> to vector<1x1x128xf32>
      %19 = vector.shape_cast %18 : vector<1x1x128xf32> to vector<1x1x128xf32>
      %20 = vector.broadcast %19 : vector<1x1x128xf32> to vector<1x8x128xf32>
      %c0_14 = arith.constant 0 : index
      %c0_15 = arith.constant 0 : index
      %c0_16 = arith.constant 0 : index
      %21 = vector.load %arg6[%c0_14, %c0_15, %c0_16] : memref<1x8x128xf32, #tpu.memory_space<vmem>>, vector<1x8x128xf32>
      tpu.vector_store %arg6[%c0_14, %c0_15, %c0_16], %20 {strides = array<i32>} : memref<1x8x128xf32, #tpu.memory_space<vmem>>, vector<1x8x128xf32>,
      %22 = vector.shape_cast %17 : vector<1x128xf32> to vector<1x1x128xf32>
      %23 = vector.shape_cast %22 : vector<1x1x128xf32> to vector<1x1x128xf32>
      %24 = vector.broadcast %23 : vector<1x1x128xf32> to vector<1x8x128xf32>
      %c0_17 = arith.constant 0 : index
      %c0_18 = arith.constant 0 : index
      %c0_19 = arith.constant 0 : index
      %25 = vector.load %arg7[%c0_17, %c0_18, %c0_19] : memref<1x8x128xf32, #tpu.memory_space<vmem>>, vector<1x8x128xf32>
      tpu.vector_store %arg7[%c0_17, %c0_18, %c0_19], %24 {strides = array<i32>} : memref<1x8x128xf32, #tpu.memory_space<vmem>>, vector<1x8x128xf32>,
      %c0_20 = arith.constant 0 : index
      %c0_21 = arith.constant 0 : index
      %26 = vector.load %arg5[%c0_20, %c0_21] : memref<128x128xf32, #tpu.memory_space<vmem>>, vector<128x128xf32>
      tpu.vector_store %arg5[%c0_20, %c0_21], %12 {strides = array<i32>} : memref<128x128xf32, #tpu.memory_space<vmem>>, vector<128x128xf32>,
    } else {
    }
    return
  }
  func.func @transform_0(%arg0: i32, %arg1: i32, %arg2: i32) -> (i32, i32) {
    %c0_i32 = arith.constant 0 : i32
    return %arg0, %arg2 : i32, i32
  }
  func.func @transform_1(%arg0: i32, %arg1: i32, %arg2: i32) -> (i32, i32) {
    %c0_i32 = arith.constant 0 : i32
    return %arg2, %arg1 : i32, i32
  }
  func.func @transform_2(%arg0: i32, %arg1: i32, %arg2: i32) -> (i32, i32) {
    %c0_i32 = arith.constant 0 : i32
    return %arg0, %arg1 : i32, i32
  }
  func.func @transform_3(%arg0: i32, %arg1: i32, %arg2: i32) -> (i32, i32, i32) {
    %c0_i32 = arith.constant 0 : i32
    %c0_i32_0 = arith.constant 0 : i32
    return %arg0, %c0_i32, %arg1 : i32, i32, i32
  }
  func.func @transform_4(%arg0: i32, %arg1: i32, %arg2: i32) -> (i32, i32, i32) {
    %c0_i32 = arith.constant 0 : i32
    %c0_i32_0 = arith.constant 0 : i32
    return %arg0, %c0_i32, %arg1 : i32, i32, i32
  }
}

module attributes {stable_mosaic.version = 11 : i64} {
  func.func @kernel(%arg0: i32, %arg1: memref<128x128xf32, #tpu.memory_space<vmem>>, %arg2: memref<1x128xf32, #tpu.memory_space<vmem>>, %arg3: memref<1x128xf32, #tpu.memory_space<vmem>>, %arg4: memref<128x128xf32, #tpu.memory_space<vmem>>) attributes {dimension_semantics = [#tpu.dimension_semantics<parallel>], iteration_bounds = array<i64: 1>, scalar_prefetch = 0 : i64, scratch_operands = 0 : i64, tpu.core_type = #tpu.core_type<tc>, window_params = [{transform_indices = @transform_0, window_bounds = array<i64: 128, 128>}, {pipeline_mode = #tpu.pipeline_mode<synchronous>, transform_indices = @transform_1, window_bounds = array<i64: 1, 128>}, {pipeline_mode = #tpu.pipeline_mode<synchronous>, transform_indices = @transform_2, window_bounds = array<i64: 1, 128>}, {transform_indices = @transform_3, window_bounds = array<i64: 128, 128>}]} {
    %c0 = arith.constant 0 : index
    %c0_0 = arith.constant 0 : index
    %0 = vector.load %arg1[%c0, %c0_0] : memref<128x128xf32, #tpu.memory_space<vmem>>, vector<128x128xf32>
    %c0_1 = arith.constant 0 : index
    %c0_2 = arith.constant 0 : index
    %1 = vector.load %arg2[%c0_1, %c0_2] : memref<1x128xf32, #tpu.memory_space<vmem>>, vector<1x128xf32>
    %2 = vector.broadcast %1 : vector<1x128xf32> to vector<128x128xf32>
    %3 = arith.mulf %0, %2 : vector<128x128xf32>
    %c0_3 = arith.constant 0 : index
    %c0_4 = arith.constant 0 : index
    %4 = vector.load %arg3[%c0_3, %c0_4] : memref<1x128xf32, #tpu.memory_space<vmem>>, vector<1x128xf32>
    %5 = vector.broadcast %4 : vector<1x128xf32> to vector<128x128xf32>
    %6 = arith.addf %3, %5 : vector<128x128xf32>
    %cst = arith.constant 0.000000e+00 : f32
    %7 = vector.broadcast %cst : f32 to vector<128x128xf32>
    %8 = arith.maximumf %6, %7 : vector<128x128xf32>
    %c0_5 = arith.constant 0 : index
    %c0_6 = arith.constant 0 : index
    %9 = vector.load %arg4[%c0_5, %c0_6] : memref<128x128xf32, #tpu.memory_space<vmem>>, vector<128x128xf32>
    tpu.vector_store %arg4[%c0_5, %c0_6], %8 {strides = array<i32>} : memref<128x128xf32, #tpu.memory_space<vmem>>, vector<128x128xf32>,
    return
  }
  func.func @transform_0(%arg0: i32) -> (i32, i32) {
    %c0_i32 = arith.constant 0 : i32
    %c0_i32_0 = arith.constant 0 : i32
    return %arg0, %c0_i32 : i32, i32
  }
  func.func @transform_1(%arg0: i32) -> (i32, i32) {
    %c0_i32 = arith.constant 0 : i32
    %c0_i32_0 = arith.constant 0 : i32
    %c0_i32_1 = arith.constant 0 : i32
    return %c0_i32, %c0_i32_0 : i32, i32
  }
  func.func @transform_2(%arg0: i32) -> (i32, i32) {
    %c0_i32 = arith.constant 0 : i32
    %c0_i32_0 = arith.constant 0 : i32
    %c0_i32_1 = arith.constant 0 : i32
    return %c0_i32, %c0_i32_0 : i32, i32
  }
  func.func @transform_3(%arg0: i32) -> (i32, i32) {
    %c0_i32 = arith.constant 0 : i32
    %c0_i32_0 = arith.constant 0 : i32
    return %arg0, %c0_i32 : i32, i32
  }
}

module attributes {stable_mosaic.version = 11 : i64} {
  func.func @kernel(%arg0: i32, %arg1: memref<512x128xf32, #tpu.memory_space<vmem>>, %arg2: memref<1x128xf32, #tpu.memory_space<vmem>>, %arg3: memref<1x128xf32, #tpu.memory_space<vmem>>, %arg4: memref<512x128xf32, #tpu.memory_space<vmem>>) attributes {dimension_semantics = [#tpu.dimension_semantics<parallel>], iteration_bounds = array<i64: 1>, scalar_prefetch = 0 : i64, scratch_operands = 0 : i64, tpu.core_type = #tpu.core_type<tc>, window_params = [{transform_indices = @transform_0, window_bounds = array<i64: 512, 128>}, {pipeline_mode = #tpu.pipeline_mode<synchronous>, transform_indices = @transform_1, window_bounds = array<i64: 1, 128>}, {pipeline_mode = #tpu.pipeline_mode<synchronous>, transform_indices = @transform_2, window_bounds = array<i64: 1, 128>}, {transform_indices = @transform_3, window_bounds = array<i64: 512, 128>}]} {
    %c0 = arith.constant 0 : index
    %c0_0 = arith.constant 0 : index
    %0 = vector.load %arg1[%c0, %c0_0] : memref<512x128xf32, #tpu.memory_space<vmem>>, vector<512x128xf32>
    %c0_1 = arith.constant 0 : index
    %c0_2 = arith.constant 0 : index
    %1 = vector.load %arg2[%c0_1, %c0_2] : memref<1x128xf32, #tpu.memory_space<vmem>>, vector<1x128xf32>
    %2 = vector.broadcast %1 : vector<1x128xf32> to vector<512x128xf32>
    %3 = arith.mulf %0, %2 : vector<512x128xf32>
    %c0_3 = arith.constant 0 : index
    %c0_4 = arith.constant 0 : index
    %4 = vector.load %arg3[%c0_3, %c0_4] : memref<1x128xf32, #tpu.memory_space<vmem>>, vector<1x128xf32>
    %5 = vector.broadcast %4 : vector<1x128xf32> to vector<512x128xf32>
    %6 = arith.addf %3, %5 : vector<512x128xf32>
    %cst = arith.constant 0.000000e+00 : f32
    %7 = vector.broadcast %cst : f32 to vector<512x128xf32>
    %8 = arith.maximumf %6, %7 : vector<512x128xf32>
    %c0_5 = arith.constant 0 : index
    %c0_6 = arith.constant 0 : index
    %9 = vector.load %arg4[%c0_5, %c0_6] : memref<512x128xf32, #tpu.memory_space<vmem>>, vector<512x128xf32>
    tpu.vector_store %arg4[%c0_5, %c0_6], %8 {strides = array<i32>} : memref<512x128xf32, #tpu.memory_space<vmem>>, vector<512x128xf32>,
    return
  }
  func.func @transform_0(%arg0: i32) -> (i32, i32) {
    %c0_i32 = arith.constant 0 : i32
    %c0_i32_0 = arith.constant 0 : i32
    return %arg0, %c0_i32 : i32, i32
  }
  func.func @transform_1(%arg0: i32) -> (i32, i32) {
    %c0_i32 = arith.constant 0 : i32
    %c0_i32_0 = arith.constant 0 : i32
    %c0_i32_1 = arith.constant 0 : i32
    return %c0_i32, %c0_i32_0 : i32, i32
  }
  func.func @transform_2(%arg0: i32) -> (i32, i32) {
    %c0_i32 = arith.constant 0 : i32
    %c0_i32_0 = arith.constant 0 : i32
    %c0_i32_1 = arith.constant 0 : i32
    return %c0_i32, %c0_i32_0 : i32, i32
  }
  func.func @transform_3(%arg0: i32) -> (i32, i32) {
    %c0_i32 = arith.constant 0 : i32
    %c0_i32_0 = arith.constant 0 : i32
    return %arg0, %c0_i32 : i32, i32
  }
}

module attributes {stable_mosaic.version = 11 : i64} {
  func.func @kernel(%arg0: i32, %arg1: i32, %arg2: i32, %arg3: memref<256x128xbf16, #tpu.memory_space<vmem>>, %arg4: memref<128x128xbf16, #tpu.memory_space<vmem>>, %arg5: memref<256x128xf32, #tpu.memory_space<vmem>>, %arg6: memref<256x128xf32, #tpu.memory_space<vmem>>) attributes {dimension_semantics = [#tpu.dimension_semantics<parallel>, #tpu.dimension_semantics<parallel>, #tpu.dimension_semantics<arbitrary>], iteration_bounds = array<i64: 8, 1, 1>, scalar_prefetch = 0 : i64, scratch_operands = 1 : i64, tpu.core_type = #tpu.core_type<tc>, window_params = [{transform_indices = @transform_0, window_bounds = array<i64: 256, 128>}, {transform_indices = @transform_1, window_bounds = array<i64: 128, 128>}, {transform_indices = @transform_2, window_bounds = array<i64: 256, 128>}]} {
    %c0_i32 = arith.constant 0 : i32
    %0 = arith.cmpi eq, %arg2, %c0_i32 : i32
    %1 = arith.extui %0 : i1 to i32
    %c0_i32_0 = arith.constant 0 : i32
    %2 = arith.cmpi ne, %1, %c0_i32_0 : i32
    scf.if %2 {
      %cst_10 = arith.constant 0.000000e+00 : f32
      %12 = vector.broadcast %cst_10 : f32 to vector<256x128xf32>
      %c0_11 = arith.constant 0 : index
      %c0_12 = arith.constant 0 : index
      %13 = vector.load %arg6[%c0_11, %c0_12] : memref<256x128xf32, #tpu.memory_space<vmem>>, vector<256x128xf32>
      tpu.vector_store %arg6[%c0_11, %c0_12], %12 {strides = array<i32>} : memref<256x128xf32, #tpu.memory_space<vmem>>, vector<256x128xf32>,
    } else {
    }
    %c0 = arith.constant 0 : index
    %c0_1 = arith.constant 0 : index
    %3 = vector.load %arg6[%c0, %c0_1] : memref<256x128xf32, #tpu.memory_space<vmem>>, vector<256x128xf32>
    %c0_2 = arith.constant 0 : index
    %c0_3 = arith.constant 0 : index
    %4 = vector.load %arg3[%c0_2, %c0_3] : memref<256x128xbf16, #tpu.memory_space<vmem>>, vector<256x128xbf16>
    %c0_4 = arith.constant 0 : index
    %c0_5 = arith.constant 0 : index
    %5 = vector.load %arg4[%c0_4, %c0_5] : memref<128x128xbf16, #tpu.memory_space<vmem>>, vector<128x128xbf16>
    %cst = arith.constant dense<0.000000e+00> : vector<256x128xf32>
    %6 = tpu.matmul %4, %5, %cst {dimension_numbers = #tpu.dot_dimension_numbers<[1], [0], [0], [1], [0, 0, 1, 1], [], []>} : vector<256x128xbf16>, vector<128x128xbf16>, vector<256x128xf32> -> vector<256x128xf32>
    %7 = arith.addf %3, %6 : vector<256x128xf32>
    %c0_6 = arith.constant 0 : index
    %c0_7 = arith.constant 0 : index
    %8 = vector.load %arg6[%c0_6, %c0_7] : memref<256x128xf32, #tpu.memory_space<vmem>>, vector<256x128xf32>
    tpu.vector_store %arg6[%c0_6, %c0_7], %7 {strides = array<i32>} : memref<256x128xf32, #tpu.memory_space<vmem>>, vector<256x128xf32>,
    %c0_i32_8 = arith.constant 0 : i32
    %9 = arith.cmpi eq, %arg2, %c0_i32_8 : i32
    %10 = arith.extui %9 : i1 to i32
    %c0_i32_9 = arith.constant 0 : i32
    %11 = arith.cmpi ne, %10, %c0_i32_9 : i32
    scf.if %11 {
      %c0_10 = arith.constant 0 : index
      %c0_11 = arith.constant 0 : index
      %12 = vector.load %arg6[%c0_10, %c0_11] : memref<256x128xf32, #tpu.memory_space<vmem>>, vector<256x128xf32>
      %13 = math.tanh %12 : vector<256x128xf32>
      %c0_12 = arith.constant 0 : index
      %c0_13 = arith.constant 0 : index
      %14 = vector.load %arg5[%c0_12, %c0_13] : memref<256x128xf32, #tpu.memory_space<vmem>>, vector<256x128xf32>
      tpu.vector_store %arg5[%c0_12, %c0_13], %13 {strides = array<i32>} : memref<256x128xf32, #tpu.memory_space<vmem>>, vector<256x128xf32>,
    } else {
    }
    return
  }
  func.func @transform_0(%arg0: i32, %arg1: i32, %arg2: i32) -> (i32, i32) {
    %c0_i32 = arith.constant 0 : i32
    return %arg0, %arg2 : i32, i32
  }
  func.func @transform_1(%arg0: i32, %arg1: i32, %arg2: i32) -> (i32, i32) {
    %c0_i32 = arith.constant 0 : i32
    return %arg2, %arg1 : i32, i32
  }
  func.func @transform_2(%arg0: i32, %arg1: i32, %arg2: i32) -> (i32, i32) {
    %c0_i32 = arith.constant 0 : i32
    return %arg0, %arg1 : i32, i32
  }
}

</mosaic_0001>

<bundles_post_ra>
// kernel: generator_forward.38
= control target key start
LH: loop header
LB: loop body
LE: loop exit
PB: predicated region body
PF: predicated region fallthrough
CT: control target
= control target key end

     0   :  { %s1177_s9 = smov 0   ;;  %s1179_s10 = smov 0   ;;  %s1290_s0 = inlined_call_operand.vmem [shape: bf16[2048,128], index: 0, kind: input, shape index: {}]   ;;  %s1291_s1 = inlined_call_operand.vmem [shape: bf16[128,128], index: 1, kind: input, shape index: {}]   ;;  %s1292_s2 = inlined_call_operand.vmem [shape: f32[2048,128], index: 2, kind: output, shape index: {}]  }
   0x1   :  { %s1181_s11 = smov 0  }
   0x2 LB: > { %s31_s12 = sadd.s32 1, %s1156_s10  ;;  %p971_p0 = scmp.ge.s32.totalorder %s1160_s11, 1  ;;  %s1160_s11 = sphi %s1181_s11, %s12_s11   ;;  %s1156_s10 = sphi %s1179_s10, %s1294_s10   ;;  %s1152_s9 = sphi %s1177_s9, %s1293_s9  }
   0x3   : > { %p33_p1 = scmp.ge.s32.totalorder %s31_s12, 8  ;;  %p155_p2 = scmp.lt.s32.totalorder %s1160_s11, 9 }
   0x5   : > { %s1296_s12 = smov (%p33_p1, %s31_s12), 0  ;;  %p156_p3 = pnand %p971_p0, %p155_p2 }
   0x6   : > { %s972_s15 = sshll.u32 (!%p156_p3), %s1152_s9, 5 }
   0x7   : > { %159 = sbr.rel (%p156_p3) target bundleno = 273 (0x111), region = 28  ;;  %p192_p4 = scmp.lt.s32.totalorder (!%p156_p3), %s972_s15, 255 }
   0xc   : > { %v1114_v0 = vld [vmem:[%s1291_s1 + $0x38] sm:$0xff]   ;;  %v1115_v1 = vld [vmem:[%s1291_s1 + $0x30] sm:$0xff]   ;;  %s1298_s15 = smov (!%p192_p4, %s972_s15), 255  ;;  %v1116_v2 = vld [vmem:[%s1291_s1 + $0x28] sm:$0xff]  }
   0xd   : > { %1026 = vmatprep.subr.bf16.mxu0 %v1114_v0  ;;  %1074 = vmatprep.subr.bf16.mxu1 %v1114_v0  ;;  %s973_s20 = sshll.u32 %s1298_s15, 2  ;;  %v1117_v3 = vld [vmem:[%s1291_s1 + $0x20] sm:$0xff]   ;;  %v1118_v6 = vld [vmem:[%s1291_s1 + $0x18] sm:$0xff]   ;;  %v1119_v7 = vld [vmem:[%s1291_s1 + $0x10] sm:$0xff]   ;;  %s975_s6 = sshll.u32 %s1298_s15, 3 }
   0xe   : > { %1027 = vmatpush3.bf16.msra.mxu0 %v1114_v0  ;;  %1082 = vmatpush3.bf16.msra.mxu1 %v1114_v0  ;;  %s1210_s23 = scalar_lea.vmem %s1290_s0, %s973_s20  ;;  %v1120_v8 = vld [vmem:[%s1291_s1 + $0x8] sm:$0xff]   ;;  %v1121_v9 = vld [vmem:[%s1291_s1] sm:$0xff]   ;;  %s1247_s9 = scalar_lea.vmem %s1292_s2, %s975_s6 }
   0xf   : > { %1028 = vmatprep.subr.bf16.mxu0 %v1115_v1  ;;  %1075 = vmatprep.subr.bf16.mxu1 %v1115_v1  ;;  %v1122_v4 = vld [vmem:[%s1210_s23] sm:$0xff]   ;;  %v1124_v10 = vld [vmem:[%s1210_s23 + $0x8] sm:$0xff]   ;;  %v1126_v12 = vld [vmem:[%s1210_s23 + $0x10] sm:$0xff]  }
  0x10   : > { %v1123_v5 = vld [vmem:[%s1210_s23 + $0x40] sm:$0xff]   ;;  %1042 = vmatprep.mubr.bf16.mxu0 %v1122_v4  ;;  %v1125_v11 = vld [vmem:[%s1210_s23 + $0x48] sm:$0xff]   ;;  %v1127_v13 = vld [vmem:[%s1210_s23 + $0x50] sm:$0xff]  }
  0x11   : > { %1058 = vmatprep.mubr.bf16.mxu1 %v1123_v5  ;;  %v1128_v14 = vld [vmem:[%s1210_s23 + $0x18] sm:$0xff]   ;;  %v1130_v16 = vld [vmem:[%s1210_s23 + $0x20] sm:$0xff]   ;;  %v1132_v18 = vld [vmem:[%s1210_s23 + $0x28] sm:$0xff]  }
  0x12   : > { %1029 = vmatpush3.bf16.msra.mxu0 %v1115_v1  ;;  %1083 = vmatpush3.bf16.msra.mxu1 %v1115_v1  ;;  %v1129_v15 = vld [vmem:[%s1210_s23 + $0x58] sm:$0xff]   ;;  %v1131_v17 = vld [vmem:[%s1210_s23 + $0x60] sm:$0xff]   ;;  %v1133_v19 = vld [vmem:[%s1210_s23 + $0x68] sm:$0xff]  }
  0x13   : > { %1030 = vmatprep.subr.bf16.mxu0 %v1116_v2  ;;  %1076 = vmatprep.subr.bf16.mxu1 %v1116_v2  ;;  %v1134_v20 = vld [vmem:[%s1210_s23 + $0x30] sm:$0xff]   ;;  %v1136_v22 = vld [vmem:[%s1210_s23 + $0x38] sm:$0xff]  }
  0x14   : > { %v1135_v21 = vld [vmem:[%s1210_s23 + $0x70] sm:$0xff]   ;;  %v1137_v23 = vld [vmem:[%s1210_s23 + $0x78] sm:$0xff]  }
  0x16   : > { %1031 = vmatpush3.bf16.msra.mxu0 %v1116_v2  ;;  %1084 = vmatpush3.bf16.msra.mxu1 %v1116_v2 }
  0x17   : > { %1032 = vmatprep.subr.bf16.mxu0 %v1117_v3  ;;  %1077 = vmatprep.subr.bf16.mxu1 %v1117_v3 }
  0x1a   : > { %1033 = vmatpush3.bf16.msra.mxu0 %v1117_v3  ;;  %1085 = vmatpush3.bf16.msra.mxu1 %v1117_v3 }
  0x1b   : > { %1034 = vmatprep.subr.bf16.mxu0 %v1118_v6  ;;  %1078 = vmatprep.subr.bf16.mxu1 %v1118_v6 }
  0x1e   : > { %1035 = vmatpush3.bf16.msra.mxu0 %v1118_v6  ;;  %1086 = vmatpush3.bf16.msra.mxu1 %v1118_v6 }
  0x1f   : > { %1036 = vmatprep.subr.bf16.mxu0 %v1119_v7  ;;  %1079 = vmatprep.subr.bf16.mxu1 %v1119_v7 }
  0x22   : > { %1037 = vmatpush3.bf16.msra.mxu0 %v1119_v7  ;;  %1087 = vmatpush3.bf16.msra.mxu1 %v1119_v7 }
  0x23   : > { %1038 = vmatprep.subr.bf16.mxu0 %v1120_v8  ;;  %1080 = vmatprep.subr.bf16.mxu1 %v1120_v8 }
  0x26   : > { %1039 = vmatpush3.bf16.msra.mxu0 %v1120_v8  ;;  %1088 = vmatpush3.bf16.msra.mxu1 %v1120_v8 }
  0x27   : > { %1040 = vmatprep.subr.bf16.mxu0 %v1121_v9  ;;  %1081 = vmatprep.subr.bf16.mxu1 %v1121_v9 }
  0x2a   : > { %1041 = vmatpush3.bf16.msra.mxu0 %v1121_v9  ;;  %1089 = vmatpush3.bf16.msra.mxu1 %v1121_v9 }
  0x2d   : > { %1043 = vmatmul.mubr.bf16.vlgmr.msra.gmra.mxu0 %v1124_v10  ;;  %1059 = vmatmul.mubr.bf16.vlgmr.msra.gmra.mxu1 %v1125_v11 }
  0x2e   : > { %1046 = vmatprep.mubr.bf16.mxu0 %v1126_v12  ;;  %1062 = vmatprep.mubr.bf16.mxu1 %v1127_v13 }
  0x35   : > { %1047 = vmatmul.mubr.bf16.gmra.mxu0 %v1128_v14  ;;  %1063 = vmatmul.mubr.bf16.gmra.mxu1 %v1129_v15 }
  0x36   : > { %1050 = vmatprep.mubr.bf16.mxu0 %v1130_v16  ;;  %1066 = vmatprep.mubr.bf16.mxu1 %v1131_v17 }
  0x3d   : > { %1051 = vmatmul.mubr.bf16.gmra.mxu0 %v1132_v18  ;;  %1067 = vmatmul.mubr.bf16.gmra.mxu1 %v1133_v19 }
  0x3e   : > { %1054 = vmatprep.mubr.bf16.mxu0 %v1134_v20  ;;  %1070 = vmatprep.mubr.bf16.mxu1 %v1135_v21 }
  0x45   : > { %1055 = vmatmul.mubr.bf16.gmra.mxu0 %v1136_v22  ;;  %1071 = vmatmul.mubr.bf16.gmra.mxu1 %v1137_v23 }
  0xed   : > { %v1044_v24 = vpop.f32.mrf.mxu0  ;;  %v1060_v25 = vpop.f32.mrf.mxu1 }
  0xee   : > { %vm741_vm0 = vcmp.gt.f32.partialorder %v1044_v24, 0.0  ;;  %v773_v26 = vmul.f32 0.2, %v1044_v24  ;;  %vm757_vm1 = vcmp.gt.f32.partialorder %v1060_v25, 0.0  ;;  %v789_v27 = vmul.f32 0.2, %v1060_v25 }
  0xef   : > { %v513_v28 = vpop.f32.mrf.mxu0  ;;  %v577_v29 = vpop.f32.mrf.mxu1 }
  0xf0   : > { %v805_v30 = vsel %vm741_vm0, %v1044_v24, %v773_v26  ;;  %v821_v31 = vsel %vm757_vm1, %v1060_v25, %v789_v27  ;;  %vm739_vm2 = vcmp.gt.f32.partialorder %v513_v28, 0.0  ;;  %v771_v32 = vmul.f32 0.2, %v513_v28 }
  0xf1   : > { %837 = vst [vmem:[%s1247_s9 + $0x10] sm:$0xff] %v805_v30  ;;  %853 = vst [vmem:[%s1247_s9 + $0x90] sm:$0xff] %v821_v31  ;;  %vm755_vm3 = vcmp.gt.f32.partialorder %v577_v29, 0.0  ;;  %v787_v33 = vmul.f32 0.2, %v577_v29  ;;  %v1045_v34 = vpop.f32.mrf.mxu0  ;;  %v1061_v35 = vpop.f32.mrf.mxu1 }
  0xf2   : > { %v803_v36 = vsel %vm739_vm2, %v513_v28, %v771_v32  ;;  %vm742_vm4 = vcmp.gt.f32.partialorder %v1045_v34, 0.0  ;;  %v774_v37 = vmul.f32 0.2, %v1045_v34  ;;  %vm758_vm5 = vcmp.gt.f32.partialorder %v1061_v35, 0.0 }
  0xf3   : > { %835 = vst [vmem:[%s1247_s9] sm:$0xff] %v803_v36  ;;  %v819_v38 = vsel %vm755_vm3, %v577_v29, %v787_v33  ;;  %v790_v39 = vmul.f32 0.2, %v1061_v35  ;;  %v516_v40 = vpop.f32.mrf.mxu0  ;;  %v580_v41 = vpop.f32.mrf.mxu1 }
  0xf4   : > { %851 = vst [vmem:[%s1247_s9 + $0x80] sm:$0xff] %v819_v38  ;;  %v806_v42 = vsel %vm742_vm4, %v1045_v34, %v774_v37  ;;  %vm740_vm6 = vcmp.gt.f32.partialorder %v516_v40, 0.0  ;;  %v772_v43 = vmul.f32 0.2, %v516_v40  ;;  %vm756_vm7 = vcmp.gt.f32.partialorder %v580_v41, 0.0 }
  0xf5   : > { %838 = vst [vmem:[%s1247_s9 + $0x18] sm:$0xff] %v806_v42  ;;  %v822_v44 = vsel %vm758_vm5, %v1061_v35, %v790_v39  ;;  %v788_v45 = vmul.f32 0.2, %v580_v41  ;;  %v1048_v46 = vpop.f32.mrf.mxu0  ;;  %v1064_v47 = vpop.f32.mrf.mxu1 }
  0xf6   : > { %854 = vst [vmem:[%s1247_s9 + $0x98] sm:$0xff] %v822_v44  ;;  %v804_v48 = vsel %vm740_vm6, %v516_v40, %v772_v43  ;;  %vm745_vm8 = vcmp.gt.f32.partialorder %v1048_v46, 0.0  ;;  %v777_v49 = vmul.f32 0.2, %v1048_v46  ;;  %vm761_vm9 = vcmp.gt.f32.partialorder %v1064_v47, 0.0 }
  0xf7   : > { %836 = vst [vmem:[%s1247_s9 + $0x8] sm:$0xff] %v804_v48  ;;  %v820_v50 = vsel %vm756_vm7, %v580_v41, %v788_v45  ;;  %v793_v51 = vmul.f32 0.2, %v1064_v47  ;;  %v529_v52 = vpop.f32.mrf.mxu0  ;;  %v593_v53 = vpop.f32.mrf.mxu1 }
  0xf8   : > { %852 = vst [vmem:[%s1247_s9 + $0x88] sm:$0xff] %v820_v50  ;;  %v809_v54 = vsel %vm745_vm8, %v1048_v46, %v777_v49  ;;  %vm743_vm10 = vcmp.gt.f32.partialorder %v529_v52, 0.0  ;;  %v775_v55 = vmul.f32 0.2, %v529_v52  ;;  %vm759_vm11 = vcmp.gt.f32.partialorder %v593_v53, 0.0 }
  0xf9   : > { %841 = vst [vmem:[%s1247_s9 + $0x30] sm:$0xff] %v809_v54  ;;  %v825_v56 = vsel %vm761_vm9, %v1064_v47, %v793_v51  ;;  %v791_v57 = vmul.f32 0.2, %v593_v53  ;;  %v1049_v58 = vpop.f32.mrf.mxu0  ;;  %v1065_v59 = vpop.f32.mrf.mxu1 }
  0xfa   : > { %857 = vst [vmem:[%s1247_s9 + $0xb0] sm:$0xff] %v825_v56  ;;  %v807_v60 = vsel %vm743_vm10, %v529_v52, %v775_v55  ;;  %vm746_vm12 = vcmp.gt.f32.partialorder %v1049_v58, 0.0  ;;  %v778_v61 = vmul.f32 0.2, %v1049_v58  ;;  %vm762_vm13 = vcmp.gt.f32.partialorder %v1065_v59, 0.0 }
  0xfb   : > { %839 = vst [vmem:[%s1247_s9 + $0x20] sm:$0xff] %v807_v60  ;;  %v823_v62 = vsel %vm759_vm11, %v593_v53, %v791_v57  ;;  %v794_v63 = vmul.f32 0.2, %v1065_v59  ;;  %v532_v0 = vpop.f32.mrf.mxu0  ;;  %v596_v1 = vpop.f32.mrf.mxu1 }
  0xfc   : > { %855 = vst [vmem:[%s1247_s9 + $0xa0] sm:$0xff] %v823_v62  ;;  %v810_v2 = vsel %vm746_vm12, %v1049_v58, %v778_v61  ;;  %vm744_vm14 = vcmp.gt.f32.partialorder %v532_v0, 0.0  ;;  %v776_v3 = vmul.f32 0.2, %v532_v0  ;;  %vm760_vm15 = vcmp.gt.f32.partialorder %v596_v1, 0.0 }
  0xfd   : > { %842 = vst [vmem:[%s1247_s9 + $0x38] sm:$0xff] %v810_v2  ;;  %v826_v4 = vsel %vm762_vm13, %v1065_v59, %v794_v63  ;;  %v792_v5 = vmul.f32 0.2, %v596_v1  ;;  %v1052_v6 = vpop.f32.mrf.mxu0  ;;  %v1068_v7 = vpop.f32.mrf.mxu1 }
  0xfe   : > { %858 = vst [vmem:[%s1247_s9 + $0xb8] sm:$0xff] %v826_v4  ;;  %v808_v8 = vsel %vm744_vm14, %v532_v0, %v776_v3  ;;  %vm749_vm0 = vcmp.gt.f32.partialorder %v1052_v6, 0.0  ;;  %v781_v9 = vmul.f32 0.2, %v1052_v6  ;;  %vm765_vm1 = vcmp.gt.f32.partialorder %v1068_v7, 0.0 }
  0xff   : > { %840 = vst [vmem:[%s1247_s9 + $0x28] sm:$0xff] %v808_v8  ;;  %v824_v10 = vsel %vm760_vm15, %v596_v1, %v792_v5  ;;  %v797_v11 = vmul.f32 0.2, %v1068_v7  ;;  %v545_v12 = vpop.f32.mrf.mxu0  ;;  %v609_v13 = vpop.f32.mrf.mxu1 }
 0x100   : > { %856 = vst [vmem:[%s1247_s9 + $0xa8] sm:$0xff] %v824_v10  ;;  %v813_v14 = vsel %vm749_vm0, %v1052_v6, %v781_v9  ;;  %vm747_vm2 = vcmp.gt.f32.partialorder %v545_v12, 0.0  ;;  %v779_v15 = vmul.f32 0.2, %v545_v12  ;;  %vm763_vm3 = vcmp.gt.f32.partialorder %v609_v13, 0.0 }
 0x101   : > { %845 = vst [vmem:[%s1247_s9 + $0x50] sm:$0xff] %v813_v14  ;;  %v829_v16 = vsel %vm765_vm1, %v1068_v7, %v797_v11  ;;  %v795_v17 = vmul.f32 0.2, %v609_v13  ;;  %v1053_v18 = vpop.f32.mrf.mxu0  ;;  %v1069_v19 = vpop.f32.mrf.mxu1 }
 0x102   : > { %861 = vst [vmem:[%s1247_s9 + $0xd0] sm:$0xff] %v829_v16  ;;  %v811_v20 = vsel %vm747_vm2, %v545_v12, %v779_v15  ;;  %vm750_vm4 = vcmp.gt.f32.partialorder %v1053_v18, 0.0  ;;  %v782_v21 = vmul.f32 0.2, %v1053_v18  ;;  %vm766_vm5 = vcmp.gt.f32.partialorder %v1069_v19, 0.0 }
 0x103   : > { %843 = vst [vmem:[%s1247_s9 + $0x40] sm:$0xff] %v811_v20  ;;  %v827_v22 = vsel %vm763_vm3, %v609_v13, %v795_v17  ;;  %v798_v23 = vmul.f32 0.2, %v1069_v19  ;;  %v548_v24 = vpop.f32.mrf.mxu0  ;;  %v612_v25 = vpop.f32.mrf.mxu1 }
 0x104   : > { %859 = vst [vmem:[%s1247_s9 + $0xc0] sm:$0xff] %v827_v22  ;;  %v814_v26 = vsel %vm750_vm4, %v1053_v18, %v782_v21  ;;  %vm748_vm6 = vcmp.gt.f32.partialorder %v548_v24, 0.0  ;;  %v780_v27 = vmul.f32 0.2, %v548_v24  ;;  %vm764_vm7 = vcmp.gt.f32.partialorder %v612_v25, 0.0 }
 0x105   : > { %846 = vst [vmem:[%s1247_s9 + $0x58] sm:$0xff] %v814_v26  ;;  %v830_v28 = vsel %vm766_vm5, %v1069_v19, %v798_v23  ;;  %v796_v29 = vmul.f32 0.2, %v612_v25  ;;  %v1056_v30 = vpop.f32.mrf.mxu0  ;;  %v1072_v31 = vpop.f32.mrf.mxu1 }
 0x106   : > { %862 = vst [vmem:[%s1247_s9 + $0xd8] sm:$0xff] %v830_v28  ;;  %v812_v32 = vsel %vm748_vm6, %v548_v24, %v780_v27  ;;  %vm753_vm8 = vcmp.gt.f32.partialorder %v1056_v30, 0.0  ;;  %v785_v33 = vmul.f32 0.2, %v1056_v30  ;;  %vm769_vm9 = vcmp.gt.f32.partialorder %v1072_v31, 0.0 }
 0x107   : > { %844 = vst [vmem:[%s1247_s9 + $0x48] sm:$0xff] %v812_v32  ;;  %v828_v34 = vsel %vm764_vm7, %v612_v25, %v796_v29  ;;  %v801_v35 = vmul.f32 0.2, %v1072_v31  ;;  %v561_v36 = vpop.f32.mrf.mxu0  ;;  %v625_v37 = vpop.f32.mrf.mxu1 }
 0x108   : > { %860 = vst [vmem:[%s1247_s9 + $0xc8] sm:$0xff] %v828_v34  ;;  %v817_v38 = vsel %vm753_vm8, %v1056_v30, %v785_v33  ;;  %vm751_vm10 = vcmp.gt.f32.partialorder %v561_v36, 0.0  ;;  %v783_v39 = vmul.f32 0.2, %v561_v36  ;;  %vm767_vm11 = vcmp.gt.f32.partialorder %v625_v37, 0.0 }
 0x109   : > { %849 = vst [vmem:[%s1247_s9 + $0x70] sm:$0xff] %v817_v38  ;;  %v833_v40 = vsel %vm769_vm9, %v1072_v31, %v801_v35  ;;  %v799_v41 = vmul.f32 0.2, %v625_v37  ;;  %v1057_v42 = vpop.f32.mrf.mxu0  ;;  %v1073_v43 = vpop.f32.mrf.mxu1 }
 0x10a   : > { %865 = vst [vmem:[%s1247_s9 + $0xf0] sm:$0xff] %v833_v40  ;;  %v815_v44 = vsel %vm751_vm10, %v561_v36, %v783_v39  ;;  %vm754_vm12 = vcmp.gt.f32.partialorder %v1057_v42, 0.0  ;;  %v786_v45 = vmul.f32 0.2, %v1057_v42  ;;  %vm770_vm13 = vcmp.gt.f32.partialorder %v1073_v43, 0.0 }
 0x10b   : > { %847 = vst [vmem:[%s1247_s9 + $0x60] sm:$0xff] %v815_v44  ;;  %v831_v46 = vsel %vm767_vm11, %v625_v37, %v799_v41  ;;  %v802_v47 = vmul.f32 0.2, %v1073_v43  ;;  %v564_v48 = vpop.f32.mrf.mxu0  ;;  %v628_v49 = vpop.f32.mrf.mxu1 }
 0x10c   : > { %863 = vst [vmem:[%s1247_s9 + $0xe0] sm:$0xff] %v831_v46  ;;  %v818_v50 = vsel %vm754_vm12, %v1057_v42, %v786_v45  ;;  %vm752_vm14 = vcmp.gt.f32.partialorder %v564_v48, 0.0  ;;  %v784_v51 = vmul.f32 0.2, %v564_v48  ;;  %vm768_vm15 = vcmp.gt.f32.partialorder %v628_v49, 0.0 }
 0x10d   : > { %850 = vst [vmem:[%s1247_s9 + $0x78] sm:$0xff] %v818_v50  ;;  %v834_v52 = vsel %vm770_vm13, %v1073_v43, %v802_v47  ;;  %v800_v53 = vmul.f32 0.2, %v628_v49 }
 0x10e   : > { %866 = vst [vmem:[%s1247_s9 + $0xf8] sm:$0xff] %v834_v52  ;;  %v816_v54 = vsel %vm752_vm14, %v564_v48, %v784_v51 }
 0x10f   : > { %848 = vst [vmem:[%s1247_s9 + $0x68] sm:$0xff] %v816_v54  ;;  %v832_v55 = vsel %vm768_vm15, %v628_v49, %v800_v53 }
 0x110   : > { %864 = vst [vmem:[%s1247_s9 + $0xe8] sm:$0xff] %v832_v55 }
 0x111 PF: > { %s12_s11 = sadd.s32 1, %s1160_s11   ;;  %s1293_s9 = smov %s1156_s10 }
 0x112   : > { %p9_p5 = scmp.ge.s32.totalorder %s12_s11, 10   ;;  %s1294_s10 = smov %s1296_s12 }
 0x114   :  { %11 = sbr.rel (!%p9_p5) target bundleno = 2 (0x2), region = 69 }

// kernel: generator_forward.39
= control target key start
LH: loop header
LB: loop body
LE: loop exit
PB: predicated region body
PF: predicated region fallthrough
CT: control target
= control target key end

     0   :  { %s1374_s15 = smov 0   ;;  %s1376_s16 = smov 0   ;;  %s1582_s0 = inlined_call_operand.vmem [shape: bf16[512,128], index: 0, kind: input, shape index: {}]   ;;  %s1583_s1 = inlined_call_operand.vmem [shape: bf16[128,128], index: 1, kind: input, shape index: {}]   ;;  %s1584_s2 = inlined_call_operand.vmem [shape: f32[512,128], index: 2, kind: output, shape index: {0}]   ;;  %s1585_s3 = inlined_call_operand.vmem [shape: f32[2,8,128], index: 3, kind: output, shape index: {1}]   ;;  %s1586_s4 = inlined_call_operand.vmem [shape: f32[2,8,128], index: 4, kind: output, shape index: {2}]  }
   0x1   :  { %s1378_s17 = smov 0  }
   0x2 LB: > { %s34_s18 = sadd.s32 1, %s1343_s16  ;;  %p1156_p0 = scmp.ge.s32.totalorder %s1347_s17, 1  ;;  %s1347_s17 = sphi %s1378_s17, %s15_s17   ;;  %s1343_s16 = sphi %s1376_s16, %s1588_s16   ;;  %s1339_s15 = sphi %s1374_s15, %s1587_s15  }
   0x3   : > { %p36_p1 = scmp.ge.s32.totalorder %s34_s18, 2  ;;  %p214_p2 = scmp.lt.s32.totalorder %s1347_s17, 3 }
   0x5   : > { %s1590_s18 = smov (%p36_p1, %s34_s18), 0  ;;  %p215_p3 = pnand %p1156_p0, %p214_p2 }
   0x6   : > { %s1157_s21 = sshll.u32 (!%p215_p3), %s1339_s15, 5  ;;  %p295_p5 = scmp.lt.s32.totalorder (!%p215_p3), %s1339_s15, 1 }
   0x7   : > { %218 = sbr.rel (%p215_p3) target bundleno = 321 (0x141), region = 28  ;;  %p269_p4 = scmp.lt.s32.totalorder (!%p215_p3), %s1157_s21, 63 }
   0xc   : > { %v1301_v0 = vld [vmem:[%s1583_s1 + $0x38] sm:$0xff]   ;;  %v1302_v1 = vld [vmem:[%s1583_s1 + $0x30] sm:$0xff]   ;;  %s1592_s21 = smov (!%p269_p4, %s1157_s21), 63  ;;  %v1303_v2 = vld [vmem:[%s1583_s1 + $0x28] sm:$0xff]   ;;  %s1594_s15 = smov (!%p295_p5, %s1339_s15), 1 }
   0xd   : > { %1213 = vmatprep.subr.bf16.mxu0 %v1301_v0  ;;  %1261 = vmatprep.subr.bf16.mxu1 %v1301_v0  ;;  %s1158_s26 = sshll.u32 %s1592_s21, 2  ;;  %v1304_v3 = vld [vmem:[%s1583_s1 + $0x20] sm:$0xff]   ;;  %v1305_v5 = vld [vmem:[%s1583_s1 + $0x18] sm:$0xff]   ;;  %v1306_v6 = vld [vmem:[%s1583_s1 + $0x10] sm:$0xff]   ;;  %s1160_s14 = sshll.u32 %s1592_s21, 3 }
   0xe   : > { %1214 = vmatpush3.bf16.msra.mxu0 %v1301_v0  ;;  %1269 = vmatpush3.bf16.msra.mxu1 %v1301_v0  ;;  %s1410_s29 = scalar_lea.vmem %s1582_s0, %s1158_s26  ;;  %v1307_v8 = vld [vmem:[%s1583_s1 + $0x8] sm:$0xff]   ;;  %v1308_v9 = vld [vmem:[%s1583_s1] sm:$0xff]   ;;  %s1447_s22 = scalar_lea.vmem %s1584_s2, %s1160_s14 }
   0xf   : > { %1215 = vmatprep.subr.bf16.mxu0 %v1302_v1  ;;  %1262 = vmatprep.subr.bf16.mxu1 %v1302_v1  ;;  %v1309_v4 = vld [vmem:[%s1410_s29] sm:$0xff]   ;;  %v1310_v10 = vld [vmem:[%s1410_s29 + $0x8] sm:$0xff]   ;;  %v1311_v12 = vld [vmem:[%s1410_s29 + $0x10] sm:$0xff]   ;;  %s1161_s21 = sshll.u32 %s1594_s15, 3 }
  0x10   : > { %1229 = vmatprep.mubr.bf16.mxu0 %v1309_v4  ;;  %v1317_v7 = vld [vmem:[%s1410_s29 + $0x40] sm:$0xff]   ;;  %v1318_v11 = vld [vmem:[%s1410_s29 + $0x48] sm:$0xff]   ;;  %v1319_v13 = vld [vmem:[%s1410_s29 + $0x50] sm:$0xff]   ;;  %s301_s25 = scalar_lea.vmem %s1585_s3, %s1161_s21  ;;  %s308_s28 = scalar_lea.vmem %s1586_s4, %s1161_s21 }
  0x11   : > { %1245 = vmatprep.mubr.bf16.mxu1 %v1317_v7  ;;  %v1312_v14 = vld [vmem:[%s1410_s29 + $0x18] sm:$0xff]   ;;  %v1313_v16 = vld [vmem:[%s1410_s29 + $0x20] sm:$0xff]   ;;  %v1314_v18 = vld [vmem:[%s1410_s29 + $0x28] sm:$0xff]  }
  0x12   : > { %1216 = vmatpush3.bf16.msra.mxu0 %v1302_v1  ;;  %1270 = vmatpush3.bf16.msra.mxu1 %v1302_v1  ;;  %v1320_v15 = vld [vmem:[%s1410_s29 + $0x58] sm:$0xff]   ;;  %v1321_v17 = vld [vmem:[%s1410_s29 + $0x60] sm:$0xff]   ;;  %v1322_v19 = vld [vmem:[%s1410_s29 + $0x68] sm:$0xff]  }
  0x13   : > { %1217 = vmatprep.subr.bf16.mxu0 %v1303_v2  ;;  %1263 = vmatprep.subr.bf16.mxu1 %v1303_v2  ;;  %v1315_v20 = vld [vmem:[%s1410_s29 + $0x30] sm:$0xff]   ;;  %v1316_v22 = vld [vmem:[%s1410_s29 + $0x38] sm:$0xff]  }
  0x14   : > { %v1323_v21 = vld [vmem:[%s1410_s29 + $0x70] sm:$0xff]   ;;  %v1324_v23 = vld [vmem:[%s1410_s29 + $0x78] sm:$0xff]  }
  0x16   : > { %1218 = vmatpush3.bf16.msra.mxu0 %v1303_v2  ;;  %1271 = vmatpush3.bf16.msra.mxu1 %v1303_v2 }
  0x17   : > { %1219 = vmatprep.subr.bf16.mxu0 %v1304_v3  ;;  %1264 = vmatprep.subr.bf16.mxu1 %v1304_v3 }
  0x1a   : > { %1220 = vmatpush3.bf16.msra.mxu0 %v1304_v3  ;;  %1272 = vmatpush3.bf16.msra.mxu1 %v1304_v3 }
  0x1b   : > { %1221 = vmatprep.subr.bf16.mxu0 %v1305_v5  ;;  %1265 = vmatprep.subr.bf16.mxu1 %v1305_v5 }
  0x1e   : > { %1222 = vmatpush3.bf16.msra.mxu0 %v1305_v5  ;;  %1273 = vmatpush3.bf16.msra.mxu1 %v1305_v5 }
  0x1f   : > { %1223 = vmatprep.subr.bf16.mxu0 %v1306_v6  ;;  %1266 = vmatprep.subr.bf16.mxu1 %v1306_v6 }
  0x22   : > { %1224 = vmatpush3.bf16.msra.mxu0 %v1306_v6  ;;  %1274 = vmatpush3.bf16.msra.mxu1 %v1306_v6 }
  0x23   : > { %1225 = vmatprep.subr.bf16.mxu0 %v1307_v8  ;;  %1267 = vmatprep.subr.bf16.mxu1 %v1307_v8 }
  0x26   : > { %1226 = vmatpush3.bf16.msra.mxu0 %v1307_v8  ;;  %1275 = vmatpush3.bf16.msra.mxu1 %v1307_v8 }
  0x27   : > { %1227 = vmatprep.subr.bf16.mxu0 %v1308_v9  ;;  %1268 = vmatprep.subr.bf16.mxu1 %v1308_v9 }
  0x2a   : > { %1228 = vmatpush3.bf16.msra.mxu0 %v1308_v9  ;;  %1276 = vmatpush3.bf16.msra.mxu1 %v1308_v9 }
  0x2d   : > { %1230 = vmatmul.mubr.bf16.vlgmr.msra.gmra.mxu0 %v1310_v10  ;;  %1246 = vmatmul.mubr.bf16.vlgmr.msra.gmra.mxu1 %v1318_v11 }
  0x2e   : > { %1233 = vmatprep.mubr.bf16.mxu0 %v1311_v12  ;;  %1249 = vmatprep.mubr.bf16.mxu1 %v1319_v13 }
  0x35   : > { %1234 = vmatmul.mubr.bf16.gmra.mxu0 %v1312_v14  ;;  %1250 = vmatmul.mubr.bf16.gmra.mxu1 %v1320_v15 }
  0x36   : > { %1237 = vmatprep.mubr.bf16.mxu0 %v1313_v16  ;;  %1253 = vmatprep.mubr.bf16.mxu1 %v1321_v17 }
  0x3d   : > { %1238 = vmatmul.mubr.bf16.gmra.mxu0 %v1314_v18  ;;  %1254 = vmatmul.mubr.bf16.gmra.mxu1 %v1322_v19 }
  0x3e   : > { %1241 = vmatprep.mubr.bf16.mxu0 %v1315_v20  ;;  %1257 = vmatprep.mubr.bf16.mxu1 %v1323_v21 }
  0x45   : > { %1242 = vmatmul.mubr.bf16.gmra.mxu0 %v1316_v22  ;;  %1258 = vmatmul.mubr.bf16.gmra.mxu1 %v1324_v23 }
  0xed   : > { %v1231_v24 = vpop.f32.mrf.mxu0  ;;  %v1449_v25 = vpop.f32.mrf.mxu1 }
  0xee   : > { %940 = vst [vmem:[%s1447_s22 + $0x10] sm:$0xff] %v1231_v24  ;;  %956 = vst [vmem:[%s1447_s22 + $0x90] sm:$0xff] %v1449_v25  ;;  %v869_v37 = vmul.f32 %v1231_v24, %v1231_v24 }
  0xef   : > { %v604_v26 = vpop.f32.mrf.mxu0  ;;  %v1454_v27 = vpop.f32.mrf.mxu1 }
  0xf0   : > { %938 = vst [vmem:[%s1447_s22] sm:$0xff] %v604_v26  ;;  %954 = vst [vmem:[%s1447_s22 + $0x80] sm:$0xff] %v1454_v27  ;;  %v867_v32 = vmul.f32 %v604_v26, %v604_v26 }
  0xf1   : > { %v1232_v28 = vpop.f32.mrf.mxu0  ;;  %v1459_v29 = vpop.f32.mrf.mxu1 }
  0xf2   : > { %941 = vst [vmem:[%s1447_s22 + $0x18] sm:$0xff] %v1232_v28  ;;  %957 = vst [vmem:[%s1447_s22 + $0x98] sm:$0xff] %v1459_v29  ;;  %v870_v42 = vmul.f32 %v1232_v28, %v1232_v28 }
  0xf3   : > { %v607_v30 = vpop.f32.mrf.mxu0  ;;  %v1464_v31 = vpop.f32.mrf.mxu1 }
  0xf4   : > { %v830_v33 = vadd.f32 %v607_v30, %v604_v26  ;;  %v868_v34 = vmul.f32 %v607_v30, %v607_v30  ;;  %939 = vst [vmem:[%s1447_s22 + $0x8] sm:$0xff] %v607_v30  ;;  %955 = vst [vmem:[%s1447_s22 + $0x88] sm:$0xff] %v1464_v31 }
  0xf5   : > { %v1235_v35 = vpop.f32.mrf.mxu0  ;;  %v1469_v36 = vpop.f32.mrf.mxu1 }
  0xf6   : > { %v831_v38 = vadd.f32 %v1231_v24, %v830_v33  ;;  %v899_v39 = vadd.f32 %v868_v34, %v867_v32  ;;  %944 = vst [vmem:[%s1447_s22 + $0x30] sm:$0xff] %v1235_v35  ;;  %960 = vst [vmem:[%s1447_s22 + $0xb0] sm:$0xff] %v1469_v36  ;;  %v873_v57 = vmul.f32 %v1235_v35, %v1235_v35 }
  0xf7   : > { %v620_v40 = vpop.f32.mrf.mxu0  ;;  %v1474_v41 = vpop.f32.mrf.mxu1 }
  0xf8   : > { %v900_v43 = vadd.f32 %v899_v39, %v869_v37  ;;  %v832_v44 = vadd.f32 %v1232_v28, %v831_v38  ;;  %942 = vst [vmem:[%s1447_s22 + $0x20] sm:$0xff] %v620_v40  ;;  %958 = vst [vmem:[%s1447_s22 + $0xa0] sm:$0xff] %v1474_v41  ;;  %v871_v48 = vmul.f32 %v620_v40, %v620_v40 }
  0xf9   : > { %v1236_v45 = vpop.f32.mrf.mxu0  ;;  %v1479_v46 = vpop.f32.mrf.mxu1 }
  0xfa   : > { %v833_v47 = vadd.f32 %v832_v44, %v620_v40  ;;  %v901_v49 = vadd.f32 %v900_v43, %v870_v42  ;;  %945 = vst [vmem:[%s1447_s22 + $0x38] sm:$0xff] %v1236_v45  ;;  %961 = vst [vmem:[%s1447_s22 + $0xb8] sm:$0xff] %v1479_v46  ;;  %v874_v62 = vmul.f32 %v1236_v45, %v1236_v45 }
  0xfb   : > { %v623_v50 = vpop.f32.mrf.mxu0  ;;  %v1484_v51 = vpop.f32.mrf.mxu1  ;;  %v883_v43 = vmul.f32 %v1454_v27, %v1454_v27 }
  0xfc   : > { %v902_v52 = vadd.f32 %v901_v49, %v871_v48  ;;  %v834_v53 = vadd.f32 %v833_v47, %v623_v50  ;;  %v872_v54 = vmul.f32 %v623_v50, %v623_v50  ;;  %943 = vst [vmem:[%s1447_s22 + $0x28] sm:$0xff] %v623_v50  ;;  %959 = vst [vmem:[%s1447_s22 + $0xa8] sm:$0xff] %v1484_v51 }
  0xfd   : > { %v1239_v55 = vpop.f32.mrf.mxu0  ;;  %v1489_v56 = vpop.f32.mrf.mxu1  ;;  %v884_v48 = vmul.f32 %v1464_v31, %v1464_v31  ;;  %v885_v50 = vmul.f32 %v1449_v25, %v1449_v25 }
  0xfe   : > { %v835_v58 = vadd.f32 %v1235_v35, %v834_v53  ;;  %v903_v59 = vadd.f32 %v902_v52, %v872_v54  ;;  %948 = vst [vmem:[%s1447_s22 + $0x50] sm:$0xff] %v1239_v55  ;;  %964 = vst [vmem:[%s1447_s22 + $0xd0] sm:$0xff] %v1489_v56  ;;  %v877_v13 = vmul.f32 %v1239_v55, %v1239_v55 }
  0xff   : > { %v636_v60 = vpop.f32.mrf.mxu0  ;;  %v1494_v61 = vpop.f32.mrf.mxu1  ;;  %v886_v54 = vmul.f32 %v1459_v29, %v1459_v29 }
 0x100   : > { %v904_v63 = vadd.f32 %v903_v59, %v873_v57  ;;  %v836_v0 = vadd.f32 %v1236_v45, %v835_v58  ;;  %946 = vst [vmem:[%s1447_s22 + $0x40] sm:$0xff] %v636_v60  ;;  %962 = vst [vmem:[%s1447_s22 + $0xc0] sm:$0xff] %v1494_v61  ;;  %v875_v4 = vmul.f32 %v636_v60, %v636_v60 }
 0x101   : > { %v1240_v1 = vpop.f32.mrf.mxu0  ;;  %v1499_v2 = vpop.f32.mrf.mxu1  ;;  %v887_v58 = vmul.f32 %v1474_v41, %v1474_v41 }
 0x102   : > { %v837_v3 = vadd.f32 %v836_v0, %v636_v60  ;;  %v905_v5 = vadd.f32 %v904_v63, %v874_v62  ;;  %949 = vst [vmem:[%s1447_s22 + $0x58] sm:$0xff] %v1240_v1  ;;  %965 = vst [vmem:[%s1447_s22 + $0xd8] sm:$0xff] %v1499_v2  ;;  %v878_v18 = vmul.f32 %v1240_v1, %v1240_v1 }
 0x103   : > { %v639_v6 = vpop.f32.mrf.mxu0  ;;  %v1504_v7 = vpop.f32.mrf.mxu1  ;;  %v888_v62 = vmul.f32 %v1484_v51, %v1484_v51 }
 0x104   : > { %v906_v8 = vadd.f32 %v905_v5, %v875_v4  ;;  %v838_v9 = vadd.f32 %v837_v3, %v639_v6  ;;  %v876_v10 = vmul.f32 %v639_v6, %v639_v6  ;;  %947 = vst [vmem:[%s1447_s22 + $0x48] sm:$0xff] %v639_v6  ;;  %963 = vst [vmem:[%s1447_s22 + $0xc8] sm:$0xff] %v1504_v7 }
 0x105   : > { %v1243_v11 = vpop.f32.mrf.mxu0  ;;  %v1509_v12 = vpop.f32.mrf.mxu1  ;;  %v891_v4 = vmul.f32 %v1494_v61, %v1494_v61 }
 0x106   : > { %v839_v14 = vadd.f32 %v1239_v55, %v838_v9  ;;  %v907_v15 = vadd.f32 %v906_v8, %v876_v10  ;;  %952 = vst [vmem:[%s1447_s22 + $0x70] sm:$0xff] %v1243_v11  ;;  %968 = vst [vmem:[%s1447_s22 + $0xf0] sm:$0xff] %v1509_v12  ;;  %v881_v35 = vmul.f32 %v1243_v11, %v1243_v11 }
 0x107   : > { %v652_v16 = vpop.f32.mrf.mxu0  ;;  %v716_v17 = vpop.f32.mrf.mxu1  ;;  %v892_v8 = vmul.f32 %v1504_v7, %v1504_v7 }
 0x108   : > { %v908_v19 = vadd.f32 %v907_v15, %v877_v13  ;;  %v840_v20 = vadd.f32 %v1240_v1, %v839_v14  ;;  %950 = vst [vmem:[%s1447_s22 + $0x60] sm:$0xff] %v652_v16  ;;  %966 = vst [vmem:[%s1447_s22 + $0xe0] sm:$0xff] %v716_v17  ;;  %v879_v24 = vmul.f32 %v652_v16, %v652_v16 }
 0x109   : > { %v1244_v21 = vpop.f32.mrf.mxu0  ;;  %v1516_v22 = vpop.f32.mrf.mxu1  ;;  %v895_v14 = vmul.f32 %v716_v17, %v716_v17 }
 0x10a   : > { %v841_v23 = vadd.f32 %v840_v20, %v652_v16  ;;  %v909_v26 = vadd.f32 %v908_v19, %v878_v18  ;;  %953 = vst [vmem:[%s1447_s22 + $0x78] sm:$0xff] %v1244_v21  ;;  %969 = vst [vmem:[%s1447_s22 + $0xf8] sm:$0xff] %v1516_v22  ;;  %v882_v39 = vmul.f32 %v1244_v21, %v1244_v21 }
 0x10b   : > { %v655_v28 = vpop.f32.mrf.mxu0  ;;  %v719_v30 = vpop.f32.mrf.mxu1  ;;  %v897_v19 = vmul.f32 %v1509_v12, %v1509_v12 }
 0x10c   : > { %v910_v32 = vadd.f32 %v909_v26, %v879_v24  ;;  %v842_v33 = vadd.f32 %v841_v23, %v655_v28  ;;  %v880_v34 = vmul.f32 %v655_v28, %v655_v28  ;;  %951 = vst [vmem:[%s1447_s22 + $0x68] sm:$0xff] %v655_v28  ;;  %967 = vst [vmem:[%s1447_s22 + $0xe8] sm:$0xff] %v719_v30 }
 0x10e   : > { %v843_v37 = vadd.f32 %v1243_v11, %v842_v33  ;;  %v911_v38 = vadd.f32 %v910_v32, %v880_v34 }
 0x110   : > { %v844_v40 = vadd.f32 %v1244_v21, %v843_v37  ;;  %v912_v42 = vadd.f32 %v911_v38, %v881_v35  ;;  %v898_v21 = vmul.f32 %v1516_v22, %v1516_v22 }
 0x112   : > { %v913_v44 = vadd.f32 %v912_v42, %v882_v39  ;;  %v845_v45 = vadd.f32 %v844_v40, %v1454_v27 }
 0x114   : > { %v846_v47 = vadd.f32 %v845_v45, %v1464_v31  ;;  %v914_v49 = vadd.f32 %v913_v44, %v883_v43 }
 0x116   : > { %v847_v52 = vadd.f32 %v1449_v25, %v846_v47  ;;  %v915_v53 = vadd.f32 %v914_v49, %v884_v48  ;;  %v889_v25 = vmul.f32 %v1469_v36, %v1469_v36 }
 0x118   : > { %v916_v55 = vadd.f32 %v915_v53, %v885_v50  ;;  %v848_v57 = vadd.f32 %v1459_v29, %v847_v52  ;;  %v890_v29 = vmul.f32 %v1479_v46, %v1479_v46 }
 0x11a   : > { %v849_v27 = vadd.f32 %v848_v57, %v1474_v41  ;;  %v917_v59 = vadd.f32 %v916_v55, %v886_v54 }
 0x11c   : > { %v918_v31 = vadd.f32 %v917_v59, %v887_v58  ;;  %v850_v60 = vadd.f32 %v849_v27, %v1484_v51 }
 0x11e   : > { %v851_v63 = vadd.f32 %v1469_v36, %v850_v60  ;;  %v919_v0 = vadd.f32 %v918_v31, %v888_v62  ;;  %v893_v36 = vmul.f32 %v1489_v56, %v1489_v56 }
 0x120   : > { %v920_v1 = vadd.f32 %v919_v0, %v889_v25  ;;  %v852_v3 = vadd.f32 %v1479_v46, %v851_v63  ;;  %v894_v46 = vmul.f32 %v1499_v2, %v1499_v2 }
 0x122   : > { %v853_v41 = vadd.f32 %v852_v3, %v1494_v61  ;;  %v921_v5 = vadd.f32 %v920_v1, %v890_v29 }
 0x124   : > { %v922_v6 = vadd.f32 %v921_v5, %v891_v4  ;;  %v854_v51 = vadd.f32 %v853_v41, %v1504_v7  ;;  %v896_v7 = vmul.f32 %v719_v30, %v719_v30 }
 0x126   : > { %v855_v9 = vadd.f32 %v1489_v56, %v854_v51  ;;  %v923_v10 = vadd.f32 %v922_v6, %v892_v8 }
 0x128   : > { %v924_v11 = vadd.f32 %v923_v10, %v893_v36  ;;  %v856_v61 = vadd.f32 %v1499_v2, %v855_v9 }
 0x12a   : > { %v857_v13 = vadd.f32 %v856_v61, %v716_v17  ;;  %v925_v15 = vadd.f32 %v924_v11, %v894_v46 }
 0x12c   : > { %v926_v16 = vadd.f32 %v925_v15, %v895_v14  ;;  %v858_v18 = vadd.f32 %v857_v13, %v719_v30 }
 0x12e   : > { %v859_v20 = vadd.f32 %v1509_v12, %v858_v18  ;;  %v927_v56 = vadd.f32 %v926_v16, %v896_v7 }
 0x130   : > { %v860_v23 = vadd.f32 %v1516_v22, %v859_v20  ;;  %v928_v2 = vadd.f32 %v927_v56, %v897_v19 }
 0x132   : > { %v861_v24 = vrot.slane %v860_v23, 4  ;;  %v929_v26 = vadd.f32 %v928_v2, %v898_v21 }
 0x134   : > { %v862_v17 = vadd.f32 %v861_v24, %v860_v23  ;;  %v930_v28 = vrot.slane %v929_v26, 4 }
 0x136   : > { %v863_v32 = vrot.slane %v862_v17, 2  ;;  %v931_v30 = vadd.f32 %v930_v28, %v929_v26 }
 0x138   : > { %v864_v33 = vadd.f32 %v863_v32, %v862_v17  ;;  %v932_v34 = vrot.slane %v931_v30, 2 }
 0x13a   : > { %v865_v35 = vrot.slane %v864_v33, 1  ;;  %v933_v12 = vadd.f32 %v932_v34, %v931_v30 }
 0x13c   : > { %v866_v37 = vadd.f32 %v865_v35, %v864_v33  ;;  %v934_v38 = vrot.slane %v933_v12, 1 }
 0x13e   : > { %v935_v22 = vadd.f32 %v934_v38, %v933_v12  ;;  %936 = vst [vmem:[%s301_s25] sm:$0xff] %v866_v37 }
 0x140   : > { %937 = vst [vmem:[%s308_s28] sm:$0xff] %v935_v22 }
 0x141 PF: > { %s15_s17 = sadd.s32 1, %s1347_s17   ;;  %s1587_s15 = smov %s1343_s16 }
 0x142   : > { %p12_p6 = scmp.ge.s32.totalorder %s15_s17, 4   ;;  %s1588_s16 = smov %s1590_s18 }
 0x144   :  { %14 = sbr.rel (!%p12_p6) target bundleno = 2 (0x2), region = 93 }

// kernel: generator_forward.40
= control target key start
LH: loop header
LB: loop body
LE: loop exit
PB: predicated region body
PF: predicated region fallthrough
CT: control target
= control target key end

     0   :  { %s1030_s0 = inlined_call_operand.vmem [shape: f32[512,128], index: 0, kind: input, shape index: {}]   ;;  %s1031_s1 = inlined_call_operand.vmem [shape: f32[1,128], index: 1, kind: input, shape index: {}]   ;;  %s1032_s2 = inlined_call_operand.vmem [shape: f32[1,128], index: 2, kind: input, shape index: {}]   ;;  %s1033_s3 = inlined_call_operand.vmem [shape: f32[512,128], index: 3, kind: output, shape index: {}]  }
   0x1   :  { %v14_v0 = vld [vmem:[%s1030_s0] sm:$0xff]  ;;  %v15_v4 = vld [vmem:[%s1030_s0 + $0x8] sm:$0xff]  ;;  %v16_v5 = vld [vmem:[%s1030_s0 + $0x10] sm:$0xff] }
   0x2   :  { %v508_v1 = vld [vmem:[%s1031_s1] ss:$0 sm:$0xff]  ;;  %v17_v6 = vld [vmem:[%s1030_s0 + $0x18] sm:$0xff]  ;;  %v19_v11 = vld [vmem:[%s1030_s0 + $0x28] sm:$0xff] }
   0x3   :  { %v513_v2 = vld [vmem:[%s1032_s2] ss:$0 sm:$0xff]  ;;  %v85_v3 = vmul.f32 %v508_v1, %v14_v0  ;;  %v86_v7 = vmul.f32 %v508_v1, %v15_v4  ;;  %v87_v8 = vmul.f32 %v508_v1, %v16_v5  ;;  %v88_v9 = vmul.f32 %v508_v1, %v17_v6  ;;  %v20_v12 = vld [vmem:[%s1030_s0 + $0x30] sm:$0xff]  ;;  %v21_v17 = vld [vmem:[%s1030_s0 + $0x38] sm:$0xff] }
   0x4   :  { %v18_v10 = vld [vmem:[%s1030_s0 + $0x20] sm:$0xff]  ;;  %v90_v15 = vmul.f32 %v508_v1, %v19_v11  ;;  %v91_v16 = vmul.f32 %v508_v1, %v20_v12  ;;  %v92_v21 = vmul.f32 %v508_v1, %v21_v17  ;;  %v23_v30 = vld [vmem:[%s1030_s0 + $0x48] sm:$0xff]  ;;  %v24_v31 = vld [vmem:[%s1030_s0 + $0x50] sm:$0xff] }
   0x5   :  { %v156_v13 = vadd.f32 %v513_v2, %v85_v3  ;;  %v89_v14 = vmul.f32 %v508_v1, %v18_v10  ;;  %v157_v18 = vadd.f32 %v513_v2, %v86_v7  ;;  %v158_v19 = vadd.f32 %v513_v2, %v87_v8  ;;  %v22_v25 = vld [vmem:[%s1030_s0 + $0x40] sm:$0xff]  ;;  %v25_v43 = vld [vmem:[%s1030_s0 + $0x58] sm:$0xff]  ;;  %v27_v45 = vld [vmem:[%s1030_s0 + $0x68] sm:$0xff] }
   0x6   :  { %v159_v20 = vadd.f32 %v513_v2, %v88_v9  ;;  %v161_v24 = vadd.f32 %v513_v2, %v90_v15  ;;  %v162_v37 = vadd.f32 %v513_v2, %v91_v16  ;;  %v163_v38 = vadd.f32 %v513_v2, %v92_v21  ;;  %v26_v44 = vld [vmem:[%s1030_s0 + $0x60] sm:$0xff]  ;;  %v28_v56 = vld [vmem:[%s1030_s0 + $0x70] sm:$0xff]  ;;  %v29_v4 = vld [vmem:[%s1030_s0 + $0x78] sm:$0xff] }
   0x7   :  { %vm220_vm0 = vcmp.gt.f32.partialorder %v156_v13, 0.0  ;;  %v284_v22 = vmul.f32 0.2, %v156_v13  ;;  %v160_v23 = vadd.f32 %v513_v2, %v89_v14  ;;  %vm221_vm1 = vcmp.gt.f32.partialorder %v157_v18, 0.0  ;;  %v30_v5 = vld [vmem:[%s1030_s0 + $0x80] sm:$0xff]  ;;  %v31_v9 = vld [vmem:[%s1030_s0 + $0x88] sm:$0xff] }
   0x8   :  { %v285_v26 = vmul.f32 0.2, %v157_v18  ;;  %vm222_vm2 = vcmp.gt.f32.partialorder %v158_v19, 0.0  ;;  %v286_v27 = vmul.f32 0.2, %v158_v19  ;;  %vm223_vm3 = vcmp.gt.f32.partialorder %v159_v20, 0.0 }
   0x9   :  { %v348_v28 = vsel %vm220_vm0, %v156_v13, %v284_v22  ;;  %v287_v29 = vmul.f32 0.2, %v159_v20  ;;  %vm224_vm4 = vcmp.gt.f32.partialorder %v160_v23, 0.0  ;;  %v288_v34 = vmul.f32 0.2, %v160_v23  ;;  %v32_v10 = vld [vmem:[%s1030_s0 + $0x90] sm:$0xff] }
   0xa   :  { %412 = vst [vmem:[%s1033_s3] sm:$0xff] %v348_v28  ;;  %v349_v32 = vsel %vm221_vm1, %v157_v18, %v285_v26  ;;  %v350_v33 = vsel %vm222_vm2, %v158_v19, %v286_v27  ;;  %vm225_vm5 = vcmp.gt.f32.partialorder %v161_v24, 0.0  ;;  %v289_v36 = vmul.f32 0.2, %v161_v24  ;;  %v33_v17 = vld [vmem:[%s1030_s0 + $0x98] sm:$0xff]  ;;  %v34_v18 = vld [vmem:[%s1030_s0 + $0xa0] sm:$0xff] }
   0xb   :  { %413 = vst [vmem:[%s1033_s3 + $0x8] sm:$0xff] %v349_v32  ;;  %414 = vst [vmem:[%s1033_s3 + $0x10] sm:$0xff] %v350_v33  ;;  %v351_v35 = vsel %vm223_vm3, %v159_v20, %v287_v29  ;;  %v352_v39 = vsel %vm224_vm4, %v160_v23, %v288_v34  ;;  %v93_v40 = vmul.f32 %v508_v1, %v22_v25  ;;  %vm226_vm6 = vcmp.gt.f32.partialorder %v162_v37, 0.0  ;;  %v35_v32 = vld [vmem:[%s1030_s0 + $0xa8] sm:$0xff]  ;;  %v36_v33 = vld [vmem:[%s1030_s0 + $0xb0] sm:$0xff] }
   0xc   :  { %415 = vst [vmem:[%s1033_s3 + $0x18] sm:$0xff] %v351_v35  ;;  %v94_v41 = vmul.f32 %v508_v1, %v23_v30  ;;  %v95_v42 = vmul.f32 %v508_v1, %v24_v31  ;;  %416 = vst [vmem:[%s1033_s3 + $0x20] sm:$0xff] %v352_v39  ;;  %v353_v46 = vsel %vm225_vm5, %v161_v24, %v289_v36  ;;  %v290_v47 = vmul.f32 0.2, %v162_v37 }
   0xd   :  { %vm227_vm7 = vcmp.gt.f32.partialorder %v163_v38, 0.0  ;;  %417 = vst [vmem:[%s1033_s3 + $0x28] sm:$0xff] %v353_v46  ;;  %v291_v48 = vmul.f32 0.2, %v163_v38  ;;  %v164_v49 = vadd.f32 %v513_v2, %v93_v40  ;;  %v96_v53 = vmul.f32 %v508_v1, %v25_v43  ;;  %v37_v40 = vld [vmem:[%s1030_s0 + $0xb8] sm:$0xff]  ;;  %v39_v46 = vld [vmem:[%s1030_s0 + $0xc8] sm:$0xff] }
   0xe   :  { %v165_v50 = vadd.f32 %v513_v2, %v94_v41  ;;  %v166_v51 = vadd.f32 %v513_v2, %v95_v42  ;;  %v354_v52 = vsel %vm226_vm6, %v162_v37, %v290_v47  ;;  %v97_v54 = vmul.f32 %v508_v1, %v26_v44  ;;  %v40_v47 = vld [vmem:[%s1030_s0 + $0xd0] sm:$0xff] }
   0xf   :  { %v98_v55 = vmul.f32 %v508_v1, %v27_v45  ;;  %418 = vst [vmem:[%s1033_s3 + $0x30] sm:$0xff] %v354_v52  ;;  %v355_v57 = vsel %vm227_vm7, %v163_v38, %v291_v48  ;;  %vm228_vm8 = vcmp.gt.f32.partialorder %v164_v49, 0.0  ;;  %v292_v58 = vmul.f32 0.2, %v164_v49  ;;  %v38_v45 = vld [vmem:[%s1030_s0 + $0xc0] sm:$0xff] }
  0x10   :  { %vm229_vm9 = vcmp.gt.f32.partialorder %v165_v50, 0.0  ;;  %419 = vst [vmem:[%s1033_s3 + $0x38] sm:$0xff] %v355_v57  ;;  %v293_v59 = vmul.f32 0.2, %v165_v50  ;;  %vm230_vm10 = vcmp.gt.f32.partialorder %v166_v51, 0.0  ;;  %v167_v61 = vadd.f32 %v513_v2, %v96_v53 }
  0x11   :  { %v294_v60 = vmul.f32 0.2, %v166_v51  ;;  %v356_v62 = vsel %vm228_vm8, %v164_v49, %v292_v58  ;;  %v168_v63 = vadd.f32 %v513_v2, %v97_v54  ;;  %v169_v0 = vadd.f32 %v513_v2, %v98_v55  ;;  %v41_v58 = vld [vmem:[%s1030_s0 + $0xd8] sm:$0xff] }
  0x12   :  { %v99_v3 = vmul.f32 %v508_v1, %v28_v56  ;;  %420 = vst [vmem:[%s1033_s3 + $0x40] sm:$0xff] %v356_v62  ;;  %v357_v6 = vsel %vm229_vm9, %v165_v50, %v293_v59  ;;  %vm231_vm11 = vcmp.gt.f32.partialorder %v167_v61, 0.0  ;;  %v295_v8 = vmul.f32 0.2, %v167_v61  ;;  %v42_v59 = vld [vmem:[%s1030_s0 + $0xe0] sm:$0xff] }
  0x13   :  { %v358_v7 = vsel %vm230_vm10, %v166_v51, %v294_v60  ;;  %421 = vst [vmem:[%s1033_s3 + $0x48] sm:$0xff] %v357_v6  ;;  %vm232_vm12 = vcmp.gt.f32.partialorder %v168_v63, 0.0  ;;  %v296_v11 = vmul.f32 0.2, %v168_v63  ;;  %vm233_vm13 = vcmp.gt.f32.partialorder %v169_v0, 0.0 }
  0x14   :  { %422 = vst [vmem:[%s1033_s3 + $0x50] sm:$0xff] %v358_v7  ;;  %v297_v12 = vmul.f32 0.2, %v169_v0  ;;  %v359_v13 = vsel %vm231_vm11, %v167_v61, %v295_v8  ;;  %v170_v14 = vadd.f32 %v513_v2, %v99_v3  ;;  %v100_v15 = vmul.f32 %v508_v1, %v29_v4 }
  0x15   :  { %v101_v16 = vmul.f32 %v508_v1, %v30_v5  ;;  %423 = vst [vmem:[%s1033_s3 + $0x58] sm:$0xff] %v359_v13  ;;  %v360_v19 = vsel %vm232_vm12, %v168_v63, %v296_v11  ;;  %v102_v21 = vmul.f32 %v508_v1, %v31_v9  ;;  %v103_v22 = vmul.f32 %v508_v1, %v32_v10  ;;  %v43_v10 = vld [vmem:[%s1030_s0 + $0xe8] sm:$0xff]  ;;  %v44_v11 = vld [vmem:[%s1030_s0 + $0xf0] sm:$0xff] }
  0x16   :  { %v361_v20 = vsel %vm233_vm13, %v169_v0, %v297_v12  ;;  %424 = vst [vmem:[%s1033_s3 + $0x60] sm:$0xff] %v360_v19  ;;  %vm234_vm14 = vcmp.gt.f32.partialorder %v170_v14, 0.0  ;;  %v298_v23 = vmul.f32 0.2, %v170_v14  ;;  %v171_v24 = vadd.f32 %v513_v2, %v100_v15 }
  0x17   :  { %425 = vst [vmem:[%s1033_s3 + $0x68] sm:$0xff] %v361_v20  ;;  %v172_v25 = vadd.f32 %v513_v2, %v101_v16  ;;  %v173_v26 = vadd.f32 %v513_v2, %v102_v21  ;;  %v174_v27 = vadd.f32 %v513_v2, %v103_v22  ;;  %v104_v28 = vmul.f32 %v508_v1, %v33_v17 }
  0x18   :  { %v105_v29 = vmul.f32 %v508_v1, %v34_v18  ;;  %v362_v30 = vsel %vm234_vm14, %v170_v14, %v298_v23  ;;  %vm235_vm15 = vcmp.gt.f32.partialorder %v171_v24, 0.0  ;;  %v299_v31 = vmul.f32 0.2, %v171_v24  ;;  %v45_v18 = vld [vmem:[%s1030_s0 + $0xf8] sm:$0xff]  ;;  %v46_v23 = vld [vmem:[%s1030_s0 + $0x100] sm:$0xff] }
  0x19   :  { %vm236_vm0 = vcmp.gt.f32.partialorder %v172_v25, 0.0  ;;  %426 = vst [vmem:[%s1033_s3 + $0x70] sm:$0xff] %v362_v30  ;;  %v300_v34 = vmul.f32 0.2, %v172_v25  ;;  %vm237_vm1 = vcmp.gt.f32.partialorder %v173_v26, 0.0  ;;  %vm238_vm2 = vcmp.gt.f32.partialorder %v174_v27, 0.0 }
  0x1a   :  { %v301_v35 = vmul.f32 0.2, %v173_v26  ;;  %v363_v36 = vsel %vm235_vm15, %v171_v24, %v299_v31  ;;  %v302_v37 = vmul.f32 0.2, %v174_v27  ;;  %v175_v38 = vadd.f32 %v513_v2, %v104_v28  ;;  %v47_v24 = vld [vmem:[%s1030_s0 + $0x108] sm:$0xff] }
  0x1b   :  { %v176_v39 = vadd.f32 %v513_v2, %v105_v29  ;;  %427 = vst [vmem:[%s1033_s3 + $0x78] sm:$0xff] %v363_v36  ;;  %v364_v41 = vsel %vm236_vm0, %v172_v25, %v300_v34  ;;  %v106_v43 = vmul.f32 %v508_v1, %v35_v32  ;;  %v107_v44 = vmul.f32 %v508_v1, %v36_v33  ;;  %v48_v25 = vld [vmem:[%s1030_s0 + $0x110] sm:$0xff]  ;;  %v49_v36 = vld [vmem:[%s1030_s0 + $0x118] sm:$0xff] }
  0x1c   :  { %v365_v42 = vsel %vm237_vm1, %v173_v26, %v301_v35  ;;  %428 = vst [vmem:[%s1033_s3 + $0x80] sm:$0xff] %v364_v41  ;;  %v366_v48 = vsel %vm238_vm2, %v174_v27, %v302_v37  ;;  %vm239_vm3 = vcmp.gt.f32.partialorder %v175_v38, 0.0  ;;  %v303_v49 = vmul.f32 0.2, %v175_v38  ;;  %v50_v37 = vld [vmem:[%s1030_s0 + $0x120] sm:$0xff] }
  0x1d   :  { %429 = vst [vmem:[%s1033_s3 + $0x88] sm:$0xff] %v365_v42  ;;  %vm240_vm4 = vcmp.gt.f32.partialorder %v176_v39, 0.0  ;;  %430 = vst [vmem:[%s1033_s3 + $0x90] sm:$0xff] %v366_v48  ;;  %v304_v50 = vmul.f32 0.2, %v176_v39  ;;  %v177_v51 = vadd.f32 %v513_v2, %v106_v43  ;;  %v178_v52 = vadd.f32 %v513_v2, %v107_v44 }
  0x1e   :  { %v108_v53 = vmul.f32 %v508_v1, %v37_v40  ;;  %v367_v54 = vsel %vm239_vm3, %v175_v38, %v303_v49  ;;  %v109_v55 = vmul.f32 %v508_v1, %v38_v45  ;;  %v110_v56 = vmul.f32 %v508_v1, %v39_v46 }
  0x1f   :  { %v111_v57 = vmul.f32 %v508_v1, %v40_v47  ;;  %431 = vst [vmem:[%s1033_s3 + $0x98] sm:$0xff] %v367_v54  ;;  %v368_v60 = vsel %vm240_vm4, %v176_v39, %v304_v50  ;;  %vm241_vm5 = vcmp.gt.f32.partialorder %v177_v51, 0.0  ;;  %v305_v61 = vmul.f32 0.2, %v177_v51  ;;  %v51_v50 = vld [vmem:[%s1030_s0 + $0x128] sm:$0xff] }
  0x20   :  { %vm242_vm6 = vcmp.gt.f32.partialorder %v178_v52, 0.0  ;;  %432 = vst [vmem:[%s1033_s3 + $0xa0] sm:$0xff] %v368_v60  ;;  %v306_v62 = vmul.f32 0.2, %v178_v52  ;;  %v179_v63 = vadd.f32 %v513_v2, %v108_v53  ;;  %v180_v0 = vadd.f32 %v513_v2, %v109_v55 }
  0x21   :  { %v181_v3 = vadd.f32 %v513_v2, %v110_v56  ;;  %v369_v4 = vsel %vm241_vm5, %v177_v51, %v305_v61  ;;  %v182_v5 = vadd.f32 %v513_v2, %v111_v57  ;;  %v112_v6 = vmul.f32 %v508_v1, %v41_v58  ;;  %v52_v51 = vld [vmem:[%s1030_s0 + $0x130] sm:$0xff]  ;;  %v53_v58 = vld [vmem:[%s1030_s0 + $0x138] sm:$0xff] }
  0x22   :  { %v113_v7 = vmul.f32 %v508_v1, %v42_v59  ;;  %433 = vst [vmem:[%s1033_s3 + $0xa8] sm:$0xff] %v369_v4  ;;  %v370_v8 = vsel %vm242_vm6, %v178_v52, %v306_v62  ;;  %vm243_vm7 = vcmp.gt.f32.partialorder %v179_v63, 0.0  ;;  %v307_v9 = vmul.f32 0.2, %v179_v63 }
  0x23   :  { %vm244_vm8 = vcmp.gt.f32.partialorder %v180_v0, 0.0  ;;  %434 = vst [vmem:[%s1033_s3 + $0xb0] sm:$0xff] %v370_v8  ;;  %v308_v12 = vmul.f32 0.2, %v180_v0  ;;  %vm245_vm9 = vcmp.gt.f32.partialorder %v181_v3, 0.0  ;;  %vm246_vm10 = vcmp.gt.f32.partialorder %v182_v5, 0.0 }
  0x24   :  { %v309_v13 = vmul.f32 0.2, %v181_v3  ;;  %v371_v14 = vsel %vm243_vm7, %v179_v63, %v307_v9  ;;  %v310_v15 = vmul.f32 0.2, %v182_v5  ;;  %v183_v16 = vadd.f32 %v513_v2, %v112_v6  ;;  %v54_v63 = vld [vmem:[%s1030_s0 + $0x140] sm:$0xff] }
  0x25   :  { %v184_v17 = vadd.f32 %v513_v2, %v113_v7  ;;  %435 = vst [vmem:[%s1033_s3 + $0xb8] sm:$0xff] %v371_v14  ;;  %v372_v19 = vsel %vm244_vm8, %v180_v0, %v308_v12  ;;  %v114_v21 = vmul.f32 %v508_v1, %v43_v10  ;;  %v115_v22 = vmul.f32 %v508_v1, %v44_v11  ;;  %v55_v0 = vld [vmem:[%s1030_s0 + $0x148] sm:$0xff]  ;;  %v57_v14 = vld [vmem:[%s1030_s0 + $0x158] sm:$0xff] }
  0x26   :  { %v373_v20 = vsel %vm245_vm9, %v181_v3, %v309_v13  ;;  %436 = vst [vmem:[%s1033_s3 + $0xc0] sm:$0xff] %v372_v19  ;;  %v374_v26 = vsel %vm246_vm10, %v182_v5, %v310_v15  ;;  %vm247_vm11 = vcmp.gt.f32.partialorder %v183_v16, 0.0  ;;  %v311_v27 = vmul.f32 0.2, %v183_v16  ;;  %v56_v3 = vld [vmem:[%s1030_s0 + $0x150] sm:$0xff]  ;;  %v58_v15 = vld [vmem:[%s1030_s0 + $0x160] sm:$0xff] }
  0x27   :  { %437 = vst [vmem:[%s1033_s3 + $0xc8] sm:$0xff] %v373_v20  ;;  %vm248_vm12 = vcmp.gt.f32.partialorder %v184_v17, 0.0  ;;  %438 = vst [vmem:[%s1033_s3 + $0xd0] sm:$0xff] %v374_v26  ;;  %v312_v28 = vmul.f32 0.2, %v184_v17  ;;  %v185_v29 = vadd.f32 %v513_v2, %v114_v21  ;;  %v186_v30 = vadd.f32 %v513_v2, %v115_v22 }
  0x28   :  { %v116_v31 = vmul.f32 %v508_v1, %v45_v18  ;;  %v375_v32 = vsel %vm247_vm11, %v183_v16, %v311_v27  ;;  %v117_v33 = vmul.f32 %v508_v1, %v46_v23  ;;  %v118_v34 = vmul.f32 %v508_v1, %v47_v24 }
  0x29   :  { %v119_v35 = vmul.f32 %v508_v1, %v48_v25  ;;  %439 = vst [vmem:[%s1033_s3 + $0xd8] sm:$0xff] %v375_v32  ;;  %v376_v38 = vsel %vm248_vm12, %v184_v17, %v312_v28  ;;  %vm249_vm13 = vcmp.gt.f32.partialorder %v185_v29, 0.0  ;;  %v313_v39 = vmul.f32 0.2, %v185_v29  ;;  %v59_v28 = vld [vmem:[%s1030_s0 + $0x168] sm:$0xff] }
  0x2a   :  { %vm250_vm14 = vcmp.gt.f32.partialorder %v186_v30, 0.0  ;;  %440 = vst [vmem:[%s1033_s3 + $0xe0] sm:$0xff] %v376_v38  ;;  %v314_v40 = vmul.f32 0.2, %v186_v30  ;;  %v187_v41 = vadd.f32 %v513_v2, %v116_v31  ;;  %v188_v42 = vadd.f32 %v513_v2, %v117_v33 }
  0x2b   :  { %v189_v43 = vadd.f32 %v513_v2, %v118_v34  ;;  %v377_v44 = vsel %vm249_vm13, %v185_v29, %v313_v39  ;;  %v190_v45 = vadd.f32 %v513_v2, %v119_v35  ;;  %v120_v46 = vmul.f32 %v508_v1, %v49_v36  ;;  %v60_v29 = vld [vmem:[%s1030_s0 + $0x170] sm:$0xff]  ;;  %v61_v36 = vld [vmem:[%s1030_s0 + $0x178] sm:$0xff] }
  0x2c   :  { %v121_v47 = vmul.f32 %v508_v1, %v50_v37  ;;  %441 = vst [vmem:[%s1033_s3 + $0xe8] sm:$0xff] %v377_v44  ;;  %v378_v48 = vsel %vm250_vm14, %v186_v30, %v314_v40  ;;  %vm251_vm15 = vcmp.gt.f32.partialorder %v187_v41, 0.0  ;;  %v315_v49 = vmul.f32 0.2, %v187_v41 }
  0x2d   :  { %vm252_vm0 = vcmp.gt.f32.partialorder %v188_v42, 0.0  ;;  %442 = vst [vmem:[%s1033_s3 + $0xf0] sm:$0xff] %v378_v48  ;;  %v316_v52 = vmul.f32 0.2, %v188_v42  ;;  %vm253_vm1 = vcmp.gt.f32.partialorder %v189_v43, 0.0  ;;  %vm254_vm2 = vcmp.gt.f32.partialorder %v190_v45, 0.0 }
  0x2e   :  { %v317_v53 = vmul.f32 0.2, %v189_v43  ;;  %v379_v54 = vsel %vm251_vm15, %v187_v41, %v315_v49  ;;  %v318_v55 = vmul.f32 0.2, %v190_v45  ;;  %v191_v56 = vadd.f32 %v513_v2, %v120_v46  ;;  %v62_v41 = vld [vmem:[%s1030_s0 + $0x180] sm:$0xff] }
  0x2f   :  { %v192_v57 = vadd.f32 %v513_v2, %v121_v47  ;;  %443 = vst [vmem:[%s1033_s3 + $0xf8] sm:$0xff] %v379_v54  ;;  %v380_v59 = vsel %vm252_vm0, %v188_v42, %v316_v52  ;;  %v122_v61 = vmul.f32 %v508_v1, %v51_v50  ;;  %v123_v62 = vmul.f32 %v508_v1, %v52_v51  ;;  %v63_v42 = vld [vmem:[%s1030_s0 + $0x188] sm:$0xff]  ;;  %v65_v54 = vld [vmem:[%s1030_s0 + $0x198] sm:$0xff] }
  0x30   :  { %v381_v60 = vsel %vm253_vm1, %v189_v43, %v317_v53  ;;  %444 = vst [vmem:[%s1033_s3 + $0x100] sm:$0xff] %v380_v59  ;;  %v382_v4 = vsel %vm254_vm2, %v190_v45, %v318_v55  ;;  %vm255_vm3 = vcmp.gt.f32.partialorder %v191_v56, 0.0  ;;  %v319_v5 = vmul.f32 0.2, %v191_v56  ;;  %v64_v43 = vld [vmem:[%s1030_s0 + $0x190] sm:$0xff]  ;;  %v66_v55 = vld [vmem:[%s1030_s0 + $0x1a0] sm:$0xff] }
  0x31   :  { %445 = vst [vmem:[%s1033_s3 + $0x108] sm:$0xff] %v381_v60  ;;  %vm256_vm4 = vcmp.gt.f32.partialorder %v192_v57, 0.0  ;;  %446 = vst [vmem:[%s1033_s3 + $0x110] sm:$0xff] %v382_v4  ;;  %v320_v6 = vmul.f32 0.2, %v192_v57  ;;  %v193_v7 = vadd.f32 %v513_v2, %v122_v61  ;;  %v194_v8 = vadd.f32 %v513_v2, %v123_v62 }
  0x32   :  { %v124_v9 = vmul.f32 %v508_v1, %v53_v58  ;;  %v383_v10 = vsel %vm255_vm3, %v191_v56, %v319_v5  ;;  %v125_v11 = vmul.f32 %v508_v1, %v54_v63  ;;  %v126_v12 = vmul.f32 %v508_v1, %v55_v0 }
  0x33   :  { %v127_v13 = vmul.f32 %v508_v1, %v56_v3  ;;  %447 = vst [vmem:[%s1033_s3 + $0x118] sm:$0xff] %v383_v10  ;;  %v384_v16 = vsel %vm256_vm4, %v192_v57, %v320_v6  ;;  %vm257_vm5 = vcmp.gt.f32.partialorder %v193_v7, 0.0  ;;  %v321_v17 = vmul.f32 0.2, %v193_v7  ;;  %v67_v6 = vld [vmem:[%s1030_s0 + $0x1a8] sm:$0xff] }
  0x34   :  { %vm258_vm6 = vcmp.gt.f32.partialorder %v194_v8, 0.0  ;;  %448 = vst [vmem:[%s1033_s3 + $0x120] sm:$0xff] %v384_v16  ;;  %v322_v18 = vmul.f32 0.2, %v194_v8  ;;  %v195_v19 = vadd.f32 %v513_v2, %v124_v9  ;;  %v196_v20 = vadd.f32 %v513_v2, %v125_v11 }
  0x35   :  { %v197_v21 = vadd.f32 %v513_v2, %v126_v12  ;;  %v385_v22 = vsel %vm257_vm5, %v193_v7, %v321_v17  ;;  %v198_v23 = vadd.f32 %v513_v2, %v127_v13  ;;  %v128_v24 = vmul.f32 %v508_v1, %v57_v14  ;;  %v68_v7 = vld [vmem:[%s1030_s0 + $0x1b0] sm:$0xff]  ;;  %v69_v14 = vld [vmem:[%s1030_s0 + $0x1b8] sm:$0xff] }
  0x36   :  { %v129_v25 = vmul.f32 %v508_v1, %v58_v15  ;;  %449 = vst [vmem:[%s1033_s3 + $0x128] sm:$0xff] %v385_v22  ;;  %v386_v26 = vsel %vm258_vm6, %v194_v8, %v322_v18  ;;  %vm259_vm7 = vcmp.gt.f32.partialorder %v195_v19, 0.0  ;;  %v323_v27 = vmul.f32 0.2, %v195_v19 }
  0x37   :  { %vm260_vm8 = vcmp.gt.f32.partialorder %v196_v20, 0.0  ;;  %450 = vst [vmem:[%s1033_s3 + $0x130] sm:$0xff] %v386_v26  ;;  %v324_v30 = vmul.f32 0.2, %v196_v20  ;;  %vm261_vm9 = vcmp.gt.f32.partialorder %v197_v21, 0.0  ;;  %vm262_vm10 = vcmp.gt.f32.partialorder %v198_v23, 0.0 }
  0x38   :  { %v325_v31 = vmul.f32 0.2, %v197_v21  ;;  %v387_v32 = vsel %vm259_vm7, %v195_v19, %v323_v27  ;;  %v326_v33 = vmul.f32 0.2, %v198_v23  ;;  %v199_v34 = vadd.f32 %v513_v2, %v128_v24  ;;  %v70_v19 = vld [vmem:[%s1030_s0 + $0x1c0] sm:$0xff] }
  0x39   :  { %v200_v35 = vadd.f32 %v513_v2, %v129_v25  ;;  %451 = vst [vmem:[%s1033_s3 + $0x138] sm:$0xff] %v387_v32  ;;  %v388_v37 = vsel %vm260_vm8, %v196_v20, %v324_v30  ;;  %v130_v39 = vmul.f32 %v508_v1, %v59_v28  ;;  %v131_v40 = vmul.f32 %v508_v1, %v60_v29  ;;  %v71_v20 = vld [vmem:[%s1030_s0 + $0x1c8] sm:$0xff]  ;;  %v73_v32 = vld [vmem:[%s1030_s0 + $0x1d8] sm:$0xff] }
  0x3a   :  { %v389_v38 = vsel %vm261_vm9, %v197_v21, %v325_v31  ;;  %452 = vst [vmem:[%s1033_s3 + $0x140] sm:$0xff] %v388_v37  ;;  %v390_v44 = vsel %vm262_vm10, %v198_v23, %v326_v33  ;;  %vm263_vm11 = vcmp.gt.f32.partialorder %v199_v34, 0.0  ;;  %v327_v45 = vmul.f32 0.2, %v199_v34  ;;  %v72_v21 = vld [vmem:[%s1030_s0 + $0x1d0] sm:$0xff]  ;;  %v74_v33 = vld [vmem:[%s1030_s0 + $0x1e0] sm:$0xff] }
  0x3b   :  { %453 = vst [vmem:[%s1033_s3 + $0x148] sm:$0xff] %v389_v38  ;;  %vm264_vm12 = vcmp.gt.f32.partialorder %v200_v35, 0.0  ;;  %454 = vst [vmem:[%s1033_s3 + $0x150] sm:$0xff] %v390_v44  ;;  %v328_v46 = vmul.f32 0.2, %v200_v35  ;;  %v201_v47 = vadd.f32 %v513_v2, %v130_v39  ;;  %v202_v48 = vadd.f32 %v513_v2, %v131_v40 }
  0x3c   :  { %v132_v49 = vmul.f32 %v508_v1, %v61_v36  ;;  %v391_v50 = vsel %vm263_vm11, %v199_v34, %v327_v45  ;;  %v133_v51 = vmul.f32 %v508_v1, %v62_v41  ;;  %v134_v52 = vmul.f32 %v508_v1, %v63_v42 }
  0x3d   :  { %v135_v53 = vmul.f32 %v508_v1, %v64_v43  ;;  %455 = vst [vmem:[%s1033_s3 + $0x158] sm:$0xff] %v391_v50  ;;  %v392_v56 = vsel %vm264_vm12, %v200_v35, %v328_v46  ;;  %vm265_vm13 = vcmp.gt.f32.partialorder %v201_v47, 0.0  ;;  %v329_v57 = vmul.f32 0.2, %v201_v47  ;;  %v75_v46 = vld [vmem:[%s1030_s0 + $0x1e8] sm:$0xff] }
  0x3e   :  { %vm266_vm14 = vcmp.gt.f32.partialorder %v202_v48, 0.0  ;;  %456 = vst [vmem:[%s1033_s3 + $0x160] sm:$0xff] %v392_v56  ;;  %v330_v58 = vmul.f32 0.2, %v202_v48  ;;  %v203_v59 = vadd.f32 %v513_v2, %v132_v49  ;;  %v204_v60 = vadd.f32 %v513_v2, %v133_v51 }
  0x3f   :  { %v205_v61 = vadd.f32 %v513_v2, %v134_v52  ;;  %v393_v62 = vsel %vm265_vm13, %v201_v47, %v329_v57  ;;  %v206_v63 = vadd.f32 %v513_v2, %v135_v53  ;;  %v136_v0 = vmul.f32 %v508_v1, %v65_v54  ;;  %v76_v47 = vld [vmem:[%s1030_s0 + $0x1f0] sm:$0xff]  ;;  %v77_v54 = vld [vmem:[%s1030_s0 + $0x1f8] sm:$0xff] }
  0x40   :  { %v137_v3 = vmul.f32 %v508_v1, %v66_v55  ;;  %457 = vst [vmem:[%s1033_s3 + $0x168] sm:$0xff] %v393_v62  ;;  %v394_v4 = vsel %vm266_vm14, %v202_v48, %v330_v58  ;;  %vm267_vm15 = vcmp.gt.f32.partialorder %v203_v59, 0.0  ;;  %v331_v5 = vmul.f32 0.2, %v203_v59 }
  0x41   :  { %vm268_vm0 = vcmp.gt.f32.partialorder %v204_v60, 0.0  ;;  %458 = vst [vmem:[%s1033_s3 + $0x170] sm:$0xff] %v394_v4  ;;  %v332_v8 = vmul.f32 0.2, %v204_v60  ;;  %vm269_vm1 = vcmp.gt.f32.partialorder %v205_v61, 0.0  ;;  %vm270_vm2 = vcmp.gt.f32.partialorder %v206_v63, 0.0 }
  0x42   :  { %v333_v9 = vmul.f32 0.2, %v205_v61  ;;  %v395_v10 = vsel %vm267_vm15, %v203_v59, %v331_v5  ;;  %v334_v11 = vmul.f32 0.2, %v206_v63  ;;  %v207_v12 = vadd.f32 %v513_v2, %v136_v0 }
  0x43   :  { %v208_v13 = vadd.f32 %v513_v2, %v137_v3  ;;  %459 = vst [vmem:[%s1033_s3 + $0x178] sm:$0xff] %v395_v10  ;;  %v396_v15 = vsel %vm268_vm0, %v204_v60, %v332_v8  ;;  %v138_v17 = vmul.f32 %v508_v1, %v67_v6  ;;  %v139_v18 = vmul.f32 %v508_v1, %v68_v7 }
  0x44   :  { %v397_v16 = vsel %vm269_vm1, %v205_v61, %v333_v9  ;;  %460 = vst [vmem:[%s1033_s3 + $0x180] sm:$0xff] %v396_v15  ;;  %v398_v22 = vsel %vm270_vm2, %v206_v63, %v334_v11  ;;  %vm271_vm3 = vcmp.gt.f32.partialorder %v207_v12, 0.0  ;;  %v335_v23 = vmul.f32 0.2, %v207_v12 }
  0x45   :  { %461 = vst [vmem:[%s1033_s3 + $0x188] sm:$0xff] %v397_v16  ;;  %vm272_vm4 = vcmp.gt.f32.partialorder %v208_v13, 0.0  ;;  %462 = vst [vmem:[%s1033_s3 + $0x190] sm:$0xff] %v398_v22  ;;  %v336_v24 = vmul.f32 0.2, %v208_v13  ;;  %v209_v25 = vadd.f32 %v513_v2, %v138_v17  ;;  %v210_v26 = vadd.f32 %v513_v2, %v139_v18 }
  0x46   :  { %v140_v27 = vmul.f32 %v508_v1, %v69_v14  ;;  %v399_v28 = vsel %vm271_vm3, %v207_v12, %v335_v23  ;;  %v141_v29 = vmul.f32 %v508_v1, %v70_v19  ;;  %v142_v30 = vmul.f32 %v508_v1, %v71_v20 }
  0x47   :  { %v143_v31 = vmul.f32 %v508_v1, %v72_v21  ;;  %463 = vst [vmem:[%s1033_s3 + $0x198] sm:$0xff] %v399_v28  ;;  %v400_v34 = vsel %vm272_vm4, %v208_v13, %v336_v24  ;;  %vm273_vm5 = vcmp.gt.f32.partialorder %v209_v25, 0.0  ;;  %v337_v35 = vmul.f32 0.2, %v209_v25 }
  0x48   :  { %vm274_vm6 = vcmp.gt.f32.partialorder %v210_v26, 0.0  ;;  %464 = vst [vmem:[%s1033_s3 + $0x1a0] sm:$0xff] %v400_v34  ;;  %v338_v36 = vmul.f32 0.2, %v210_v26  ;;  %v211_v37 = vadd.f32 %v513_v2, %v140_v27  ;;  %v212_v38 = vadd.f32 %v513_v2, %v141_v29 }
  0x49   :  { %v213_v39 = vadd.f32 %v513_v2, %v142_v30  ;;  %v401_v40 = vsel %vm273_vm5, %v209_v25, %v337_v35  ;;  %v214_v41 = vadd.f32 %v513_v2, %v143_v31  ;;  %v144_v42 = vmul.f32 %v508_v1, %v73_v32 }
  0x4a   :  { %v145_v43 = vmul.f32 %v508_v1, %v74_v33  ;;  %465 = vst [vmem:[%s1033_s3 + $0x1a8] sm:$0xff] %v401_v40  ;;  %v402_v44 = vsel %vm274_vm6, %v210_v26, %v338_v36  ;;  %vm275_vm7 = vcmp.gt.f32.partialorder %v211_v37, 0.0  ;;  %v339_v45 = vmul.f32 0.2, %v211_v37 }
  0x4b   :  { %vm276_vm8 = vcmp.gt.f32.partialorder %v212_v38, 0.0  ;;  %466 = vst [vmem:[%s1033_s3 + $0x1b0] sm:$0xff] %v402_v44  ;;  %v340_v48 = vmul.f32 0.2, %v212_v38  ;;  %vm277_vm9 = vcmp.gt.f32.partialorder %v213_v39, 0.0  ;;  %vm278_vm10 = vcmp.gt.f32.partialorder %v214_v41, 0.0 }
  0x4c   :  { %v341_v49 = vmul.f32 0.2, %v213_v39  ;;  %v403_v50 = vsel %vm275_vm7, %v211_v37, %v339_v45  ;;  %v342_v51 = vmul.f32 0.2, %v214_v41  ;;  %v215_v52 = vadd.f32 %v513_v2, %v144_v42 }
  0x4d   :  { %v216_v53 = vadd.f32 %v513_v2, %v145_v43  ;;  %467 = vst [vmem:[%s1033_s3 + $0x1b8] sm:$0xff] %v403_v50  ;;  %v404_v55 = vsel %vm276_vm8, %v212_v38, %v340_v48  ;;  %v146_v57 = vmul.f32 %v508_v1, %v75_v46  ;;  %v147_v58 = vmul.f32 %v508_v1, %v76_v47 }
  0x4e   :  { %v405_v56 = vsel %vm277_vm9, %v213_v39, %v341_v49  ;;  %468 = vst [vmem:[%s1033_s3 + $0x1c0] sm:$0xff] %v404_v55  ;;  %v406_v59 = vsel %vm278_vm10, %v214_v41, %v342_v51  ;;  %vm279_vm11 = vcmp.gt.f32.partialorder %v215_v52, 0.0  ;;  %v343_v60 = vmul.f32 0.2, %v215_v52 }
  0x4f   :  { %469 = vst [vmem:[%s1033_s3 + $0x1c8] sm:$0xff] %v405_v56  ;;  %vm280_vm12 = vcmp.gt.f32.partialorder %v216_v53, 0.0  ;;  %470 = vst [vmem:[%s1033_s3 + $0x1d0] sm:$0xff] %v406_v59  ;;  %v344_v61 = vmul.f32 0.2, %v216_v53  ;;  %v217_v62 = vadd.f32 %v513_v2, %v146_v57  ;;  %v218_v63 = vadd.f32 %v513_v2, %v147_v58 }
  0x50   :  { %v148_v0 = vmul.f32 %v508_v1, %v77_v54  ;;  %v407_v3 = vsel %vm279_vm11, %v215_v52, %v343_v60 }
  0x51   :  { %471 = vst [vmem:[%s1033_s3 + $0x1d8] sm:$0xff] %v407_v3  ;;  %v408_v4 = vsel %vm280_vm12, %v216_v53, %v344_v61  ;;  %vm281_vm13 = vcmp.gt.f32.partialorder %v217_v62, 0.0  ;;  %v345_v5 = vmul.f32 0.2, %v217_v62  ;;  %vm282_vm14 = vcmp.gt.f32.partialorder %v218_v63, 0.0 }
  0x52   :  { %472 = vst [vmem:[%s1033_s3 + $0x1e0] sm:$0xff] %v408_v4  ;;  %v346_v6 = vmul.f32 0.2, %v218_v63  ;;  %v219_v7 = vadd.f32 %v513_v2, %v148_v0 }
  0x53   :  { %v409_v8 = vsel %vm281_vm13, %v217_v62, %v345_v5 }
  0x54   :  { %473 = vst [vmem:[%s1033_s3 + $0x1e8] sm:$0xff] %v409_v8  ;;  %v410_v1 = vsel %vm282_vm14, %v218_v63, %v346_v6  ;;  %vm283_vm15 = vcmp.gt.f32.partialorder %v219_v7, 0.0  ;;  %v347_v9 = vmul.f32 0.2, %v219_v7 }
  0x55   :  { %474 = vst [vmem:[%s1033_s3 + $0x1f0] sm:$0xff] %v410_v1 }
  0x56   :  { %v411_v10 = vsel %vm283_vm15, %v219_v7, %v347_v9 }
  0x57   :  { %475 = vst [vmem:[%s1033_s3 + $0x1f8] sm:$0xff] %v411_v10 }

// kernel: generator_forward.41
= control target key start
LH: loop header
LB: loop body
LE: loop exit
PB: predicated region body
PF: predicated region fallthrough
CT: control target
= control target key end

     0   :  { %s862_s1 = inlined_call_operand.vmem [shape: bf16[256,128], index: 1, kind: input, shape index: {}]   ;;  %s863_s0 = inlined_call_operand.vmem [shape: bf16[128,256], index: 0, kind: input, shape index: {}]   ;;  %s864_s2 = inlined_call_operand.vmem [shape: f32[128,128], index: 2, kind: output, shape index: {0}]   ;;  %s865_s3 = inlined_call_operand.vmem [shape: f32[1,8,128], index: 3, kind: output, shape index: {1}]   ;;  %s866_s4 = inlined_call_operand.vmem [shape: f32[1,8,128], index: 4, kind: output, shape index: {2}]  }
   0x1   :  { %v623_v0 = vld [vmem:[%s862_s1 + $0x78] sm:$0xff]   ;;  %v625_v2 = vld [vmem:[%s862_s1 + $0x70] sm:$0xff]   ;;  %v627_v4 = vld [vmem:[%s862_s1 + $0x68] sm:$0xff]  }
   0x2   :  { %v624_v1 = vld [vmem:[%s862_s1 + $0x38] sm:$0xff]   ;;  %543 = vmatprep.subr.bf16.mxu0 %v623_v0  ;;  %607 = vmatprep.subr.bf16.mxu1 %v623_v0  ;;  %v626_v3 = vld [vmem:[%s862_s1 + $0x30] sm:$0xff]   ;;  %v628_v5 = vld [vmem:[%s862_s1 + $0x28] sm:$0xff]  }
   0x3   :  { %544 = vmatpush3.bf16.msra.mxu0 %v624_v1  ;;  %615 = vmatpush3.bf16.msra.mxu1 %v624_v1  ;;  %v629_v6 = vld [vmem:[%s862_s1 + $0x60] sm:$0xff]   ;;  %v631_v8 = vld [vmem:[%s862_s1 + $0x58] sm:$0xff]   ;;  %v633_v10 = vld [vmem:[%s862_s1 + $0x50] sm:$0xff]  }
   0x4   :  { %545 = vmatprep.subr.bf16.mxu0 %v625_v2  ;;  %608 = vmatprep.subr.bf16.mxu1 %v625_v2  ;;  %v630_v7 = vld [vmem:[%s862_s1 + $0x20] sm:$0xff]   ;;  %v632_v9 = vld [vmem:[%s862_s1 + $0x18] sm:$0xff]   ;;  %v634_v12 = vld [vmem:[%s862_s1 + $0x10] sm:$0xff]  }
   0x5   :  { %v641_v11 = vld [vmem:[%s863_s0 + $0x4] ss:$8 sps:$4 sm:$0xff]   ;;  %v639_v18 = vld [vmem:[%s863_s0] ss:$8 sps:$4 sm:$0xff]   ;;  %v642_v20 = vld [vmem:[%s863_s0 + $0x14] ss:$8 sps:$4 sm:$0xff]  }
   0x6   :  { %v647_v13 = vld [vmem:[%s863_s0 + $0x44] ss:$8 sps:$4 sm:$0xff]   ;;  %307 = vmatprep.mubr.bf16.mxu0 %v641_v11  ;;  %v645_v19 = vld [vmem:[%s863_s0 + $0x40] ss:$8 sps:$4 sm:$0xff]   ;;  %v651_v21 = vld [vmem:[%s863_s0 + $0x54] ss:$8 sps:$4 sm:$0xff]  }
   0x7   :  { %546 = vmatpush3.bf16.msra.mxu0 %v626_v3  ;;  %616 = vmatpush3.bf16.msra.mxu1 %v626_v3  ;;  %v635_v14 = vld [vmem:[%s862_s1 + $0x48] sm:$0xff]   ;;  %v637_v16 = vld [vmem:[%s862_s1 + $0x40] sm:$0xff]   ;;  %v644_v22 = vld [vmem:[%s863_s0 + $0x10] ss:$8 sps:$4 sm:$0xff]  }
   0x8   :  { %547 = vmatprep.subr.bf16.mxu0 %v627_v4  ;;  %609 = vmatprep.subr.bf16.mxu1 %v627_v4  ;;  %v636_v15 = vld [vmem:[%s862_s1 + $0x8] sm:$0xff]   ;;  %v638_v17 = vld [vmem:[%s862_s1] sm:$0xff]   ;;  %v653_v23 = vld [vmem:[%s863_s0 + $0x50] ss:$8 sps:$4 sm:$0xff]  }
   0x9   :  { %339 = vmatprep.mubr.bf16.mxu1 %v647_v13  ;;  %v648_v24 = vld [vmem:[%s863_s0 + $0x24] ss:$8 sps:$4 sm:$0xff]   ;;  %v650_v26 = vld [vmem:[%s863_s0 + $0x20] ss:$8 sps:$4 sm:$0xff]   ;;  %v654_v28 = vld [vmem:[%s863_s0 + $0x34] ss:$8 sps:$4 sm:$0xff]  }
   0xa   :  { %v657_v25 = vld [vmem:[%s863_s0 + $0x64] ss:$8 sps:$4 sm:$0xff]   ;;  %v659_v27 = vld [vmem:[%s863_s0 + $0x60] ss:$8 sps:$4 sm:$0xff]   ;;  %v660_v29 = vld [vmem:[%s863_s0 + $0x74] ss:$8 sps:$4 sm:$0xff]  }
   0xb   :  { %548 = vmatpush3.bf16.msra.mxu0 %v628_v5  ;;  %617 = vmatpush3.bf16.msra.mxu1 %v628_v5  ;;  %v656_v30 = vld [vmem:[%s863_s0 + $0x30] ss:$8 sps:$4 sm:$0xff]  }
   0xc   :  { %549 = vmatprep.subr.bf16.mxu0 %v629_v6  ;;  %610 = vmatprep.subr.bf16.mxu1 %v629_v6  ;;  %v662_v31 = vld [vmem:[%s863_s0 + $0x70] ss:$8 sps:$4 sm:$0xff]  }
   0xf   :  { %550 = vmatpush3.bf16.msra.mxu0 %v630_v7  ;;  %618 = vmatpush3.bf16.msra.mxu1 %v630_v7 }
  0x10   :  { %551 = vmatprep.subr.bf16.mxu0 %v631_v8  ;;  %611 = vmatprep.subr.bf16.mxu1 %v631_v8 }
  0x13   :  { %552 = vmatpush3.bf16.msra.mxu0 %v632_v9  ;;  %619 = vmatpush3.bf16.msra.mxu1 %v632_v9 }
  0x14   :  { %553 = vmatprep.subr.bf16.mxu0 %v633_v10  ;;  %612 = vmatprep.subr.bf16.mxu1 %v633_v10 }
  0x17   :  { %554 = vmatpush3.bf16.msra.mxu0 %v634_v12  ;;  %620 = vmatpush3.bf16.msra.mxu1 %v634_v12 }
  0x18   :  { %555 = vmatprep.subr.bf16.mxu0 %v635_v14  ;;  %613 = vmatprep.subr.bf16.mxu1 %v635_v14 }
  0x1b   :  { %556 = vmatpush3.bf16.msra.mxu0 %v636_v15  ;;  %621 = vmatpush3.bf16.msra.mxu1 %v636_v15 }
  0x1c   :  { %557 = vmatprep.subr.bf16.mxu0 %v637_v16  ;;  %614 = vmatprep.subr.bf16.mxu1 %v637_v16 }
  0x1f   :  { %558 = vmatpush3.bf16.msra.mxu0 %v638_v17  ;;  %622 = vmatpush3.bf16.msra.mxu1 %v638_v17 }
  0x22   :  { %308 = vmatmul.mubr.bf16.vlgmr.msra.gmra.mxu0 %v639_v18  ;;  %340 = vmatmul.mubr.bf16.vlgmr.msra.gmra.mxu1 %v645_v19 }
  0x23   :  { %315 = vmatprep.mubr.bf16.mxu0 %v642_v20  ;;  %347 = vmatprep.mubr.bf16.mxu1 %v651_v21 }
  0x2a   :  { %316 = vmatmul.mubr.bf16.gmra.mxu0 %v644_v22  ;;  %348 = vmatmul.mubr.bf16.gmra.mxu1 %v653_v23 }
  0x2b   :  { %323 = vmatprep.mubr.bf16.mxu0 %v648_v24  ;;  %355 = vmatprep.mubr.bf16.mxu1 %v657_v25 }
  0x32   :  { %324 = vmatmul.mubr.bf16.gmra.mxu0 %v650_v26  ;;  %356 = vmatmul.mubr.bf16.gmra.mxu1 %v659_v27 }
  0x33   :  { %331 = vmatprep.mubr.bf16.mxu0 %v654_v28  ;;  %363 = vmatprep.mubr.bf16.mxu1 %v660_v29 }
  0x3a   :  { %332 = vmatmul.mubr.bf16.gmra.mxu0 %v656_v30  ;;  %364 = vmatmul.mubr.bf16.gmra.mxu1 %v662_v31 }
  0xe2   :  { %v559_v32 = vpop.f32.mrf.mxu0  ;;  %v583_v33 = vpop.f32.mrf.mxu1 }
  0xe4   :  { %v560_v34 = vpop.f32.mrf.mxu0  ;;  %v584_v35 = vpop.f32.mrf.mxu1 }
  0xe5   :  { %v561_v36 = vadd.f32 %v560_v34, %v559_v32  ;;  %v784_v37 = vadd.f32 %v584_v35, %v583_v33 }
  0xe6   :  { %v562_v38 = vpop.f32.mrf.mxu0  ;;  %v586_v39 = vpop.f32.mrf.mxu1 }
  0xe7   :  { %483 = vst [vmem:[%s864_s2] sm:$0xff] %v561_v36  ;;  %491 = vst [vmem:[%s864_s2 + $0x40] sm:$0xff] %v784_v37  ;;  %v444_v63 = vmul.f32 %v561_v36, %v561_v36 }
  0xe8   :  { %v563_v40 = vpop.f32.mrf.mxu0  ;;  %v587_v41 = vpop.f32.mrf.mxu1 }
  0xe9   :  { %v564_v42 = vadd.f32 %v563_v40, %v562_v38  ;;  %v793_v43 = vadd.f32 %v587_v41, %v586_v39  ;;  %v452_v38 = vmul.f32 %v784_v37, %v784_v37 }
  0xea   :  { %v565_v44 = vpop.f32.mrf.mxu0  ;;  %v589_v45 = vpop.f32.mrf.mxu1 }
  0xeb   :  { %484 = vst [vmem:[%s864_s2 + $0x8] sm:$0xff] %v564_v42  ;;  %492 = vst [vmem:[%s864_s2 + $0x48] sm:$0xff] %v793_v43  ;;  %v445_v58 = vmul.f32 %v564_v42, %v564_v42  ;;  %v423_v3 = vadd.f32 %v564_v42, %v561_v36  ;;  %v453_v41 = vmul.f32 %v793_v43, %v793_v43 }
  0xec   :  { %v566_v46 = vpop.f32.mrf.mxu0  ;;  %v590_v47 = vpop.f32.mrf.mxu1 }
  0xed   :  { %v567_v48 = vadd.f32 %v566_v46, %v565_v44  ;;  %v802_v49 = vadd.f32 %v590_v47, %v589_v45  ;;  %v460_v4 = vadd.f32 %v445_v58, %v444_v63 }
  0xee   :  { %v568_v50 = vpop.f32.mrf.mxu0  ;;  %v592_v51 = vpop.f32.mrf.mxu1 }
  0xef   :  { %485 = vst [vmem:[%s864_s2 + $0x10] sm:$0xff] %v567_v48  ;;  %493 = vst [vmem:[%s864_s2 + $0x50] sm:$0xff] %v802_v49  ;;  %v446_v0 = vmul.f32 %v567_v48, %v567_v48  ;;  %v424_v8 = vadd.f32 %v567_v48, %v423_v3  ;;  %v454_v45 = vmul.f32 %v802_v49, %v802_v49 }
  0xf0   :  { %v569_v52 = vpop.f32.mrf.mxu0  ;;  %v593_v53 = vpop.f32.mrf.mxu1 }
  0xf1   :  { %v570_v54 = vadd.f32 %v569_v52, %v568_v50  ;;  %v811_v55 = vadd.f32 %v593_v53, %v592_v51  ;;  %v461_v11 = vadd.f32 %v460_v4, %v446_v0 }
  0xf2   :  { %v571_v56 = vpop.f32.mrf.mxu0  ;;  %v595_v57 = vpop.f32.mrf.mxu1 }
  0xf3   :  { %486 = vst [vmem:[%s864_s2 + $0x18] sm:$0xff] %v570_v54  ;;  %494 = vst [vmem:[%s864_s2 + $0x58] sm:$0xff] %v811_v55  ;;  %v447_v5 = vmul.f32 %v570_v54, %v570_v54  ;;  %v425_v14 = vadd.f32 %v570_v54, %v424_v8  ;;  %v455_v48 = vmul.f32 %v811_v55, %v811_v55 }
  0xf4   :  { %v572_v59 = vpop.f32.mrf.mxu0  ;;  %v596_v60 = vpop.f32.mrf.mxu1 }
  0xf5   :  { %v573_v61 = vadd.f32 %v572_v59, %v571_v56  ;;  %v597_v62 = vadd.f32 %v596_v60, %v595_v57  ;;  %v462_v16 = vadd.f32 %v461_v11, %v447_v5 }
  0xf6   :  { %v574_v1 = vpop.f32.mrf.mxu0  ;;  %v598_v2 = vpop.f32.mrf.mxu1 }
  0xf7   :  { %487 = vst [vmem:[%s864_s2 + $0x20] sm:$0xff] %v573_v61  ;;  %495 = vst [vmem:[%s864_s2 + $0x60] sm:$0xff] %v597_v62  ;;  %v448_v15 = vmul.f32 %v573_v61, %v573_v61  ;;  %v426_v19 = vadd.f32 %v573_v61, %v425_v14 }
  0xf8   :  { %v575_v6 = vpop.f32.mrf.mxu0  ;;  %v599_v7 = vpop.f32.mrf.mxu1 }
  0xf9   :  { %v576_v9 = vadd.f32 %v575_v6, %v574_v1  ;;  %v600_v10 = vadd.f32 %v599_v7, %v598_v2  ;;  %v463_v25 = vadd.f32 %v462_v16, %v448_v15 }
  0xfa   :  { %v577_v12 = vpop.f32.mrf.mxu0  ;;  %v601_v13 = vpop.f32.mrf.mxu1 }
  0xfb   :  { %488 = vst [vmem:[%s864_s2 + $0x28] sm:$0xff] %v576_v9  ;;  %496 = vst [vmem:[%s864_s2 + $0x68] sm:$0xff] %v600_v10  ;;  %v449_v20 = vmul.f32 %v576_v9, %v576_v9  ;;  %v427_v26 = vadd.f32 %v576_v9, %v426_v19  ;;  %v457_v56 = vmul.f32 %v600_v10, %v600_v10 }
  0xfc   :  { %v578_v17 = vpop.f32.mrf.mxu0  ;;  %v602_v18 = vpop.f32.mrf.mxu1 }
  0xfd   :  { %v579_v21 = vadd.f32 %v578_v17, %v577_v12  ;;  %v603_v22 = vadd.f32 %v602_v18, %v601_v13  ;;  %v464_v30 = vadd.f32 %v463_v25, %v449_v20 }
  0xfe   :  { %v580_v23 = vpop.f32.mrf.mxu0  ;;  %v604_v24 = vpop.f32.mrf.mxu1 }
  0xff   :  { %v450_v27 = vmul.f32 %v579_v21, %v579_v21  ;;  %489 = vst [vmem:[%s864_s2 + $0x30] sm:$0xff] %v579_v21  ;;  %497 = vst [vmem:[%s864_s2 + $0x70] sm:$0xff] %v603_v22  ;;  %v428_v31 = vadd.f32 %v579_v21, %v427_v26  ;;  %v458_v59 = vmul.f32 %v603_v22, %v603_v22 }
 0x100   :  { %v581_v28 = vpop.f32.mrf.mxu0  ;;  %v605_v29 = vpop.f32.mrf.mxu1 }
 0x101   :  { %v582_v32 = vadd.f32 %v581_v28, %v580_v23  ;;  %v606_v33 = vadd.f32 %v605_v29, %v604_v24  ;;  %v465_v34 = vadd.f32 %v464_v30, %v450_v27 }
 0x103   :  { %v429_v35 = vadd.f32 %v582_v32, %v428_v31  ;;  %v451_v36 = vmul.f32 %v582_v32, %v582_v32  ;;  %490 = vst [vmem:[%s864_s2 + $0x38] sm:$0xff] %v582_v32  ;;  %498 = vst [vmem:[%s864_s2 + $0x78] sm:$0xff] %v606_v33  ;;  %v459_v63 = vmul.f32 %v606_v33, %v606_v33 }
 0x105   :  { %v430_v39 = vadd.f32 %v784_v37, %v429_v35  ;;  %v466_v40 = vadd.f32 %v465_v34, %v451_v36  ;;  %v456_v37 = vmul.f32 %v597_v62, %v597_v62 }
 0x107   :  { %v431_v42 = vadd.f32 %v793_v43, %v430_v39  ;;  %v467_v44 = vadd.f32 %v466_v40, %v452_v38 }
 0x109   :  { %v468_v46 = vadd.f32 %v467_v44, %v453_v41  ;;  %v432_v47 = vadd.f32 %v802_v49, %v431_v42 }
 0x10b   :  { %v433_v50 = vadd.f32 %v811_v55, %v432_v47  ;;  %v469_v51 = vadd.f32 %v468_v46, %v454_v45 }
 0x10d   :  { %v434_v52 = vadd.f32 %v597_v62, %v433_v50  ;;  %v470_v53 = vadd.f32 %v469_v51, %v455_v48 }
 0x10f   :  { %v435_v54 = vadd.f32 %v600_v10, %v434_v52  ;;  %v471_v57 = vadd.f32 %v470_v53, %v456_v37 }
 0x111   :  { %v472_v43 = vadd.f32 %v471_v57, %v457_v56  ;;  %v436_v58 = vadd.f32 %v603_v22, %v435_v54 }
 0x113   :  { %v473_v60 = vadd.f32 %v472_v43, %v458_v59  ;;  %v437_v61 = vadd.f32 %v606_v33, %v436_v58 }
 0x115   :  { %v438_v0 = vrot.slane %v437_v61, 4  ;;  %v474_v49 = vadd.f32 %v473_v60, %v459_v63 }
 0x117   :  { %v439_v1 = vadd.f32 %v438_v0, %v437_v61  ;;  %v475_v2 = vrot.slane %v474_v49, 4 }
 0x119   :  { %v440_v3 = vrot.slane %v439_v1, 2  ;;  %v476_v4 = vadd.f32 %v475_v2, %v474_v49 }
 0x11b   :  { %v441_v55 = vadd.f32 %v440_v3, %v439_v1  ;;  %v477_v5 = vrot.slane %v476_v4, 2 }
 0x11d   :  { %v442_v6 = vrot.slane %v441_v55, 1  ;;  %v478_v62 = vadd.f32 %v477_v5, %v476_v4 }
 0x11f   :  { %v443_v7 = vadd.f32 %v442_v6, %v441_v55  ;;  %v479_v8 = vrot.slane %v478_v62, 1 }
 0x121   :  { %v480_v9 = vadd.f32 %v479_v8, %v478_v62  ;;  %481 = vst [vmem:[%s865_s3] sm:$0xff] %v443_v7 }
 0x123   :  { %482 = vst [vmem:[%s866_s4] sm:$0xff] %v480_v9 }

// kernel: generator_forward.42
= control target key start
LH: loop header
LB: loop body
LE: loop exit
PB: predicated region body
PF: predicated region fallthrough
CT: control target
= control target key end

     0   :  { %s305_s0 = inlined_call_operand.vmem [shape: f32[128,128], index: 0, kind: input, shape index: {}]   ;;  %s306_s1 = inlined_call_operand.vmem [shape: f32[1,128], index: 1, kind: input, shape index: {}]   ;;  %s307_s2 = inlined_call_operand.vmem [shape: f32[1,128], index: 2, kind: input, shape index: {}]   ;;  %s308_s3 = inlined_call_operand.vmem [shape: f32[128,128], index: 3, kind: output, shape index: {}]  }
   0x1   :  { %v14_v0 = vld [vmem:[%s305_s0] sm:$0xff]  ;;  %v15_v4 = vld [vmem:[%s305_s0 + $0x8] sm:$0xff]  ;;  %v16_v5 = vld [vmem:[%s305_s0 + $0x10] sm:$0xff] }
   0x2   :  { %v172_v1 = vld [vmem:[%s306_s1] ss:$0 sm:$0xff]  ;;  %v17_v6 = vld [vmem:[%s305_s0 + $0x18] sm:$0xff]  ;;  %v19_v11 = vld [vmem:[%s305_s0 + $0x28] sm:$0xff] }
   0x3   :  { %v177_v2 = vld [vmem:[%s307_s2] ss:$0 sm:$0xff]  ;;  %v37_v3 = vmul.f32 %v172_v1, %v14_v0  ;;  %v38_v7 = vmul.f32 %v172_v1, %v15_v4  ;;  %v39_v8 = vmul.f32 %v172_v1, %v16_v5  ;;  %v40_v9 = vmul.f32 %v172_v1, %v17_v6  ;;  %v20_v12 = vld [vmem:[%s305_s0 + $0x30] sm:$0xff]  ;;  %v21_v17 = vld [vmem:[%s305_s0 + $0x38] sm:$0xff] }
   0x4   :  { %v18_v10 = vld [vmem:[%s305_s0 + $0x20] sm:$0xff]  ;;  %v42_v15 = vmul.f32 %v172_v1, %v19_v11  ;;  %v43_v16 = vmul.f32 %v172_v1, %v20_v12  ;;  %v44_v21 = vmul.f32 %v172_v1, %v21_v17  ;;  %v23_v30 = vld [vmem:[%s305_s0 + $0x48] sm:$0xff]  ;;  %v24_v31 = vld [vmem:[%s305_s0 + $0x50] sm:$0xff] }
   0x5   :  { %v60_v13 = vadd.f32 %v177_v2, %v37_v3  ;;  %v41_v14 = vmul.f32 %v172_v1, %v18_v10  ;;  %v61_v18 = vadd.f32 %v177_v2, %v38_v7  ;;  %v62_v19 = vadd.f32 %v177_v2, %v39_v8  ;;  %v22_v25 = vld [vmem:[%s305_s0 + $0x40] sm:$0xff]  ;;  %v25_v43 = vld [vmem:[%s305_s0 + $0x58] sm:$0xff]  ;;  %v27_v45 = vld [vmem:[%s305_s0 + $0x68] sm:$0xff] }
   0x6   :  { %v63_v20 = vadd.f32 %v177_v2, %v40_v9  ;;  %v65_v24 = vadd.f32 %v177_v2, %v42_v15  ;;  %v66_v37 = vadd.f32 %v177_v2, %v43_v16  ;;  %v67_v38 = vadd.f32 %v177_v2, %v44_v21  ;;  %v26_v44 = vld [vmem:[%s305_s0 + $0x60] sm:$0xff]  ;;  %v28_v56 = vld [vmem:[%s305_s0 + $0x70] sm:$0xff]  ;;  %v29_v4 = vld [vmem:[%s305_s0 + $0x78] sm:$0xff] }
   0x7   :  { %vm76_vm0 = vcmp.gt.f32.partialorder %v60_v13, 0.0  ;;  %v92_v22 = vmul.f32 0.2, %v60_v13  ;;  %v64_v23 = vadd.f32 %v177_v2, %v41_v14  ;;  %vm77_vm1 = vcmp.gt.f32.partialorder %v61_v18, 0.0 }
   0x8   :  { %v93_v26 = vmul.f32 0.2, %v61_v18  ;;  %vm78_vm2 = vcmp.gt.f32.partialorder %v62_v19, 0.0  ;;  %v94_v27 = vmul.f32 0.2, %v62_v19  ;;  %vm79_vm3 = vcmp.gt.f32.partialorder %v63_v20, 0.0 }
   0x9   :  { %v108_v28 = vsel %vm76_vm0, %v60_v13, %v92_v22  ;;  %v95_v29 = vmul.f32 0.2, %v63_v20  ;;  %vm80_vm4 = vcmp.gt.f32.partialorder %v64_v23, 0.0  ;;  %v96_v34 = vmul.f32 0.2, %v64_v23 }
   0xa   :  { %124 = vst [vmem:[%s308_s3] sm:$0xff] %v108_v28  ;;  %v109_v32 = vsel %vm77_vm1, %v61_v18, %v93_v26  ;;  %v110_v33 = vsel %vm78_vm2, %v62_v19, %v94_v27  ;;  %vm81_vm5 = vcmp.gt.f32.partialorder %v65_v24, 0.0  ;;  %v97_v36 = vmul.f32 0.2, %v65_v24 }
   0xb   :  { %125 = vst [vmem:[%s308_s3 + $0x8] sm:$0xff] %v109_v32  ;;  %126 = vst [vmem:[%s308_s3 + $0x10] sm:$0xff] %v110_v33  ;;  %v111_v35 = vsel %vm79_vm3, %v63_v20, %v95_v29  ;;  %v112_v39 = vsel %vm80_vm4, %v64_v23, %v96_v34  ;;  %v45_v40 = vmul.f32 %v172_v1, %v22_v25  ;;  %vm82_vm6 = vcmp.gt.f32.partialorder %v66_v37, 0.0 }
   0xc   :  { %127 = vst [vmem:[%s308_s3 + $0x18] sm:$0xff] %v111_v35  ;;  %v46_v41 = vmul.f32 %v172_v1, %v23_v30  ;;  %v47_v42 = vmul.f32 %v172_v1, %v24_v31  ;;  %128 = vst [vmem:[%s308_s3 + $0x20] sm:$0xff] %v112_v39  ;;  %v113_v46 = vsel %vm81_vm5, %v65_v24, %v97_v36  ;;  %v98_v47 = vmul.f32 0.2, %v66_v37 }
   0xd   :  { %vm83_vm7 = vcmp.gt.f32.partialorder %v67_v38, 0.0  ;;  %129 = vst [vmem:[%s308_s3 + $0x28] sm:$0xff] %v113_v46  ;;  %v99_v48 = vmul.f32 0.2, %v67_v38  ;;  %v68_v49 = vadd.f32 %v177_v2, %v45_v40  ;;  %v48_v53 = vmul.f32 %v172_v1, %v25_v43 }
   0xe   :  { %v69_v50 = vadd.f32 %v177_v2, %v46_v41  ;;  %v70_v51 = vadd.f32 %v177_v2, %v47_v42  ;;  %v114_v52 = vsel %vm82_vm6, %v66_v37, %v98_v47  ;;  %v49_v54 = vmul.f32 %v172_v1, %v26_v44 }
   0xf   :  { %v50_v55 = vmul.f32 %v172_v1, %v27_v45  ;;  %130 = vst [vmem:[%s308_s3 + $0x30] sm:$0xff] %v114_v52  ;;  %v115_v57 = vsel %vm83_vm7, %v67_v38, %v99_v48  ;;  %vm84_vm8 = vcmp.gt.f32.partialorder %v68_v49, 0.0  ;;  %v100_v58 = vmul.f32 0.2, %v68_v49 }
  0x10   :  { %vm85_vm9 = vcmp.gt.f32.partialorder %v69_v50, 0.0  ;;  %131 = vst [vmem:[%s308_s3 + $0x38] sm:$0xff] %v115_v57  ;;  %v101_v59 = vmul.f32 0.2, %v69_v50  ;;  %vm86_vm10 = vcmp.gt.f32.partialorder %v70_v51, 0.0  ;;  %v71_v61 = vadd.f32 %v177_v2, %v48_v53 }
  0x11   :  { %v102_v60 = vmul.f32 0.2, %v70_v51  ;;  %v116_v62 = vsel %vm84_vm8, %v68_v49, %v100_v58  ;;  %v72_v63 = vadd.f32 %v177_v2, %v49_v54  ;;  %v73_v0 = vadd.f32 %v177_v2, %v50_v55 }
  0x12   :  { %v51_v3 = vmul.f32 %v172_v1, %v28_v56  ;;  %132 = vst [vmem:[%s308_s3 + $0x40] sm:$0xff] %v116_v62  ;;  %v117_v5 = vsel %vm85_vm9, %v69_v50, %v101_v59  ;;  %vm87_vm11 = vcmp.gt.f32.partialorder %v71_v61, 0.0  ;;  %v103_v7 = vmul.f32 0.2, %v71_v61 }
  0x13   :  { %v118_v6 = vsel %vm86_vm10, %v70_v51, %v102_v60  ;;  %133 = vst [vmem:[%s308_s3 + $0x48] sm:$0xff] %v117_v5  ;;  %vm88_vm12 = vcmp.gt.f32.partialorder %v72_v63, 0.0  ;;  %v104_v8 = vmul.f32 0.2, %v72_v63  ;;  %vm89_vm13 = vcmp.gt.f32.partialorder %v73_v0, 0.0 }
  0x14   :  { %134 = vst [vmem:[%s308_s3 + $0x50] sm:$0xff] %v118_v6  ;;  %v105_v9 = vmul.f32 0.2, %v73_v0  ;;  %v119_v10 = vsel %vm87_vm11, %v71_v61, %v103_v7  ;;  %v74_v11 = vadd.f32 %v177_v2, %v51_v3  ;;  %v52_v12 = vmul.f32 %v172_v1, %v29_v4 }
  0x15   :  { %135 = vst [vmem:[%s308_s3 + $0x58] sm:$0xff] %v119_v10  ;;  %v120_v13 = vsel %vm88_vm12, %v72_v63, %v104_v8 }
  0x16   :  { %v121_v14 = vsel %vm89_vm13, %v73_v0, %v105_v9  ;;  %136 = vst [vmem:[%s308_s3 + $0x60] sm:$0xff] %v120_v13  ;;  %vm90_vm14 = vcmp.gt.f32.partialorder %v74_v11, 0.0  ;;  %v106_v15 = vmul.f32 0.2, %v74_v11  ;;  %v75_v16 = vadd.f32 %v177_v2, %v52_v12 }
  0x17   :  { %137 = vst [vmem:[%s308_s3 + $0x68] sm:$0xff] %v121_v14 }
  0x18   :  { %v122_v17 = vsel %vm90_vm14, %v74_v11, %v106_v15  ;;  %vm91_vm15 = vcmp.gt.f32.partialorder %v75_v16, 0.0  ;;  %v107_v1 = vmul.f32 0.2, %v75_v16 }
  0x19   :  { %138 = vst [vmem:[%s308_s3 + $0x70] sm:$0xff] %v122_v17 }
  0x1a   :  { %v123_v18 = vsel %vm91_vm15, %v75_v16, %v107_v1 }
  0x1b   :  { %139 = vst [vmem:[%s308_s3 + $0x78] sm:$0xff] %v123_v18 }

// kernel: generator_forward.43
= control target key start
LH: loop header
LB: loop body
LE: loop exit
PB: predicated region body
PF: predicated region fallthrough
CT: control target
= control target key end

     0   :  { %s787_s1 = inlined_call_operand.vmem [shape: bf16[512,128], index: 1, kind: input, shape index: {}]   ;;  %s788_s0 = inlined_call_operand.vmem [shape: bf16[32,512], index: 0, kind: input, shape index: {}]   ;;  %s789_s2 = inlined_call_operand.vmem [shape: f32[32,128], index: 2, kind: output, shape index: {0}]   ;;  %s790_s3 = inlined_call_operand.vmem [shape: f32[1,8,128], index: 3, kind: output, shape index: {1}]   ;;  %s791_s4 = inlined_call_operand.vmem [shape: f32[1,8,128], index: 4, kind: output, shape index: {2}]  }
   0x1   :  { %v580_v0 = vld [vmem:[%s787_s1 + $0x78] sm:$0xff]   ;;  %v584_v4 = vld [vmem:[%s787_s1 + $0x70] sm:$0xff]   ;;  %v588_v8 = vld [vmem:[%s787_s1 + $0x68] sm:$0xff]  }
   0x2   :  { %v581_v1 = vld [vmem:[%s787_s1 + $0xf8] sm:$0xff]   ;;  %524 = vmatprep.subr.bf16.mxu0 %v580_v0  ;;  %v585_v5 = vld [vmem:[%s787_s1 + $0xf0] sm:$0xff]   ;;  %v589_v9 = vld [vmem:[%s787_s1 + $0xe8] sm:$0xff]  }
   0x3   :  { %v582_v2 = vld [vmem:[%s787_s1 + $0x38] sm:$0xff]   ;;  %552 = vmatprep.subr.bf16.mxu1 %v581_v1  ;;  %v586_v6 = vld [vmem:[%s787_s1 + $0x30] sm:$0xff]   ;;  %v590_v10 = vld [vmem:[%s787_s1 + $0x28] sm:$0xff]  }
   0x4   :  { %v583_v3 = vld [vmem:[%s787_s1 + $0xb8] sm:$0xff]   ;;  %525 = vmatpush3.bf16.msra.mxu0 %v582_v2  ;;  %v587_v7 = vld [vmem:[%s787_s1 + $0xb0] sm:$0xff]   ;;  %v591_v11 = vld [vmem:[%s787_s1 + $0xa8] sm:$0xff]  }
   0x5   :  { %553 = vmatpush3.bf16.msra.mxu1 %v583_v3  ;;  %526 = vmatprep.subr.bf16.mxu0 %v584_v4  ;;  %v592_v12 = vld [vmem:[%s787_s1 + $0x60] sm:$0xff]   ;;  %v596_v16 = vld [vmem:[%s787_s1 + $0x58] sm:$0xff]   ;;  %v600_v20 = vld [vmem:[%s787_s1 + $0x50] sm:$0xff]  }
   0x6   :  { %554 = vmatprep.subr.bf16.mxu1 %v585_v5  ;;  %v593_v13 = vld [vmem:[%s787_s1 + $0xe0] sm:$0xff]   ;;  %v597_v17 = vld [vmem:[%s787_s1 + $0xd8] sm:$0xff]   ;;  %v601_v21 = vld [vmem:[%s787_s1 + $0xd0] sm:$0xff]  }
   0x7   :  { %v594_v14 = vld [vmem:[%s787_s1 + $0x20] sm:$0xff]   ;;  %v598_v18 = vld [vmem:[%s787_s1 + $0x18] sm:$0xff]   ;;  %v602_v22 = vld [vmem:[%s787_s1 + $0x10] sm:$0xff]  }
   0x8   :  { %527 = vmatpush3.bf16.msra.mxu0 %v586_v6  ;;  %v595_v15 = vld [vmem:[%s787_s1 + $0xa0] sm:$0xff]   ;;  %v599_v19 = vld [vmem:[%s787_s1 + $0x98] sm:$0xff]   ;;  %v603_v23 = vld [vmem:[%s787_s1 + $0x90] sm:$0xff]  }
   0x9   :  { %555 = vmatpush3.bf16.msra.mxu1 %v587_v7  ;;  %528 = vmatprep.subr.bf16.mxu0 %v588_v8  ;;  %v604_v24 = vld [vmem:[%s787_s1 + $0x48] sm:$0xff]   ;;  %v608_v28 = vld [vmem:[%s787_s1 + $0x40] sm:$0xff]  }
   0xa   :  { %556 = vmatprep.subr.bf16.mxu1 %v589_v9  ;;  %v605_v25 = vld [vmem:[%s787_s1 + $0xc8] sm:$0xff]   ;;  %v609_v29 = vld [vmem:[%s787_s1 + $0xc0] sm:$0xff]  }
   0xb   :  { %v606_v26 = vld [vmem:[%s787_s1 + $0x8] sm:$0xff]   ;;  %v610_v30 = vld [vmem:[%s787_s1] sm:$0xff]  }
   0xc   :  { %529 = vmatpush3.bf16.msra.mxu0 %v590_v10  ;;  %v607_v27 = vld [vmem:[%s787_s1 + $0x88] sm:$0xff]   ;;  %v611_v31 = vld [vmem:[%s787_s1 + $0x80] sm:$0xff]  }
   0xd   :  { %557 = vmatpush3.bf16.msra.mxu1 %v591_v11  ;;  %530 = vmatprep.subr.bf16.mxu0 %v592_v12  ;;  %v612_v32 = vld [vmem:[%s788_s0] ss:$16 sps:$4 sm:$0xff]   ;;  %v614_v33 = vld [vmem:[%s788_s0 + $0x4] ss:$16 sps:$4 sm:$0xff]   ;;  %v615_v34 = vld [vmem:[%s788_s0 + $0x8] ss:$16 sps:$4 sm:$0xff]  }
   0xe   :  { %558 = vmatprep.subr.bf16.mxu1 %v593_v13  ;;  %v617_v35 = vld [vmem:[%s788_s0 + $0xc] ss:$16 sps:$4 sm:$0xff]   ;;  %363 = vmatprep.mubr.bf16.mxu0 %v614_v33  ;;  %v618_v36 = vld [vmem:[%s788_s0 + $0x24] ss:$16 sps:$4 sm:$0xff]   ;;  %v622_v38 = vld [vmem:[%s788_s0 + $0x20] ss:$16 sps:$4 sm:$0xff]  }
   0xf   :  { %412 = vmatprep.mubr.bf16.mxu1 %v617_v35  ;;  %v620_v37 = vld [vmem:[%s788_s0 + $0x2c] ss:$16 sps:$4 sm:$0xff]   ;;  %v623_v39 = vld [vmem:[%s788_s0 + $0x28] ss:$16 sps:$4 sm:$0xff]  }
  0x10   :  { %531 = vmatpush3.bf16.msra.mxu0 %v594_v14 }
  0x11   :  { %559 = vmatpush3.bf16.msra.mxu1 %v595_v15  ;;  %532 = vmatprep.subr.bf16.mxu0 %v596_v16 }
  0x12   :  { %560 = vmatprep.subr.bf16.mxu1 %v597_v17 }
  0x14   :  { %533 = vmatpush3.bf16.msra.mxu0 %v598_v18 }
  0x15   :  { %561 = vmatpush3.bf16.msra.mxu1 %v599_v19  ;;  %534 = vmatprep.subr.bf16.mxu0 %v600_v20 }
  0x16   :  { %562 = vmatprep.subr.bf16.mxu1 %v601_v21 }
  0x18   :  { %535 = vmatpush3.bf16.msra.mxu0 %v602_v22 }
  0x19   :  { %563 = vmatpush3.bf16.msra.mxu1 %v603_v23  ;;  %536 = vmatprep.subr.bf16.mxu0 %v604_v24 }
  0x1a   :  { %564 = vmatprep.subr.bf16.mxu1 %v605_v25 }
  0x1c   :  { %537 = vmatpush3.bf16.msra.mxu0 %v606_v26 }
  0x1d   :  { %565 = vmatpush3.bf16.msra.mxu1 %v607_v27  ;;  %538 = vmatprep.subr.bf16.mxu0 %v608_v28 }
  0x1e   :  { %566 = vmatprep.subr.bf16.mxu1 %v609_v29 }
  0x20   :  { %539 = vmatpush3.bf16.msra.mxu0 %v610_v30 }
  0x21   :  { %567 = vmatpush3.bf16.msra.mxu1 %v611_v31 }
  0x23   :  { %364 = vmatmul.mubr.bf16.vlgmr.msra.gmra.mxu0 %v612_v32 }
  0x24   :  { %413 = vmatmul.mubr.bf16.vlgmr.msra.gmra.mxu1 %v615_v34  ;;  %371 = vmatprep.mubr.bf16.mxu0 %v618_v36 }
  0x25   :  { %420 = vmatprep.mubr.bf16.mxu1 %v620_v37 }
  0x2b   :  { %372 = vmatmul.mubr.bf16.gmra.mxu0 %v622_v38 }
  0x2c   :  { %421 = vmatmul.mubr.bf16.gmra.mxu1 %v623_v39 }
  0xe3   :  { %v540_v40 = vpop.f32.mrf.mxu0 }
  0xe4   :  { %v568_v41 = vpop.f32.mrf.mxu1 }
  0xe5   :  { %v541_v42 = vpop.f32.mrf.mxu0 }
  0xe6   :  { %v542_v43 = vadd.f32 %v541_v42, %v540_v40  ;;  %v569_v44 = vpop.f32.mrf.mxu1 }
  0xe7   :  { %v570_v45 = vadd.f32 %v569_v44, %v568_v41  ;;  %v543_v46 = vpop.f32.mrf.mxu0 }
  0xe8   :  { %v571_v47 = vpop.f32.mrf.mxu1 }
  0xe9   :  { %v415_v48 = vadd.f32 %v570_v45, %v542_v43  ;;  %v544_v49 = vpop.f32.mrf.mxu0 }
  0xea   :  { %v545_v50 = vadd.f32 %v544_v49, %v543_v46  ;;  %v572_v51 = vpop.f32.mrf.mxu1 }
  0xeb   :  { %468 = vst [vmem:[%s789_s2] sm:$0xff] %v415_v48  ;;  %v573_v52 = vadd.f32 %v572_v51, %v571_v47  ;;  %v546_v53 = vpop.f32.mrf.mxu0  ;;  %v453_v3 = vmul.f32 %v415_v48, %v415_v48 }
  0xec   :  { %v574_v54 = vpop.f32.mrf.mxu1 }
  0xed   :  { %v418_v55 = vadd.f32 %v573_v52, %v545_v50  ;;  %v547_v56 = vpop.f32.mrf.mxu0 }
  0xee   :  { %v548_v57 = vadd.f32 %v547_v56, %v546_v53  ;;  %v575_v58 = vpop.f32.mrf.mxu1 }
  0xef   :  { %469 = vst [vmem:[%s789_s2 + $0x8] sm:$0xff] %v418_v55  ;;  %v576_v59 = vadd.f32 %v575_v58, %v574_v54  ;;  %v549_v60 = vpop.f32.mrf.mxu0  ;;  %v454_v62 = vmul.f32 %v418_v55, %v418_v55  ;;  %v444_v4 = vadd.f32 %v418_v55, %v415_v48 }
  0xf0   :  { %v577_v61 = vpop.f32.mrf.mxu1 }
  0xf1   :  { %v423_v63 = vadd.f32 %v576_v59, %v548_v57  ;;  %v550_v0 = vpop.f32.mrf.mxu0  ;;  %v457_v7 = vadd.f32 %v454_v62, %v453_v3 }
  0xf2   :  { %v551_v1 = vadd.f32 %v550_v0, %v549_v60  ;;  %v578_v2 = vpop.f32.mrf.mxu1 }
  0xf3   :  { %v455_v5 = vmul.f32 %v423_v63, %v423_v63  ;;  %470 = vst [vmem:[%s789_s2 + $0x10] sm:$0xff] %v423_v63  ;;  %v579_v6 = vadd.f32 %v578_v2, %v577_v61  ;;  %v445_v8 = vadd.f32 %v444_v4, %v423_v63 }
  0xf5   :  { %v426_v9 = vadd.f32 %v579_v6, %v551_v1  ;;  %v458_v10 = vadd.f32 %v457_v7, %v455_v5 }
  0xf7   :  { %v446_v11 = vadd.f32 %v445_v8, %v426_v9  ;;  %v456_v12 = vmul.f32 %v426_v9, %v426_v9  ;;  %471 = vst [vmem:[%s789_s2 + $0x18] sm:$0xff] %v426_v9 }
  0xf9   :  { %v447_v13 = vrot.slane %v446_v11, 4  ;;  %v459_v14 = vadd.f32 %v458_v10, %v456_v12 }
  0xfb   :  { %v448_v15 = vadd.f32 %v447_v13, %v446_v11  ;;  %v460_v16 = vrot.slane %v459_v14, 4 }
  0xfd   :  { %v449_v17 = vrot.slane %v448_v15, 2  ;;  %v461_v18 = vadd.f32 %v460_v16, %v459_v14 }
  0xff   :  { %v450_v19 = vadd.f32 %v449_v17, %v448_v15  ;;  %v462_v20 = vrot.slane %v461_v18, 2 }
 0x101   :  { %v451_v21 = vrot.slane %v450_v19, 1  ;;  %v463_v22 = vadd.f32 %v462_v20, %v461_v18 }
 0x103   :  { %v452_v23 = vadd.f32 %v451_v21, %v450_v19  ;;  %v464_v24 = vrot.slane %v463_v22, 1 }
 0x105   :  { %v465_v25 = vadd.f32 %v464_v24, %v463_v22  ;;  %466 = vst [vmem:[%s790_s3] sm:$0xff] %v452_v23 }
 0x107   :  { %467 = vst [vmem:[%s791_s4] sm:$0xff] %v465_v25 }

// kernel: generator_forward.44
= control target key start
LH: loop header
LB: loop body
LE: loop exit
PB: predicated region body
PF: predicated region fallthrough
CT: control target
= control target key end

     0   :  { %s112_s0 = inlined_call_operand.vmem [shape: f32[32,128], index: 0, kind: input, shape index: {}]   ;;  %s113_s1 = inlined_call_operand.vmem [shape: f32[1,128], index: 1, kind: input, shape index: {}]   ;;  %s114_s2 = inlined_call_operand.vmem [shape: f32[1,128], index: 2, kind: input, shape index: {}]   ;;  %s115_s3 = inlined_call_operand.vmem [shape: f32[32,128], index: 3, kind: output, shape index: {}]  }
   0x1   :  { %v14_v0 = vld [vmem:[%s112_s0] sm:$0xff]  ;;  %v15_v4 = vld [vmem:[%s112_s0 + $0x8] sm:$0xff]  ;;  %v16_v5 = vld [vmem:[%s112_s0 + $0x10] sm:$0xff] }
   0x2   :  { %v60_v1 = vld [vmem:[%s113_s1] ss:$0 sm:$0xff]  ;;  %v17_v6 = vld [vmem:[%s112_s0 + $0x18] sm:$0xff] }
   0x3   :  { %v61_v2 = vld [vmem:[%s114_s2] ss:$0 sm:$0xff]  ;;  %v25_v3 = vmul.f32 %v60_v1, %v14_v0  ;;  %v26_v7 = vmul.f32 %v60_v1, %v15_v4  ;;  %v27_v8 = vmul.f32 %v60_v1, %v16_v5  ;;  %v28_v9 = vmul.f32 %v60_v1, %v17_v6 }
   0x5   :  { %v36_v10 = vadd.f32 %v61_v2, %v25_v3  ;;  %v37_v11 = vadd.f32 %v61_v2, %v26_v7  ;;  %v38_v12 = vadd.f32 %v61_v2, %v27_v8  ;;  %v39_v13 = vadd.f32 %v61_v2, %v28_v9 }
   0x7   :  { %vm40_vm0 = vcmp.gt.f32.partialorder %v36_v10, 0.0  ;;  %v44_v14 = vmul.f32 0.2, %v36_v10  ;;  %vm41_vm1 = vcmp.gt.f32.partialorder %v37_v11, 0.0  ;;  %v45_v15 = vmul.f32 0.2, %v37_v11 }
   0x8   :  { %vm42_vm2 = vcmp.gt.f32.partialorder %v38_v12, 0.0  ;;  %v46_v16 = vmul.f32 0.2, %v38_v12  ;;  %vm43_vm3 = vcmp.gt.f32.partialorder %v39_v13, 0.0  ;;  %v47_v18 = vmul.f32 0.2, %v39_v13 }
   0x9   :  { %v48_v17 = vsel %vm40_vm0, %v36_v10, %v44_v14  ;;  %v49_v19 = vsel %vm41_vm1, %v37_v11, %v45_v15 }
   0xa   :  { %52 = vst [vmem:[%s115_s3] sm:$0xff] %v48_v17  ;;  %v50_v20 = vsel %vm42_vm2, %v38_v12, %v46_v16  ;;  %53 = vst [vmem:[%s115_s3 + $0x8] sm:$0xff] %v49_v19  ;;  %v51_v21 = vsel %vm43_vm3, %v39_v13, %v47_v18 }
   0xb   :  { %54 = vst [vmem:[%s115_s3 + $0x10] sm:$0xff] %v50_v20  ;;  %55 = vst [vmem:[%s115_s3 + $0x18] sm:$0xff] %v51_v21 }

// kernel: generator_forward.45
= control target key start
LH: loop header
LB: loop body
LE: loop exit
PB: predicated region body
PF: predicated region fallthrough
CT: control target
= control target key end

     0   :  { %s617_s1 = inlined_call_operand.vmem [shape: bf16[512,128], index: 1, kind: input, shape index: {}]   ;;  %s618_s0 = inlined_call_operand.vmem [shape: bf16[8,512], index: 0, kind: input, shape index: {}]   ;;  %s619_s2 = inlined_call_operand.vmem [shape: f32[8,128], index: 2, kind: output, shape index: {}]  }
   0x1   :  { %v461_v0 = vld [vmem:[%s617_s1 + $0x78] sm:$0xff]   ;;  %v465_v4 = vld [vmem:[%s617_s1 + $0x70] sm:$0xff]   ;;  %v469_v8 = vld [vmem:[%s617_s1 + $0x68] sm:$0xff]  }
   0x2   :  { %v462_v1 = vld [vmem:[%s617_s1 + $0xf8] sm:$0xff]   ;;  %417 = vmatprep.subr.bf16.mxu0 %v461_v0  ;;  %v466_v5 = vld [vmem:[%s617_s1 + $0xf0] sm:$0xff]   ;;  %v470_v9 = vld [vmem:[%s617_s1 + $0xe8] sm:$0xff]  }
   0x3   :  { %v463_v2 = vld [vmem:[%s617_s1 + $0x38] sm:$0xff]   ;;  %439 = vmatprep.subr.bf16.mxu1 %v462_v1  ;;  %v467_v6 = vld [vmem:[%s617_s1 + $0x30] sm:$0xff]   ;;  %v471_v10 = vld [vmem:[%s617_s1 + $0x28] sm:$0xff]  }
   0x4   :  { %v464_v3 = vld [vmem:[%s617_s1 + $0xb8] sm:$0xff]   ;;  %418 = vmatpush3.bf16.msra.mxu0 %v463_v2  ;;  %v468_v7 = vld [vmem:[%s617_s1 + $0xb0] sm:$0xff]   ;;  %v472_v11 = vld [vmem:[%s617_s1 + $0xa8] sm:$0xff]  }
   0x5   :  { %440 = vmatpush3.bf16.msra.mxu1 %v464_v3  ;;  %419 = vmatprep.subr.bf16.mxu0 %v465_v4  ;;  %v473_v12 = vld [vmem:[%s617_s1 + $0x60] sm:$0xff]   ;;  %v477_v16 = vld [vmem:[%s617_s1 + $0x58] sm:$0xff]   ;;  %v481_v20 = vld [vmem:[%s617_s1 + $0x50] sm:$0xff]  }
   0x6   :  { %441 = vmatprep.subr.bf16.mxu1 %v466_v5  ;;  %v474_v13 = vld [vmem:[%s617_s1 + $0xe0] sm:$0xff]   ;;  %v478_v17 = vld [vmem:[%s617_s1 + $0xd8] sm:$0xff]   ;;  %v482_v21 = vld [vmem:[%s617_s1 + $0xd0] sm:$0xff]  }
   0x7   :  { %v475_v14 = vld [vmem:[%s617_s1 + $0x20] sm:$0xff]   ;;  %v479_v18 = vld [vmem:[%s617_s1 + $0x18] sm:$0xff]   ;;  %v483_v22 = vld [vmem:[%s617_s1 + $0x10] sm:$0xff]  }
   0x8   :  { %420 = vmatpush3.bf16.msra.mxu0 %v467_v6  ;;  %v476_v15 = vld [vmem:[%s617_s1 + $0xa0] sm:$0xff]   ;;  %v480_v19 = vld [vmem:[%s617_s1 + $0x98] sm:$0xff]   ;;  %v484_v23 = vld [vmem:[%s617_s1 + $0x90] sm:$0xff]  }
   0x9   :  { %442 = vmatpush3.bf16.msra.mxu1 %v468_v7  ;;  %421 = vmatprep.subr.bf16.mxu0 %v469_v8  ;;  %v485_v24 = vld [vmem:[%s617_s1 + $0x48] sm:$0xff]   ;;  %v489_v28 = vld [vmem:[%s617_s1 + $0x40] sm:$0xff]  }
   0xa   :  { %443 = vmatprep.subr.bf16.mxu1 %v470_v9  ;;  %v486_v25 = vld [vmem:[%s617_s1 + $0xc8] sm:$0xff]   ;;  %v490_v29 = vld [vmem:[%s617_s1 + $0xc0] sm:$0xff]  }
   0xb   :  { %v487_v26 = vld [vmem:[%s617_s1 + $0x8] sm:$0xff]   ;;  %v491_v30 = vld [vmem:[%s617_s1] sm:$0xff]  }
   0xc   :  { %422 = vmatpush3.bf16.msra.mxu0 %v471_v10  ;;  %v488_v27 = vld [vmem:[%s617_s1 + $0x88] sm:$0xff]   ;;  %v492_v31 = vld [vmem:[%s617_s1 + $0x80] sm:$0xff]  }
   0xd   :  { %444 = vmatpush3.bf16.msra.mxu1 %v472_v11  ;;  %423 = vmatprep.subr.bf16.mxu0 %v473_v12  ;;  %v18_v32 = vld [vmem:[%s618_s0] sm:$0xff]  ;;  %v19_v33 = vld [vmem:[%s618_s0 + $0x8] sm:$0xff] }
   0xe   :  { %445 = vmatprep.subr.bf16.mxu1 %v474_v13  ;;  %v381_v34 = vcombine.low %v18_v32, %v18_v32  ;;  %v382_v35 = vcombine.high %v18_v32, %v18_v32  ;;  %v383_v36 = vcombine.low %v19_v33, %v19_v33  ;;  %v384_v37 = vcombine.high %v19_v33, %v19_v33 }
  0x10   :  { %424 = vmatpush3.bf16.msra.mxu0 %v475_v14  ;;  %322 = vmatprep.mubr.bf16.mxu0 %v382_v35 }
  0x11   :  { %446 = vmatpush3.bf16.msra.mxu1 %v476_v15  ;;  %425 = vmatprep.subr.bf16.mxu0 %v477_v16 }
  0x12   :  { %447 = vmatprep.subr.bf16.mxu1 %v478_v17  ;;  %362 = vmatprep.mubr.bf16.mxu1 %v384_v37 }
  0x14   :  { %426 = vmatpush3.bf16.msra.mxu0 %v479_v18 }
  0x15   :  { %448 = vmatpush3.bf16.msra.mxu1 %v480_v19  ;;  %427 = vmatprep.subr.bf16.mxu0 %v481_v20 }
  0x16   :  { %449 = vmatprep.subr.bf16.mxu1 %v482_v21 }
  0x18   :  { %428 = vmatpush3.bf16.msra.mxu0 %v483_v22 }
  0x19   :  { %450 = vmatpush3.bf16.msra.mxu1 %v484_v23  ;;  %429 = vmatprep.subr.bf16.mxu0 %v485_v24 }
  0x1a   :  { %451 = vmatprep.subr.bf16.mxu1 %v486_v25 }
  0x1c   :  { %430 = vmatpush3.bf16.msra.mxu0 %v487_v26 }
  0x1d   :  { %452 = vmatpush3.bf16.msra.mxu1 %v488_v27  ;;  %431 = vmatprep.subr.bf16.mxu0 %v489_v28 }
  0x1e   :  { %453 = vmatprep.subr.bf16.mxu1 %v490_v29 }
  0x20   :  { %432 = vmatpush3.bf16.msra.mxu0 %v491_v30 }
  0x21   :  { %454 = vmatpush3.bf16.msra.mxu1 %v492_v31 }
  0x23   :  { %323 = vmatmul.mubr.bf16.vlgmr.msra.gmra.mxu0 %v381_v34 }
  0x24   :  { %363 = vmatmul.mubr.bf16.vlgmr.msra.gmra.mxu1 %v383_v36 }
  0xe3   :  { %v433_v38 = vpop.f32.mrf.mxu0 }
  0xe4   :  { %v455_v39 = vpop.f32.mrf.mxu1 }
  0xe5   :  { %v434_v40 = vpop.f32.mrf.mxu0 }
  0xe6   :  { %v456_v41 = vpop.f32.mrf.mxu1  ;;  %v435_v42 = vadd.f32 %v434_v40, %v433_v38 }
  0xe7   :  { %v457_v43 = vadd.f32 %v456_v41, %v455_v39  ;;  %v436_v44 = vpop.f32.mrf.mxu0 }
  0xe8   :  { %v458_v45 = vpop.f32.mrf.mxu1 }
  0xe9   :  { %v365_v46 = vadd.f32 %v457_v43, %v435_v42  ;;  %v437_v47 = vpop.f32.mrf.mxu0 }
  0xea   :  { %v459_v48 = vpop.f32.mrf.mxu1 }
  0xeb   :  { %376 = vst [vmem:[%s619_s2] sm:$0xff] %v365_v46 }

// kernel: generator_forward.47
= control target key start
LH: loop header
LB: loop body
LE: loop exit
PB: predicated region body
PF: predicated region fallthrough
CT: control target
= control target key end

     0   :  { %s104_s0 = inlined_call_operand.vmem [shape: f32[32,128], index: 0, kind: input, shape index: {}]   ;;  %s105_s1 = inlined_call_operand.vmem [shape: f32[1,128], index: 1, kind: input, shape index: {}]   ;;  %s106_s2 = inlined_call_operand.vmem [shape: f32[1,128], index: 2, kind: input, shape index: {}]   ;;  %s107_s3 = inlined_call_operand.vmem [shape: f32[32,128], index: 3, kind: output, shape index: {}]  }
   0x1   :  { %v14_v0 = vld [vmem:[%s104_s0] sm:$0xff]  ;;  %v15_v4 = vld [vmem:[%s104_s0 + $0x8] sm:$0xff]  ;;  %v16_v5 = vld [vmem:[%s104_s0 + $0x10] sm:$0xff] }
   0x2   :  { %v52_v1 = vld [vmem:[%s105_s1] ss:$0 sm:$0xff]  ;;  %v17_v6 = vld [vmem:[%s104_s0 + $0x18] sm:$0xff] }
   0x3   :  { %v53_v2 = vld [vmem:[%s106_s2] ss:$0 sm:$0xff]  ;;  %v25_v3 = vmul.f32 %v52_v1, %v14_v0  ;;  %v26_v7 = vmul.f32 %v52_v1, %v15_v4  ;;  %v27_v8 = vmul.f32 %v52_v1, %v16_v5  ;;  %v28_v9 = vmul.f32 %v52_v1, %v17_v6 }
   0x5   :  { %v36_v10 = vadd.f32 %v53_v2, %v25_v3  ;;  %v37_v11 = vadd.f32 %v53_v2, %v26_v7  ;;  %v38_v12 = vadd.f32 %v53_v2, %v27_v8  ;;  %v39_v13 = vadd.f32 %v53_v2, %v28_v9 }
   0x7   :  { %v40_v14 = vmax.f32 %v36_v10, 0.0  ;;  %v41_v15 = vmax.f32 %v37_v11, 0.0  ;;  %v42_v16 = vmax.f32 %v38_v12, 0.0  ;;  %v43_v17 = vmax.f32 %v39_v13, 0.0 }
   0x9   :  { %44 = vst [vmem:[%s107_s3] sm:$0xff] %v40_v14  ;;  %45 = vst [vmem:[%s107_s3 + $0x8] sm:$0xff] %v41_v15 }
   0xa   :  { %46 = vst [vmem:[%s107_s3 + $0x10] sm:$0xff] %v42_v16  ;;  %47 = vst [vmem:[%s107_s3 + $0x18] sm:$0xff] %v43_v17 }

// kernel: generator_forward.46
= control target key start
LH: loop header
LB: loop body
LE: loop exit
PB: predicated region body
PF: predicated region fallthrough
CT: control target
= control target key end

     0   :  { %s334_s1 = inlined_call_operand.vmem [shape: bf16[128,128], index: 1, kind: input, shape index: {}]   ;;  %s335_s0 = inlined_call_operand.vmem [shape: bf16[32,128], index: 0, kind: input, shape index: {}]   ;;  %s336_s2 = inlined_call_operand.vmem [shape: f32[32,128], index: 2, kind: output, shape index: {0}]   ;;  %s337_s3 = inlined_call_operand.vmem [shape: f32[1,8,128], index: 3, kind: output, shape index: {1}]   ;;  %s338_s4 = inlined_call_operand.vmem [shape: f32[1,8,128], index: 4, kind: output, shape index: {2}]  }
   0x1   :  { %v251_v0 = vld [vmem:[%s334_s1 + $0x38] sm:$0xff]   ;;  %v252_v1 = vld [vmem:[%s334_s1 + $0x30] sm:$0xff]   ;;  %v253_v2 = vld [vmem:[%s334_s1 + $0x28] sm:$0xff]  }
   0x2   :  { %231 = vmatprep.subr.bf16.mxu0 %v251_v0  ;;  %v254_v3 = vld [vmem:[%s334_s1 + $0x20] sm:$0xff]   ;;  %v255_v5 = vld [vmem:[%s334_s1 + $0x18] sm:$0xff]   ;;  %v256_v6 = vld [vmem:[%s334_s1 + $0x10] sm:$0xff]  }
   0x3   :  { %232 = vmatpush3.bf16.msra.mxu0 %v251_v0  ;;  %v259_v4 = vld [vmem:[%s335_s0] sm:$0xff]   ;;  %v257_v7 = vld [vmem:[%s334_s1 + $0x8] sm:$0xff]  }
   0x4   :  { %233 = vmatprep.subr.bf16.mxu0 %v252_v1  ;;  %247 = vmatprep.mubr.bf16.mxu0 %v259_v4  ;;  %v258_v8 = vld [vmem:[%s334_s1] sm:$0xff]   ;;  %v260_v9 = vld [vmem:[%s335_s0 + $0x8] sm:$0xff]  }
   0x7   :  { %234 = vmatpush3.bf16.msra.mxu0 %v252_v1 }
   0x8   :  { %235 = vmatprep.subr.bf16.mxu0 %v253_v2 }
   0xb   :  { %236 = vmatpush3.bf16.msra.mxu0 %v253_v2 }
   0xc   :  { %237 = vmatprep.subr.bf16.mxu0 %v254_v3 }
   0xf   :  { %238 = vmatpush3.bf16.msra.mxu0 %v254_v3 }
  0x10   :  { %239 = vmatprep.subr.bf16.mxu0 %v255_v5 }
  0x13   :  { %240 = vmatpush3.bf16.msra.mxu0 %v255_v5 }
  0x14   :  { %241 = vmatprep.subr.bf16.mxu0 %v256_v6 }
  0x17   :  { %242 = vmatpush3.bf16.msra.mxu0 %v256_v6 }
  0x18   :  { %243 = vmatprep.subr.bf16.mxu0 %v257_v7 }
  0x1b   :  { %244 = vmatpush3.bf16.msra.mxu0 %v257_v7 }
  0x1c   :  { %245 = vmatprep.subr.bf16.mxu0 %v258_v8 }
  0x1f   :  { %246 = vmatpush3.bf16.msra.mxu0 %v258_v8 }
  0x22   :  { %248 = vmatmul.mubr.bf16.vlgmr.msra.gmra.mxu0 %v260_v9 }
  0xe2   :  { %v249_v10 = vpop.f32.mrf.mxu0 }
  0xe3   :  { %197 = vst [vmem:[%s336_s2 + $0x10] sm:$0xff] %v249_v10  ;;  %v182_v17 = vmul.f32 %v249_v10, %v249_v10 }
  0xe4   :  { %v141_v11 = vpop.f32.mrf.mxu0 }
  0xe5   :  { %195 = vst [vmem:[%s336_s2] sm:$0xff] %v141_v11  ;;  %v180_v14 = vmul.f32 %v141_v11, %v141_v11 }
  0xe6   :  { %v250_v12 = vpop.f32.mrf.mxu0 }
  0xe7   :  { %198 = vst [vmem:[%s336_s2 + $0x18] sm:$0xff] %v250_v12  ;;  %v183_v20 = vmul.f32 %v250_v12, %v250_v12 }
  0xe8   :  { %v144_v13 = vpop.f32.mrf.mxu0 }
  0xe9   :  { %v171_v15 = vadd.f32 %v144_v13, %v141_v11  ;;  %v181_v16 = vmul.f32 %v144_v13, %v144_v13  ;;  %196 = vst [vmem:[%s336_s2 + $0x8] sm:$0xff] %v144_v13 }
  0xeb   :  { %v172_v18 = vadd.f32 %v249_v10, %v171_v15  ;;  %v184_v19 = vadd.f32 %v181_v16, %v180_v14 }
  0xed   :  { %v173_v21 = vadd.f32 %v250_v12, %v172_v18  ;;  %v185_v22 = vadd.f32 %v184_v19, %v182_v17 }
  0xef   :  { %v174_v23 = vrot.slane %v173_v21, 4  ;;  %v186_v24 = vadd.f32 %v185_v22, %v183_v20 }
  0xf1   :  { %v175_v25 = vadd.f32 %v174_v23, %v173_v21  ;;  %v187_v26 = vrot.slane %v186_v24, 4 }
  0xf3   :  { %v176_v27 = vrot.slane %v175_v25, 2  ;;  %v188_v28 = vadd.f32 %v187_v26, %v186_v24 }
  0xf5   :  { %v177_v29 = vadd.f32 %v176_v27, %v175_v25  ;;  %v189_v30 = vrot.slane %v188_v28, 2 }
  0xf7   :  { %v178_v31 = vrot.slane %v177_v29, 1  ;;  %v190_v32 = vadd.f32 %v189_v30, %v188_v28 }
  0xf9   :  { %v179_v33 = vadd.f32 %v178_v31, %v177_v29  ;;  %v191_v34 = vrot.slane %v190_v32, 1 }
  0xfb   :  { %v192_v35 = vadd.f32 %v191_v34, %v190_v32  ;;  %193 = vst [vmem:[%s337_s3] sm:$0xff] %v179_v33 }
  0xfd   :  { %194 = vst [vmem:[%s338_s4] sm:$0xff] %v192_v35 }

// kernel: generator_forward.56
= control target key start
LH: loop header
LB: loop body
LE: loop exit
PB: predicated region body
PF: predicated region fallthrough
CT: control target
= control target key end

     0   :  { %s638_s1 = inlined_call_operand.vmem [shape: bf16[128,128], index: 1, kind: input, shape index: {}]   ;;  %s639_s0 = inlined_call_operand.vmem [shape: bf16[128,128], index: 0, kind: input, shape index: {}]   ;;  %s640_s2 = inlined_call_operand.vmem [shape: f32[128,128], index: 2, kind: output, shape index: {0}]   ;;  %s641_s3 = inlined_call_operand.vmem [shape: f32[1,8,128], index: 3, kind: output, shape index: {1}]   ;;  %s642_s4 = inlined_call_operand.vmem [shape: f32[1,8,128], index: 4, kind: output, shape index: {2}]  }
   0x1   :  { %v495_v0 = vld [vmem:[%s638_s1 + $0x38] sm:$0xff]   ;;  %v496_v1 = vld [vmem:[%s638_s1 + $0x30] sm:$0xff]   ;;  %v497_v2 = vld [vmem:[%s638_s1 + $0x28] sm:$0xff]  }
   0x2   :  { %447 = vmatprep.subr.bf16.mxu0 %v495_v0  ;;  %479 = vmatprep.subr.bf16.mxu1 %v495_v0  ;;  %v498_v3 = vld [vmem:[%s638_s1 + $0x20] sm:$0xff]   ;;  %v499_v5 = vld [vmem:[%s638_s1 + $0x18] sm:$0xff]   ;;  %v500_v7 = vld [vmem:[%s638_s1 + $0x10] sm:$0xff]  }
   0x3   :  { %448 = vmatpush3.bf16.msra.mxu0 %v495_v0  ;;  %487 = vmatpush3.bf16.msra.mxu1 %v495_v0  ;;  %v503_v4 = vld [vmem:[%s639_s0] sm:$0xff]   ;;  %v501_v8 = vld [vmem:[%s638_s1 + $0x8] sm:$0xff]   ;;  %v505_v12 = vld [vmem:[%s639_s0 + $0x10] sm:$0xff]  }
   0x4   :  { %449 = vmatprep.subr.bf16.mxu0 %v496_v1  ;;  %480 = vmatprep.subr.bf16.mxu1 %v496_v1  ;;  %v507_v6 = vld [vmem:[%s639_s0 + $0x20] sm:$0xff]   ;;  %v504_v10 = vld [vmem:[%s639_s0 + $0x8] sm:$0xff]   ;;  %v509_v13 = vld [vmem:[%s639_s0 + $0x30] sm:$0xff]  }
   0x5   :  { %463 = vmatprep.mubr.bf16.mxu0 %v503_v4  ;;  %471 = vmatprep.mubr.bf16.mxu1 %v507_v6  ;;  %v502_v9 = vld [vmem:[%s638_s1] sm:$0xff]   ;;  %v508_v11 = vld [vmem:[%s639_s0 + $0x28] sm:$0xff]   ;;  %v506_v14 = vld [vmem:[%s639_s0 + $0x18] sm:$0xff]  }
   0x6   :  { %v510_v15 = vld [vmem:[%s639_s0 + $0x38] sm:$0xff]  }
   0x7   :  { %450 = vmatpush3.bf16.msra.mxu0 %v496_v1  ;;  %488 = vmatpush3.bf16.msra.mxu1 %v496_v1 }
   0x8   :  { %451 = vmatprep.subr.bf16.mxu0 %v497_v2  ;;  %481 = vmatprep.subr.bf16.mxu1 %v497_v2 }
   0xb   :  { %452 = vmatpush3.bf16.msra.mxu0 %v497_v2  ;;  %489 = vmatpush3.bf16.msra.mxu1 %v497_v2 }
   0xc   :  { %453 = vmatprep.subr.bf16.mxu0 %v498_v3  ;;  %482 = vmatprep.subr.bf16.mxu1 %v498_v3 }
   0xf   :  { %454 = vmatpush3.bf16.msra.mxu0 %v498_v3  ;;  %490 = vmatpush3.bf16.msra.mxu1 %v498_v3 }
  0x10   :  { %455 = vmatprep.subr.bf16.mxu0 %v499_v5  ;;  %483 = vmatprep.subr.bf16.mxu1 %v499_v5 }
  0x13   :  { %456 = vmatpush3.bf16.msra.mxu0 %v499_v5  ;;  %491 = vmatpush3.bf16.msra.mxu1 %v499_v5 }
  0x14   :  { %457 = vmatprep.subr.bf16.mxu0 %v500_v7  ;;  %484 = vmatprep.subr.bf16.mxu1 %v500_v7 }
  0x17   :  { %458 = vmatpush3.bf16.msra.mxu0 %v500_v7  ;;  %492 = vmatpush3.bf16.msra.mxu1 %v500_v7 }
  0x18   :  { %459 = vmatprep.subr.bf16.mxu0 %v501_v8  ;;  %485 = vmatprep.subr.bf16.mxu1 %v501_v8 }
  0x1b   :  { %460 = vmatpush3.bf16.msra.mxu0 %v501_v8  ;;  %493 = vmatpush3.bf16.msra.mxu1 %v501_v8 }
  0x1c   :  { %461 = vmatprep.subr.bf16.mxu0 %v502_v9  ;;  %486 = vmatprep.subr.bf16.mxu1 %v502_v9 }
  0x1f   :  { %462 = vmatpush3.bf16.msra.mxu0 %v502_v9  ;;  %494 = vmatpush3.bf16.msra.mxu1 %v502_v9 }
  0x22   :  { %464 = vmatmul.mubr.bf16.vlgmr.msra.gmra.mxu0 %v504_v10  ;;  %472 = vmatmul.mubr.bf16.vlgmr.msra.gmra.mxu1 %v508_v11 }
  0x23   :  { %467 = vmatprep.mubr.bf16.mxu0 %v505_v12  ;;  %475 = vmatprep.mubr.bf16.mxu1 %v509_v13 }
  0x2a   :  { %468 = vmatmul.mubr.bf16.gmra.mxu0 %v506_v14  ;;  %476 = vmatmul.mubr.bf16.gmra.mxu1 %v510_v15 }
  0xe2   :  { %v465_v16 = vpop.f32.mrf.mxu0  ;;  %v473_v17 = vpop.f32.mrf.mxu1 }
  0xe3   :  { %389 = vst [vmem:[%s640_s2 + $0x10] sm:$0xff] %v465_v16  ;;  %397 = vst [vmem:[%s640_s2 + $0x50] sm:$0xff] %v473_v17  ;;  %v350_v29 = vmul.f32 %v465_v16, %v465_v16  ;;  %v358_v59 = vmul.f32 %v473_v17, %v473_v17 }
  0xe4   :  { %v213_v18 = vpop.f32.mrf.mxu0  ;;  %v245_v19 = vpop.f32.mrf.mxu1 }
  0xe5   :  { %387 = vst [vmem:[%s640_s2] sm:$0xff] %v213_v18  ;;  %395 = vst [vmem:[%s640_s2 + $0x40] sm:$0xff] %v245_v19  ;;  %v348_v24 = vmul.f32 %v213_v18, %v213_v18  ;;  %v356_v53 = vmul.f32 %v245_v19, %v245_v19 }
  0xe6   :  { %v466_v20 = vpop.f32.mrf.mxu0  ;;  %v474_v21 = vpop.f32.mrf.mxu1 }
  0xe7   :  { %390 = vst [vmem:[%s640_s2 + $0x18] sm:$0xff] %v466_v20  ;;  %398 = vst [vmem:[%s640_s2 + $0x58] sm:$0xff] %v474_v21  ;;  %v351_v34 = vmul.f32 %v466_v20, %v466_v20  ;;  %v359_v62 = vmul.f32 %v474_v21, %v474_v21 }
  0xe8   :  { %v216_v22 = vpop.f32.mrf.mxu0  ;;  %v248_v23 = vpop.f32.mrf.mxu1 }
  0xe9   :  { %v327_v25 = vadd.f32 %v216_v22, %v213_v18  ;;  %v349_v26 = vmul.f32 %v216_v22, %v216_v22  ;;  %388 = vst [vmem:[%s640_s2 + $0x8] sm:$0xff] %v216_v22  ;;  %396 = vst [vmem:[%s640_s2 + $0x48] sm:$0xff] %v248_v23  ;;  %v357_v57 = vmul.f32 %v248_v23, %v248_v23 }
  0xea   :  { %v469_v27 = vpop.f32.mrf.mxu0  ;;  %v477_v28 = vpop.f32.mrf.mxu1 }
  0xeb   :  { %v328_v30 = vadd.f32 %v465_v16, %v327_v25  ;;  %v364_v31 = vadd.f32 %v349_v26, %v348_v24  ;;  %393 = vst [vmem:[%s640_s2 + $0x30] sm:$0xff] %v469_v27  ;;  %401 = vst [vmem:[%s640_s2 + $0x70] sm:$0xff] %v477_v28  ;;  %v354_v47 = vmul.f32 %v469_v27, %v469_v27 }
  0xec   :  { %v229_v32 = vpop.f32.mrf.mxu0  ;;  %v261_v33 = vpop.f32.mrf.mxu1  ;;  %v362_v7 = vmul.f32 %v477_v28, %v477_v28 }
  0xed   :  { %v365_v35 = vadd.f32 %v364_v31, %v350_v29  ;;  %v329_v36 = vadd.f32 %v466_v20, %v328_v30  ;;  %391 = vst [vmem:[%s640_s2 + $0x20] sm:$0xff] %v229_v32  ;;  %399 = vst [vmem:[%s640_s2 + $0x60] sm:$0xff] %v261_v33  ;;  %v352_v40 = vmul.f32 %v229_v32, %v229_v32 }
  0xee   :  { %v470_v37 = vpop.f32.mrf.mxu0  ;;  %v478_v38 = vpop.f32.mrf.mxu1  ;;  %v360_v2 = vmul.f32 %v261_v33, %v261_v33 }
  0xef   :  { %v330_v39 = vadd.f32 %v329_v36, %v229_v32  ;;  %v366_v41 = vadd.f32 %v365_v35, %v351_v34  ;;  %394 = vst [vmem:[%s640_s2 + $0x38] sm:$0xff] %v470_v37  ;;  %402 = vst [vmem:[%s640_s2 + $0x78] sm:$0xff] %v478_v38  ;;  %v355_v50 = vmul.f32 %v470_v37, %v470_v37 }
  0xf0   :  { %v232_v42 = vpop.f32.mrf.mxu0  ;;  %v264_v43 = vpop.f32.mrf.mxu1  ;;  %v363_v10 = vmul.f32 %v478_v38, %v478_v38 }
  0xf1   :  { %v367_v44 = vadd.f32 %v366_v41, %v352_v40  ;;  %v331_v45 = vadd.f32 %v330_v39, %v232_v42  ;;  %v353_v46 = vmul.f32 %v232_v42, %v232_v42  ;;  %392 = vst [vmem:[%s640_s2 + $0x28] sm:$0xff] %v232_v42  ;;  %400 = vst [vmem:[%s640_s2 + $0x68] sm:$0xff] %v264_v43 }
  0xf2   :  { %v361_v6 = vmul.f32 %v264_v43, %v264_v43 }
  0xf3   :  { %v332_v48 = vadd.f32 %v469_v27, %v331_v45  ;;  %v368_v49 = vadd.f32 %v367_v44, %v353_v46 }
  0xf5   :  { %v333_v51 = vadd.f32 %v470_v37, %v332_v48  ;;  %v369_v52 = vadd.f32 %v368_v49, %v354_v47 }
  0xf7   :  { %v370_v54 = vadd.f32 %v369_v52, %v355_v50  ;;  %v334_v55 = vadd.f32 %v333_v51, %v245_v19 }
  0xf9   :  { %v335_v56 = vadd.f32 %v334_v55, %v248_v23  ;;  %v371_v58 = vadd.f32 %v370_v54, %v356_v53 }
  0xfb   :  { %v336_v60 = vadd.f32 %v473_v17, %v335_v56  ;;  %v372_v61 = vadd.f32 %v371_v58, %v357_v57 }
  0xfd   :  { %v373_v63 = vadd.f32 %v372_v61, %v358_v59  ;;  %v337_v0 = vadd.f32 %v474_v21, %v336_v60 }
  0xff   :  { %v338_v1 = vadd.f32 %v337_v0, %v261_v33  ;;  %v374_v3 = vadd.f32 %v373_v63, %v359_v62 }
 0x101   :  { %v375_v4 = vadd.f32 %v374_v3, %v360_v2  ;;  %v339_v5 = vadd.f32 %v338_v1, %v264_v43 }
 0x103   :  { %v340_v8 = vadd.f32 %v477_v28, %v339_v5  ;;  %v376_v9 = vadd.f32 %v375_v4, %v361_v6 }
 0x105   :  { %v341_v11 = vadd.f32 %v478_v38, %v340_v8  ;;  %v377_v12 = vadd.f32 %v376_v9, %v362_v7 }
 0x107   :  { %v342_v13 = vrot.slane %v341_v11, 4  ;;  %v378_v14 = vadd.f32 %v377_v12, %v363_v10 }
 0x109   :  { %v343_v15 = vadd.f32 %v342_v13, %v341_v11  ;;  %v379_v16 = vrot.slane %v378_v14, 4 }
 0x10b   :  { %v344_v17 = vrot.slane %v343_v15, 2  ;;  %v380_v18 = vadd.f32 %v379_v16, %v378_v14 }
 0x10d   :  { %v345_v19 = vadd.f32 %v344_v17, %v343_v15  ;;  %v381_v20 = vrot.slane %v380_v18, 2 }
 0x10f   :  { %v346_v21 = vrot.slane %v345_v19, 1  ;;  %v382_v22 = vadd.f32 %v381_v20, %v380_v18 }
 0x111   :  { %v347_v23 = vadd.f32 %v346_v21, %v345_v19  ;;  %v383_v24 = vrot.slane %v382_v22, 1 }
 0x113   :  { %v384_v25 = vadd.f32 %v383_v24, %v382_v22  ;;  %385 = vst [vmem:[%s641_s3] sm:$0xff] %v347_v23 }
 0x115   :  { %386 = vst [vmem:[%s642_s4] sm:$0xff] %v384_v25 }

// kernel: generator_forward.63
= control target key start
LH: loop header
LB: loop body
LE: loop exit
PB: predicated region body
PF: predicated region fallthrough
CT: control target
= control target key end

     0   :  { %s254_s0 = inlined_call_operand.vmem [shape: f32[128,128], index: 0, kind: input, shape index: {}]   ;;  %s255_s1 = inlined_call_operand.vmem [shape: f32[1,128], index: 1, kind: input, shape index: {}]   ;;  %s256_s2 = inlined_call_operand.vmem [shape: f32[1,128], index: 2, kind: input, shape index: {}]   ;;  %s257_s3 = inlined_call_operand.vmem [shape: f32[128,128], index: 3, kind: output, shape index: {}]  }
   0x1   :  { %v14_v0 = vld [vmem:[%s254_s0] sm:$0xff]  ;;  %v15_v4 = vld [vmem:[%s254_s0 + $0x8] sm:$0xff]  ;;  %v16_v5 = vld [vmem:[%s254_s0 + $0x10] sm:$0xff] }
   0x2   :  { %v112_v1 = vld [vmem:[%s255_s1] ss:$0 sm:$0xff]  ;;  %v17_v6 = vld [vmem:[%s254_s0 + $0x18] sm:$0xff]  ;;  %v19_v11 = vld [vmem:[%s254_s0 + $0x28] sm:$0xff] }
   0x3   :  { %v143_v2 = vld [vmem:[%s256_s2] ss:$0 sm:$0xff]  ;;  %v37_v3 = vmul.f32 %v112_v1, %v14_v0  ;;  %v38_v7 = vmul.f32 %v112_v1, %v15_v4  ;;  %v39_v8 = vmul.f32 %v112_v1, %v16_v5  ;;  %v40_v9 = vmul.f32 %v112_v1, %v17_v6  ;;  %v20_v12 = vld [vmem:[%s254_s0 + $0x30] sm:$0xff]  ;;  %v21_v17 = vld [vmem:[%s254_s0 + $0x38] sm:$0xff] }
   0x4   :  { %v18_v10 = vld [vmem:[%s254_s0 + $0x20] sm:$0xff]  ;;  %v42_v15 = vmul.f32 %v112_v1, %v19_v11  ;;  %v43_v16 = vmul.f32 %v112_v1, %v20_v12  ;;  %v44_v21 = vmul.f32 %v112_v1, %v21_v17  ;;  %v23_v27 = vld [vmem:[%s254_s0 + $0x48] sm:$0xff]  ;;  %v24_v28 = vld [vmem:[%s254_s0 + $0x50] sm:$0xff] }
   0x5   :  { %v60_v13 = vadd.f32 %v143_v2, %v37_v3  ;;  %v41_v14 = vmul.f32 %v112_v1, %v18_v10  ;;  %v61_v18 = vadd.f32 %v143_v2, %v38_v7  ;;  %v62_v19 = vadd.f32 %v143_v2, %v39_v8  ;;  %v22_v22 = vld [vmem:[%s254_s0 + $0x40] sm:$0xff]  ;;  %v25_v29 = vld [vmem:[%s254_s0 + $0x58] sm:$0xff]  ;;  %v27_v35 = vld [vmem:[%s254_s0 + $0x68] sm:$0xff] }
   0x6   :  { %v63_v20 = vadd.f32 %v143_v2, %v40_v9  ;;  %v65_v25 = vadd.f32 %v143_v2, %v42_v15  ;;  %v66_v26 = vadd.f32 %v143_v2, %v43_v16  ;;  %v67_v33 = vadd.f32 %v143_v2, %v44_v21  ;;  %v26_v34 = vld [vmem:[%s254_s0 + $0x60] sm:$0xff]  ;;  %v28_v36 = vld [vmem:[%s254_s0 + $0x70] sm:$0xff]  ;;  %v29_v41 = vld [vmem:[%s254_s0 + $0x78] sm:$0xff] }
   0x7   :  { %v76_v23 = vmax.f32 %v60_v13, 0.0  ;;  %v64_v24 = vadd.f32 %v143_v2, %v41_v14  ;;  %v77_v30 = vmax.f32 %v61_v18, 0.0  ;;  %v78_v31 = vmax.f32 %v62_v19, 0.0 }
   0x8   :  { %v79_v32 = vmax.f32 %v63_v20, 0.0  ;;  %v81_v38 = vmax.f32 %v65_v25, 0.0  ;;  %v82_v39 = vmax.f32 %v66_v26, 0.0  ;;  %v45_v40 = vmul.f32 %v112_v1, %v22_v22 }
   0x9   :  { %92 = vst [vmem:[%s257_s3] sm:$0xff] %v76_v23  ;;  %v80_v37 = vmax.f32 %v64_v24, 0.0  ;;  %93 = vst [vmem:[%s257_s3 + $0x8] sm:$0xff] %v77_v30  ;;  %v83_v42 = vmax.f32 %v67_v33, 0.0  ;;  %v46_v43 = vmul.f32 %v112_v1, %v23_v27  ;;  %v47_v44 = vmul.f32 %v112_v1, %v24_v28 }
   0xa   :  { %94 = vst [vmem:[%s257_s3 + $0x10] sm:$0xff] %v78_v31  ;;  %95 = vst [vmem:[%s257_s3 + $0x18] sm:$0xff] %v79_v32  ;;  %v48_v45 = vmul.f32 %v112_v1, %v25_v29  ;;  %v68_v46 = vadd.f32 %v143_v2, %v45_v40  ;;  %v49_v47 = vmul.f32 %v112_v1, %v26_v34 }
   0xb   :  { %96 = vst [vmem:[%s257_s3 + $0x20] sm:$0xff] %v80_v37  ;;  %97 = vst [vmem:[%s257_s3 + $0x28] sm:$0xff] %v81_v38  ;;  %v50_v48 = vmul.f32 %v112_v1, %v27_v35  ;;  %v51_v49 = vmul.f32 %v112_v1, %v28_v36  ;;  %v69_v50 = vadd.f32 %v143_v2, %v46_v43 }
   0xc   :  { %98 = vst [vmem:[%s257_s3 + $0x30] sm:$0xff] %v82_v39  ;;  %99 = vst [vmem:[%s257_s3 + $0x38] sm:$0xff] %v83_v42  ;;  %v70_v51 = vadd.f32 %v143_v2, %v47_v44  ;;  %v71_v52 = vadd.f32 %v143_v2, %v48_v45  ;;  %v52_v53 = vmul.f32 %v112_v1, %v29_v41  ;;  %v84_v54 = vmax.f32 %v68_v46, 0.0 }
   0xd   :  { %v72_v55 = vadd.f32 %v143_v2, %v49_v47  ;;  %v73_v56 = vadd.f32 %v143_v2, %v50_v48  ;;  %v74_v57 = vadd.f32 %v143_v2, %v51_v49  ;;  %v85_v58 = vmax.f32 %v69_v50, 0.0 }
   0xe   :  { %v86_v59 = vmax.f32 %v70_v51, 0.0  ;;  %v87_v60 = vmax.f32 %v71_v52, 0.0  ;;  %v75_v61 = vadd.f32 %v143_v2, %v52_v53  ;;  %100 = vst [vmem:[%s257_s3 + $0x40] sm:$0xff] %v84_v54 }
   0xf   :  { %v88_v62 = vmax.f32 %v72_v55, 0.0  ;;  %v89_v63 = vmax.f32 %v73_v56, 0.0  ;;  %v90_v0 = vmax.f32 %v74_v57, 0.0  ;;  %101 = vst [vmem:[%s257_s3 + $0x48] sm:$0xff] %v85_v58 }
  0x10   :  { %102 = vst [vmem:[%s257_s3 + $0x50] sm:$0xff] %v86_v59  ;;  %103 = vst [vmem:[%s257_s3 + $0x58] sm:$0xff] %v87_v60  ;;  %v91_v1 = vmax.f32 %v75_v61, 0.0 }
  0x11   :  { %104 = vst [vmem:[%s257_s3 + $0x60] sm:$0xff] %v88_v62  ;;  %105 = vst [vmem:[%s257_s3 + $0x68] sm:$0xff] %v89_v63 }
  0x12   :  { %106 = vst [vmem:[%s257_s3 + $0x70] sm:$0xff] %v90_v0  ;;  %107 = vst [vmem:[%s257_s3 + $0x78] sm:$0xff] %v91_v1 }

// kernel: generator_forward.70
= control target key start
LH: loop header
LB: loop body
LE: loop exit
PB: predicated region body
PF: predicated region fallthrough
CT: control target
= control target key end

     0   :  { %s896_s0 = inlined_call_operand.vmem [shape: f32[512,128], index: 0, kind: input, shape index: {}]   ;;  %s897_s1 = inlined_call_operand.vmem [shape: f32[1,128], index: 1, kind: input, shape index: {}]   ;;  %s898_s2 = inlined_call_operand.vmem [shape: f32[1,128], index: 2, kind: input, shape index: {}]   ;;  %s899_s3 = inlined_call_operand.vmem [shape: f32[512,128], index: 3, kind: output, shape index: {}]  }
   0x1   :  { %v14_v0 = vld [vmem:[%s896_s0] sm:$0xff]  ;;  %v15_v4 = vld [vmem:[%s896_s0 + $0x8] sm:$0xff]  ;;  %v16_v5 = vld [vmem:[%s896_s0 + $0x10] sm:$0xff] }
   0x2   :  { %v380_v1 = vld [vmem:[%s897_s1] ss:$0 sm:$0xff]  ;;  %v17_v6 = vld [vmem:[%s896_s0 + $0x18] sm:$0xff]  ;;  %v19_v11 = vld [vmem:[%s896_s0 + $0x28] sm:$0xff] }
   0x3   :  { %v385_v2 = vld [vmem:[%s898_s2] ss:$0 sm:$0xff]  ;;  %v85_v3 = vmul.f32 %v380_v1, %v14_v0  ;;  %v86_v7 = vmul.f32 %v380_v1, %v15_v4  ;;  %v87_v8 = vmul.f32 %v380_v1, %v16_v5  ;;  %v88_v9 = vmul.f32 %v380_v1, %v17_v6  ;;  %v20_v12 = vld [vmem:[%s896_s0 + $0x30] sm:$0xff]  ;;  %v21_v17 = vld [vmem:[%s896_s0 + $0x38] sm:$0xff] }
   0x4   :  { %v18_v10 = vld [vmem:[%s896_s0 + $0x20] sm:$0xff]  ;;  %v90_v15 = vmul.f32 %v380_v1, %v19_v11  ;;  %v91_v16 = vmul.f32 %v380_v1, %v20_v12  ;;  %v92_v21 = vmul.f32 %v380_v1, %v21_v17  ;;  %v23_v27 = vld [vmem:[%s896_s0 + $0x48] sm:$0xff]  ;;  %v24_v28 = vld [vmem:[%s896_s0 + $0x50] sm:$0xff] }
   0x5   :  { %v156_v13 = vadd.f32 %v385_v2, %v85_v3  ;;  %v89_v14 = vmul.f32 %v380_v1, %v18_v10  ;;  %v157_v18 = vadd.f32 %v385_v2, %v86_v7  ;;  %v158_v19 = vadd.f32 %v385_v2, %v87_v8  ;;  %v22_v22 = vld [vmem:[%s896_s0 + $0x40] sm:$0xff]  ;;  %v25_v29 = vld [vmem:[%s896_s0 + $0x58] sm:$0xff]  ;;  %v27_v35 = vld [vmem:[%s896_s0 + $0x68] sm:$0xff] }
   0x6   :  { %v159_v20 = vadd.f32 %v385_v2, %v88_v9  ;;  %v161_v25 = vadd.f32 %v385_v2, %v90_v15  ;;  %v162_v26 = vadd.f32 %v385_v2, %v91_v16  ;;  %v163_v33 = vadd.f32 %v385_v2, %v92_v21  ;;  %v26_v34 = vld [vmem:[%s896_s0 + $0x60] sm:$0xff]  ;;  %v28_v36 = vld [vmem:[%s896_s0 + $0x70] sm:$0xff]  ;;  %v29_v41 = vld [vmem:[%s896_s0 + $0x78] sm:$0xff] }
   0x7   :  { %v220_v23 = vmax.f32 %v156_v13, 0.0  ;;  %v160_v24 = vadd.f32 %v385_v2, %v89_v14  ;;  %v221_v30 = vmax.f32 %v157_v18, 0.0  ;;  %v222_v31 = vmax.f32 %v158_v19, 0.0  ;;  %v30_v54 = vld [vmem:[%s896_s0 + $0x80] sm:$0xff]  ;;  %v31_v59 = vld [vmem:[%s896_s0 + $0x88] sm:$0xff]  ;;  %v32_v60 = vld [vmem:[%s896_s0 + $0x90] sm:$0xff] }
   0x8   :  { %v223_v32 = vmax.f32 %v159_v20, 0.0  ;;  %v225_v38 = vmax.f32 %v161_v25, 0.0  ;;  %v226_v39 = vmax.f32 %v162_v26, 0.0  ;;  %v93_v40 = vmul.f32 %v380_v1, %v22_v22  ;;  %v33_v61 = vld [vmem:[%s896_s0 + $0x98] sm:$0xff]  ;;  %v34_v4 = vld [vmem:[%s896_s0 + $0xa0] sm:$0xff]  ;;  %v35_v5 = vld [vmem:[%s896_s0 + $0xa8] sm:$0xff] }
   0x9   :  { %284 = vst [vmem:[%s899_s3] sm:$0xff] %v220_v23  ;;  %v224_v37 = vmax.f32 %v160_v24, 0.0  ;;  %285 = vst [vmem:[%s899_s3 + $0x8] sm:$0xff] %v221_v30  ;;  %v227_v42 = vmax.f32 %v163_v33, 0.0  ;;  %v94_v43 = vmul.f32 %v380_v1, %v23_v27  ;;  %v95_v44 = vmul.f32 %v380_v1, %v24_v28  ;;  %v36_v6 = vld [vmem:[%s896_s0 + $0xb0] sm:$0xff]  ;;  %v37_v11 = vld [vmem:[%s896_s0 + $0xb8] sm:$0xff] }
   0xa   :  { %286 = vst [vmem:[%s899_s3 + $0x10] sm:$0xff] %v222_v31  ;;  %287 = vst [vmem:[%s899_s3 + $0x18] sm:$0xff] %v223_v32  ;;  %v96_v45 = vmul.f32 %v380_v1, %v25_v29  ;;  %v164_v46 = vadd.f32 %v385_v2, %v93_v40  ;;  %v97_v47 = vmul.f32 %v380_v1, %v26_v34  ;;  %v38_v24 = vld [vmem:[%s896_s0 + $0xc0] sm:$0xff]  ;;  %v39_v29 = vld [vmem:[%s896_s0 + $0xc8] sm:$0xff] }
   0xb   :  { %288 = vst [vmem:[%s899_s3 + $0x20] sm:$0xff] %v224_v37  ;;  %289 = vst [vmem:[%s899_s3 + $0x28] sm:$0xff] %v225_v38  ;;  %v98_v48 = vmul.f32 %v380_v1, %v27_v35  ;;  %v99_v49 = vmul.f32 %v380_v1, %v28_v36  ;;  %v165_v50 = vadd.f32 %v385_v2, %v94_v43  ;;  %v40_v30 = vld [vmem:[%s896_s0 + $0xd0] sm:$0xff]  ;;  %v41_v31 = vld [vmem:[%s896_s0 + $0xd8] sm:$0xff] }
   0xc   :  { %290 = vst [vmem:[%s899_s3 + $0x30] sm:$0xff] %v226_v39  ;;  %291 = vst [vmem:[%s899_s3 + $0x38] sm:$0xff] %v227_v42  ;;  %v166_v51 = vadd.f32 %v385_v2, %v95_v44  ;;  %v167_v52 = vadd.f32 %v385_v2, %v96_v45  ;;  %v100_v53 = vmul.f32 %v380_v1, %v29_v41  ;;  %v228_v55 = vmax.f32 %v164_v46, 0.0  ;;  %v42_v36 = vld [vmem:[%s896_s0 + $0xe0] sm:$0xff]  ;;  %v43_v37 = vld [vmem:[%s896_s0 + $0xe8] sm:$0xff] }
   0xd   :  { %v168_v56 = vadd.f32 %v385_v2, %v97_v47  ;;  %v169_v57 = vadd.f32 %v385_v2, %v98_v48  ;;  %v170_v58 = vadd.f32 %v385_v2, %v99_v49  ;;  %v229_v62 = vmax.f32 %v165_v50, 0.0  ;;  %v44_v38 = vld [vmem:[%s896_s0 + $0xf0] sm:$0xff]  ;;  %v45_v43 = vld [vmem:[%s896_s0 + $0xf8] sm:$0xff] }
   0xe   :  { %v230_v63 = vmax.f32 %v166_v51, 0.0  ;;  %v231_v0 = vmax.f32 %v167_v52, 0.0  ;;  %v171_v3 = vadd.f32 %v385_v2, %v100_v53  ;;  %292 = vst [vmem:[%s899_s3 + $0x40] sm:$0xff] %v228_v55  ;;  %v101_v10 = vmul.f32 %v380_v1, %v30_v54 }
   0xf   :  { %v232_v7 = vmax.f32 %v168_v56, 0.0  ;;  %v233_v8 = vmax.f32 %v169_v57, 0.0  ;;  %v234_v9 = vmax.f32 %v170_v58, 0.0  ;;  %293 = vst [vmem:[%s899_s3 + $0x48] sm:$0xff] %v229_v62  ;;  %v102_v13 = vmul.f32 %v380_v1, %v31_v59  ;;  %v46_v56 = vld [vmem:[%s896_s0 + $0x100] sm:$0xff]  ;;  %v48_v62 = vld [vmem:[%s896_s0 + $0x110] sm:$0xff] }
  0x10   :  { %294 = vst [vmem:[%s899_s3 + $0x50] sm:$0xff] %v230_v63  ;;  %295 = vst [vmem:[%s899_s3 + $0x58] sm:$0xff] %v231_v0  ;;  %v235_v12 = vmax.f32 %v171_v3, 0.0  ;;  %v103_v14 = vmul.f32 %v380_v1, %v32_v60  ;;  %v104_v15 = vmul.f32 %v380_v1, %v33_v61  ;;  %v172_v16 = vadd.f32 %v385_v2, %v101_v10  ;;  %v47_v61 = vld [vmem:[%s896_s0 + $0x108] sm:$0xff]  ;;  %v49_v63 = vld [vmem:[%s896_s0 + $0x118] sm:$0xff] }
  0x11   :  { %296 = vst [vmem:[%s899_s3 + $0x60] sm:$0xff] %v232_v7  ;;  %297 = vst [vmem:[%s899_s3 + $0x68] sm:$0xff] %v233_v8  ;;  %v105_v17 = vmul.f32 %v380_v1, %v34_v4  ;;  %v106_v18 = vmul.f32 %v380_v1, %v35_v5  ;;  %v107_v19 = vmul.f32 %v380_v1, %v36_v6  ;;  %v50_v6 = vld [vmem:[%s896_s0 + $0x120] sm:$0xff]  ;;  %v51_v7 = vld [vmem:[%s896_s0 + $0x128] sm:$0xff] }
  0x12   :  { %298 = vst [vmem:[%s899_s3 + $0x70] sm:$0xff] %v234_v9  ;;  %299 = vst [vmem:[%s899_s3 + $0x78] sm:$0xff] %v235_v12  ;;  %v173_v20 = vadd.f32 %v385_v2, %v102_v13  ;;  %v174_v21 = vadd.f32 %v385_v2, %v103_v14  ;;  %v175_v22 = vadd.f32 %v385_v2, %v104_v15  ;;  %v236_v25 = vmax.f32 %v172_v16, 0.0  ;;  %v52_v8 = vld [vmem:[%s896_s0 + $0x130] sm:$0xff]  ;;  %v53_v13 = vld [vmem:[%s896_s0 + $0x138] sm:$0xff] }
  0x13   :  { %v108_v23 = vmul.f32 %v380_v1, %v37_v11  ;;  %v176_v26 = vadd.f32 %v385_v2, %v105_v17  ;;  %v177_v27 = vadd.f32 %v385_v2, %v106_v18  ;;  %v178_v28 = vadd.f32 %v385_v2, %v107_v19 }
  0x14   :  { %v237_v32 = vmax.f32 %v173_v20, 0.0  ;;  %v238_v33 = vmax.f32 %v174_v21, 0.0  ;;  %v239_v34 = vmax.f32 %v175_v22, 0.0  ;;  %300 = vst [vmem:[%s899_s3 + $0x80] sm:$0xff] %v236_v25  ;;  %v109_v42 = vmul.f32 %v380_v1, %v38_v24 }
  0x15   :  { %v179_v35 = vadd.f32 %v385_v2, %v108_v23  ;;  %v240_v39 = vmax.f32 %v176_v26, 0.0  ;;  %v241_v40 = vmax.f32 %v177_v27, 0.0  ;;  %v242_v41 = vmax.f32 %v178_v28, 0.0  ;;  %v54_v26 = vld [vmem:[%s896_s0 + $0x140] sm:$0xff] }
  0x16   :  { %301 = vst [vmem:[%s899_s3 + $0x88] sm:$0xff] %v237_v32  ;;  %302 = vst [vmem:[%s899_s3 + $0x90] sm:$0xff] %v238_v33  ;;  %v110_v45 = vmul.f32 %v380_v1, %v39_v29  ;;  %v111_v46 = vmul.f32 %v380_v1, %v40_v30  ;;  %v112_v47 = vmul.f32 %v380_v1, %v41_v31  ;;  %v55_v31 = vld [vmem:[%s896_s0 + $0x148] sm:$0xff]  ;;  %v56_v32 = vld [vmem:[%s896_s0 + $0x150] sm:$0xff] }
  0x17   :  { %303 = vst [vmem:[%s899_s3 + $0x98] sm:$0xff] %v239_v34  ;;  %v243_v44 = vmax.f32 %v179_v35, 0.0  ;;  %304 = vst [vmem:[%s899_s3 + $0xa0] sm:$0xff] %v240_v39  ;;  %v180_v48 = vadd.f32 %v385_v2, %v109_v42  ;;  %v113_v49 = vmul.f32 %v380_v1, %v42_v36  ;;  %v114_v50 = vmul.f32 %v380_v1, %v43_v37  ;;  %v57_v33 = vld [vmem:[%s896_s0 + $0x158] sm:$0xff]  ;;  %v59_v39 = vld [vmem:[%s896_s0 + $0x168] sm:$0xff] }
  0x18   :  { %305 = vst [vmem:[%s899_s3 + $0xa8] sm:$0xff] %v241_v40  ;;  %306 = vst [vmem:[%s899_s3 + $0xb0] sm:$0xff] %v242_v41  ;;  %v115_v51 = vmul.f32 %v380_v1, %v44_v38  ;;  %v181_v52 = vadd.f32 %v385_v2, %v110_v45  ;;  %v182_v53 = vadd.f32 %v385_v2, %v111_v46  ;;  %v58_v38 = vld [vmem:[%s896_s0 + $0x160] sm:$0xff]  ;;  %v60_v40 = vld [vmem:[%s896_s0 + $0x170] sm:$0xff] }
  0x19   :  { %307 = vst [vmem:[%s899_s3 + $0xb8] sm:$0xff] %v243_v44  ;;  %v183_v54 = vadd.f32 %v385_v2, %v112_v47  ;;  %v116_v55 = vmul.f32 %v380_v1, %v45_v43  ;;  %v244_v57 = vmax.f32 %v180_v48, 0.0  ;;  %v184_v58 = vadd.f32 %v385_v2, %v113_v49  ;;  %v61_v45 = vld [vmem:[%s896_s0 + $0x178] sm:$0xff] }
  0x1a   :  { %v185_v59 = vadd.f32 %v385_v2, %v114_v50  ;;  %v186_v60 = vadd.f32 %v385_v2, %v115_v51  ;;  %v245_v0 = vmax.f32 %v181_v52, 0.0  ;;  %v246_v3 = vmax.f32 %v182_v53, 0.0 }
  0x1b   :  { %v247_v4 = vmax.f32 %v183_v54, 0.0  ;;  %v187_v5 = vadd.f32 %v385_v2, %v116_v55  ;;  %308 = vst [vmem:[%s899_s3 + $0xc0] sm:$0xff] %v244_v57  ;;  %v248_v9 = vmax.f32 %v184_v58, 0.0  ;;  %v117_v12 = vmul.f32 %v380_v1, %v46_v56  ;;  %v62_v58 = vld [vmem:[%s896_s0 + $0x180] sm:$0xff] }
  0x1c   :  { %v249_v10 = vmax.f32 %v185_v59, 0.0  ;;  %v250_v11 = vmax.f32 %v186_v60, 0.0  ;;  %309 = vst [vmem:[%s899_s3 + $0xc8] sm:$0xff] %v245_v0  ;;  %310 = vst [vmem:[%s899_s3 + $0xd0] sm:$0xff] %v246_v3  ;;  %v118_v15 = vmul.f32 %v380_v1, %v47_v61  ;;  %v119_v16 = vmul.f32 %v380_v1, %v48_v62  ;;  %v64_v0 = vld [vmem:[%s896_s0 + $0x190] sm:$0xff]  ;;  %v65_v3 = vld [vmem:[%s896_s0 + $0x198] sm:$0xff] }
  0x1d   :  { %311 = vst [vmem:[%s899_s3 + $0xd8] sm:$0xff] %v247_v4  ;;  %v251_v14 = vmax.f32 %v187_v5, 0.0  ;;  %v120_v17 = vmul.f32 %v380_v1, %v49_v63  ;;  %312 = vst [vmem:[%s899_s3 + $0xe0] sm:$0xff] %v248_v9  ;;  %v188_v18 = vadd.f32 %v385_v2, %v117_v12  ;;  %v121_v19 = vmul.f32 %v380_v1, %v50_v6  ;;  %v63_v63 = vld [vmem:[%s896_s0 + $0x188] sm:$0xff] }
  0x1e   :  { %313 = vst [vmem:[%s899_s3 + $0xe8] sm:$0xff] %v249_v10  ;;  %314 = vst [vmem:[%s899_s3 + $0xf0] sm:$0xff] %v250_v11  ;;  %v122_v20 = vmul.f32 %v380_v1, %v51_v7  ;;  %v123_v21 = vmul.f32 %v380_v1, %v52_v8  ;;  %v189_v22 = vadd.f32 %v385_v2, %v118_v15  ;;  %v66_v8 = vld [vmem:[%s896_s0 + $0x1a0] sm:$0xff]  ;;  %v67_v9 = vld [vmem:[%s896_s0 + $0x1a8] sm:$0xff] }
  0x1f   :  { %315 = vst [vmem:[%s899_s3 + $0xf8] sm:$0xff] %v251_v14  ;;  %v190_v23 = vadd.f32 %v385_v2, %v119_v16  ;;  %v191_v24 = vadd.f32 %v385_v2, %v120_v17  ;;  %v124_v25 = vmul.f32 %v380_v1, %v53_v13  ;;  %v252_v27 = vmax.f32 %v188_v18, 0.0  ;;  %v68_v10 = vld [vmem:[%s896_s0 + $0x1b0] sm:$0xff]  ;;  %v69_v15 = vld [vmem:[%s896_s0 + $0x1b8] sm:$0xff] }
  0x20   :  { %v192_v28 = vadd.f32 %v385_v2, %v121_v19  ;;  %v193_v29 = vadd.f32 %v385_v2, %v122_v20  ;;  %v194_v30 = vadd.f32 %v385_v2, %v123_v21  ;;  %v253_v34 = vmax.f32 %v189_v22, 0.0 }
  0x21   :  { %v254_v35 = vmax.f32 %v190_v23, 0.0  ;;  %v255_v36 = vmax.f32 %v191_v24, 0.0  ;;  %v195_v37 = vadd.f32 %v385_v2, %v124_v25  ;;  %316 = vst [vmem:[%s899_s3 + $0x100] sm:$0xff] %v252_v27  ;;  %v125_v44 = vmul.f32 %v380_v1, %v54_v26 }
  0x22   :  { %v256_v41 = vmax.f32 %v192_v28, 0.0  ;;  %v257_v42 = vmax.f32 %v193_v29, 0.0  ;;  %v258_v43 = vmax.f32 %v194_v30, 0.0  ;;  %317 = vst [vmem:[%s899_s3 + $0x108] sm:$0xff] %v253_v34  ;;  %v126_v47 = vmul.f32 %v380_v1, %v55_v31  ;;  %v70_v28 = vld [vmem:[%s896_s0 + $0x1c0] sm:$0xff]  ;;  %v72_v34 = vld [vmem:[%s896_s0 + $0x1d0] sm:$0xff] }
  0x23   :  { %318 = vst [vmem:[%s899_s3 + $0x110] sm:$0xff] %v254_v35  ;;  %319 = vst [vmem:[%s899_s3 + $0x118] sm:$0xff] %v255_v36  ;;  %v259_v46 = vmax.f32 %v195_v37, 0.0  ;;  %v127_v48 = vmul.f32 %v380_v1, %v56_v32  ;;  %v128_v49 = vmul.f32 %v380_v1, %v57_v33  ;;  %v196_v50 = vadd.f32 %v385_v2, %v125_v44  ;;  %v71_v33 = vld [vmem:[%s896_s0 + $0x1c8] sm:$0xff]  ;;  %v73_v35 = vld [vmem:[%s896_s0 + $0x1d8] sm:$0xff] }
  0x24   :  { %320 = vst [vmem:[%s899_s3 + $0x120] sm:$0xff] %v256_v41  ;;  %321 = vst [vmem:[%s899_s3 + $0x128] sm:$0xff] %v257_v42  ;;  %v129_v51 = vmul.f32 %v380_v1, %v58_v38  ;;  %v130_v52 = vmul.f32 %v380_v1, %v59_v39  ;;  %v131_v53 = vmul.f32 %v380_v1, %v60_v40  ;;  %v74_v40 = vld [vmem:[%s896_s0 + $0x1e0] sm:$0xff]  ;;  %v75_v41 = vld [vmem:[%s896_s0 + $0x1e8] sm:$0xff] }
  0x25   :  { %322 = vst [vmem:[%s899_s3 + $0x130] sm:$0xff] %v258_v43  ;;  %323 = vst [vmem:[%s899_s3 + $0x138] sm:$0xff] %v259_v46  ;;  %v197_v54 = vadd.f32 %v385_v2, %v126_v47  ;;  %v198_v55 = vadd.f32 %v385_v2, %v127_v48  ;;  %v199_v56 = vadd.f32 %v385_v2, %v128_v49  ;;  %v260_v59 = vmax.f32 %v196_v50, 0.0  ;;  %v76_v42 = vld [vmem:[%s896_s0 + $0x1f0] sm:$0xff]  ;;  %v77_v47 = vld [vmem:[%s896_s0 + $0x1f8] sm:$0xff] }
  0x26   :  { %v132_v57 = vmul.f32 %v380_v1, %v61_v45  ;;  %v200_v60 = vadd.f32 %v385_v2, %v129_v51  ;;  %v201_v61 = vadd.f32 %v385_v2, %v130_v52  ;;  %v202_v62 = vadd.f32 %v385_v2, %v131_v53 }
  0x27   :  { %v261_v4 = vmax.f32 %v197_v54, 0.0  ;;  %v262_v5 = vmax.f32 %v198_v55, 0.0  ;;  %v263_v6 = vmax.f32 %v199_v56, 0.0  ;;  %324 = vst [vmem:[%s899_s3 + $0x140] sm:$0xff] %v260_v59  ;;  %v133_v14 = vmul.f32 %v380_v1, %v62_v58 }
  0x28   :  { %v203_v7 = vadd.f32 %v385_v2, %v132_v57  ;;  %v264_v11 = vmax.f32 %v200_v60, 0.0  ;;  %v265_v12 = vmax.f32 %v201_v61, 0.0  ;;  %v266_v13 = vmax.f32 %v202_v62, 0.0 }
  0x29   :  { %325 = vst [vmem:[%s899_s3 + $0x148] sm:$0xff] %v261_v4  ;;  %326 = vst [vmem:[%s899_s3 + $0x150] sm:$0xff] %v262_v5  ;;  %v134_v17 = vmul.f32 %v380_v1, %v63_v63  ;;  %v135_v18 = vmul.f32 %v380_v1, %v64_v0  ;;  %v136_v19 = vmul.f32 %v380_v1, %v65_v3 }
  0x2a   :  { %327 = vst [vmem:[%s899_s3 + $0x158] sm:$0xff] %v263_v6  ;;  %v267_v16 = vmax.f32 %v203_v7, 0.0  ;;  %328 = vst [vmem:[%s899_s3 + $0x160] sm:$0xff] %v264_v11  ;;  %v204_v20 = vadd.f32 %v385_v2, %v133_v14  ;;  %v137_v21 = vmul.f32 %v380_v1, %v66_v8  ;;  %v138_v22 = vmul.f32 %v380_v1, %v67_v9 }
  0x2b   :  { %329 = vst [vmem:[%s899_s3 + $0x168] sm:$0xff] %v265_v12  ;;  %330 = vst [vmem:[%s899_s3 + $0x170] sm:$0xff] %v266_v13  ;;  %v139_v23 = vmul.f32 %v380_v1, %v68_v10  ;;  %v205_v24 = vadd.f32 %v385_v2, %v134_v17  ;;  %v206_v25 = vadd.f32 %v385_v2, %v135_v18 }
  0x2c   :  { %331 = vst [vmem:[%s899_s3 + $0x178] sm:$0xff] %v267_v16  ;;  %v207_v26 = vadd.f32 %v385_v2, %v136_v19  ;;  %v140_v27 = vmul.f32 %v380_v1, %v69_v15  ;;  %v268_v29 = vmax.f32 %v204_v20, 0.0  ;;  %v208_v30 = vadd.f32 %v385_v2, %v137_v21 }
  0x2d   :  { %v209_v31 = vadd.f32 %v385_v2, %v138_v22  ;;  %v210_v32 = vadd.f32 %v385_v2, %v139_v23  ;;  %v269_v36 = vmax.f32 %v205_v24, 0.0  ;;  %v270_v37 = vmax.f32 %v206_v25, 0.0 }
  0x2e   :  { %v271_v38 = vmax.f32 %v207_v26, 0.0  ;;  %v211_v39 = vadd.f32 %v385_v2, %v140_v27  ;;  %332 = vst [vmem:[%s899_s3 + $0x180] sm:$0xff] %v268_v29  ;;  %v272_v43 = vmax.f32 %v208_v30, 0.0  ;;  %v141_v46 = vmul.f32 %v380_v1, %v70_v28 }
  0x2f   :  { %v273_v44 = vmax.f32 %v209_v31, 0.0  ;;  %v274_v45 = vmax.f32 %v210_v32, 0.0  ;;  %333 = vst [vmem:[%s899_s3 + $0x188] sm:$0xff] %v269_v36  ;;  %334 = vst [vmem:[%s899_s3 + $0x190] sm:$0xff] %v270_v37  ;;  %v142_v49 = vmul.f32 %v380_v1, %v71_v33  ;;  %v143_v50 = vmul.f32 %v380_v1, %v72_v34 }
  0x30   :  { %335 = vst [vmem:[%s899_s3 + $0x198] sm:$0xff] %v271_v38  ;;  %v275_v48 = vmax.f32 %v211_v39, 0.0  ;;  %v144_v51 = vmul.f32 %v380_v1, %v73_v35  ;;  %336 = vst [vmem:[%s899_s3 + $0x1a0] sm:$0xff] %v272_v43  ;;  %v212_v52 = vadd.f32 %v385_v2, %v141_v46  ;;  %v145_v53 = vmul.f32 %v380_v1, %v74_v40 }
  0x31   :  { %337 = vst [vmem:[%s899_s3 + $0x1a8] sm:$0xff] %v273_v44  ;;  %338 = vst [vmem:[%s899_s3 + $0x1b0] sm:$0xff] %v274_v45  ;;  %v146_v54 = vmul.f32 %v380_v1, %v75_v41  ;;  %v147_v55 = vmul.f32 %v380_v1, %v76_v42  ;;  %v213_v56 = vadd.f32 %v385_v2, %v142_v49 }
  0x32   :  { %339 = vst [vmem:[%s899_s3 + $0x1b8] sm:$0xff] %v275_v48  ;;  %v214_v57 = vadd.f32 %v385_v2, %v143_v50  ;;  %v215_v58 = vadd.f32 %v385_v2, %v144_v51  ;;  %v148_v59 = vmul.f32 %v380_v1, %v77_v47  ;;  %v276_v60 = vmax.f32 %v212_v52, 0.0 }
  0x33   :  { %v216_v61 = vadd.f32 %v385_v2, %v145_v53  ;;  %v217_v62 = vadd.f32 %v385_v2, %v146_v54  ;;  %v218_v63 = vadd.f32 %v385_v2, %v147_v55  ;;  %v277_v0 = vmax.f32 %v213_v56, 0.0 }
  0x34   :  { %v278_v3 = vmax.f32 %v214_v57, 0.0  ;;  %v279_v4 = vmax.f32 %v215_v58, 0.0  ;;  %v219_v5 = vadd.f32 %v385_v2, %v148_v59  ;;  %340 = vst [vmem:[%s899_s3 + $0x1c0] sm:$0xff] %v276_v60 }
  0x35   :  { %v280_v6 = vmax.f32 %v216_v61, 0.0  ;;  %v281_v7 = vmax.f32 %v217_v62, 0.0  ;;  %v282_v8 = vmax.f32 %v218_v63, 0.0  ;;  %341 = vst [vmem:[%s899_s3 + $0x1c8] sm:$0xff] %v277_v0 }
  0x36   :  { %342 = vst [vmem:[%s899_s3 + $0x1d0] sm:$0xff] %v278_v3  ;;  %343 = vst [vmem:[%s899_s3 + $0x1d8] sm:$0xff] %v279_v4  ;;  %v283_v1 = vmax.f32 %v219_v5, 0.0 }
  0x37   :  { %344 = vst [vmem:[%s899_s3 + $0x1e0] sm:$0xff] %v280_v6  ;;  %345 = vst [vmem:[%s899_s3 + $0x1e8] sm:$0xff] %v281_v7 }
  0x38   :  { %346 = vst [vmem:[%s899_s3 + $0x1f0] sm:$0xff] %v282_v8  ;;  %347 = vst [vmem:[%s899_s3 + $0x1f8] sm:$0xff] %v283_v1 }

// kernel: generator_forward.72
= control target key start
LH: loop header
LB: loop body
LE: loop exit
PB: predicated region body
PF: predicated region fallthrough
CT: control target
= control target key end

     0   :  { %s1177_s9 = smov 0   ;;  %s1179_s10 = smov 0   ;;  %s1290_s0 = inlined_call_operand.vmem [shape: bf16[2048,128], index: 0, kind: input, shape index: {}]   ;;  %s1291_s1 = inlined_call_operand.vmem [shape: bf16[128,128], index: 1, kind: input, shape index: {}]   ;;  %s1292_s2 = inlined_call_operand.vmem [shape: f32[2048,128], index: 2, kind: output, shape index: {}]  }
   0x1   :  { %s1181_s11 = smov 0  }
   0x2 LB: > { %s31_s12 = sadd.s32 1, %s1156_s10  ;;  %p907_p0 = scmp.ge.s32.totalorder %s1160_s11, 1  ;;  %s1160_s11 = sphi %s1181_s11, %s12_s11   ;;  %s1156_s10 = sphi %s1179_s10, %s1294_s10   ;;  %s1152_s9 = sphi %s1177_s9, %s1293_s9  }
   0x3   : > { %p33_p1 = scmp.ge.s32.totalorder %s31_s12, 8  ;;  %p155_p2 = scmp.lt.s32.totalorder %s1160_s11, 9 }
   0x5   : > { %s1296_s12 = smov (%p33_p1, %s31_s12), 0  ;;  %p156_p3 = pnand %p907_p0, %p155_p2 }
   0x6   : > { %s908_s15 = sshll.u32 (!%p156_p3), %s1152_s9, 5 }
   0x7   : > { %159 = sbr.rel (%p156_p3) target bundleno = 284 (0x11c), region = 28  ;;  %p192_p4 = scmp.lt.s32.totalorder (!%p156_p3), %s908_s15, 255 }
   0xc   : > { %v1050_v0 = vld [vmem:[%s1291_s1 + $0x38] sm:$0xff]   ;;  %v1051_v1 = vld [vmem:[%s1291_s1 + $0x30] sm:$0xff]   ;;  %s1298_s15 = smov (!%p192_p4, %s908_s15), 255  ;;  %v1052_v2 = vld [vmem:[%s1291_s1 + $0x28] sm:$0xff]  }
   0xd   : > { %962 = vmatprep.subr.bf16.mxu0 %v1050_v0  ;;  %1010 = vmatprep.subr.bf16.mxu1 %v1050_v0  ;;  %s909_s20 = sshll.u32 %s1298_s15, 2  ;;  %v1053_v3 = vld [vmem:[%s1291_s1 + $0x20] sm:$0xff]   ;;  %v1054_v6 = vld [vmem:[%s1291_s1 + $0x18] sm:$0xff]   ;;  %v1055_v7 = vld [vmem:[%s1291_s1 + $0x10] sm:$0xff]   ;;  %s911_s6 = sshll.u32 %s1298_s15, 3 }
   0xe   : > { %963 = vmatpush3.bf16.msra.mxu0 %v1050_v0  ;;  %1018 = vmatpush3.bf16.msra.mxu1 %v1050_v0  ;;  %s1210_s23 = scalar_lea.vmem %s1290_s0, %s909_s20  ;;  %v1056_v8 = vld [vmem:[%s1291_s1 + $0x8] sm:$0xff]   ;;  %v1057_v9 = vld [vmem:[%s1291_s1] sm:$0xff]   ;;  %s1247_s9 = scalar_lea.vmem %s1292_s2, %s911_s6 }
   0xf   : > { %964 = vmatprep.subr.bf16.mxu0 %v1051_v1  ;;  %1011 = vmatprep.subr.bf16.mxu1 %v1051_v1  ;;  %v1058_v4 = vld [vmem:[%s1210_s23] sm:$0xff]   ;;  %v1060_v10 = vld [vmem:[%s1210_s23 + $0x8] sm:$0xff]   ;;  %v1062_v12 = vld [vmem:[%s1210_s23 + $0x10] sm:$0xff]  }
  0x10   : > { %v1059_v5 = vld [vmem:[%s1210_s23 + $0x40] sm:$0xff]   ;;  %978 = vmatprep.mubr.bf16.mxu0 %v1058_v4  ;;  %v1061_v11 = vld [vmem:[%s1210_s23 + $0x48] sm:$0xff]   ;;  %v1063_v13 = vld [vmem:[%s1210_s23 + $0x50] sm:$0xff]  }
  0x11   : > { %994 = vmatprep.mubr.bf16.mxu1 %v1059_v5  ;;  %v1064_v14 = vld [vmem:[%s1210_s23 + $0x18] sm:$0xff]   ;;  %v1066_v16 = vld [vmem:[%s1210_s23 + $0x20] sm:$0xff]   ;;  %v1068_v18 = vld [vmem:[%s1210_s23 + $0x28] sm:$0xff]  }
  0x12   : > { %965 = vmatpush3.bf16.msra.mxu0 %v1051_v1  ;;  %1019 = vmatpush3.bf16.msra.mxu1 %v1051_v1  ;;  %v1065_v15 = vld [vmem:[%s1210_s23 + $0x58] sm:$0xff]   ;;  %v1067_v17 = vld [vmem:[%s1210_s23 + $0x60] sm:$0xff]   ;;  %v1069_v19 = vld [vmem:[%s1210_s23 + $0x68] sm:$0xff]  }
  0x13   : > { %966 = vmatprep.subr.bf16.mxu0 %v1052_v2  ;;  %1012 = vmatprep.subr.bf16.mxu1 %v1052_v2  ;;  %v1070_v20 = vld [vmem:[%s1210_s23 + $0x30] sm:$0xff]   ;;  %v1072_v22 = vld [vmem:[%s1210_s23 + $0x38] sm:$0xff]  }
  0x14   : > { %v1071_v21 = vld [vmem:[%s1210_s23 + $0x70] sm:$0xff]   ;;  %v1073_v23 = vld [vmem:[%s1210_s23 + $0x78] sm:$0xff]  }
  0x16   : > { %967 = vmatpush3.bf16.msra.mxu0 %v1052_v2  ;;  %1020 = vmatpush3.bf16.msra.mxu1 %v1052_v2 }
  0x17   : > { %968 = vmatprep.subr.bf16.mxu0 %v1053_v3  ;;  %1013 = vmatprep.subr.bf16.mxu1 %v1053_v3 }
  0x1a   : > { %969 = vmatpush3.bf16.msra.mxu0 %v1053_v3  ;;  %1021 = vmatpush3.bf16.msra.mxu1 %v1053_v3 }
  0x1b   : > { %970 = vmatprep.subr.bf16.mxu0 %v1054_v6  ;;  %1014 = vmatprep.subr.bf16.mxu1 %v1054_v6 }
  0x1e   : > { %971 = vmatpush3.bf16.msra.mxu0 %v1054_v6  ;;  %1022 = vmatpush3.bf16.msra.mxu1 %v1054_v6 }
  0x1f   : > { %972 = vmatprep.subr.bf16.mxu0 %v1055_v7  ;;  %1015 = vmatprep.subr.bf16.mxu1 %v1055_v7 }
  0x22   : > { %973 = vmatpush3.bf16.msra.mxu0 %v1055_v7  ;;  %1023 = vmatpush3.bf16.msra.mxu1 %v1055_v7 }
  0x23   : > { %974 = vmatprep.subr.bf16.mxu0 %v1056_v8  ;;  %1016 = vmatprep.subr.bf16.mxu1 %v1056_v8 }
  0x26   : > { %975 = vmatpush3.bf16.msra.mxu0 %v1056_v8  ;;  %1024 = vmatpush3.bf16.msra.mxu1 %v1056_v8 }
  0x27   : > { %976 = vmatprep.subr.bf16.mxu0 %v1057_v9  ;;  %1017 = vmatprep.subr.bf16.mxu1 %v1057_v9 }
  0x2a   : > { %977 = vmatpush3.bf16.msra.mxu0 %v1057_v9  ;;  %1025 = vmatpush3.bf16.msra.mxu1 %v1057_v9 }
  0x2d   : > { %979 = vmatmul.mubr.bf16.vlgmr.msra.gmra.mxu0 %v1060_v10  ;;  %995 = vmatmul.mubr.bf16.vlgmr.msra.gmra.mxu1 %v1061_v11 }
  0x2e   : > { %982 = vmatprep.mubr.bf16.mxu0 %v1062_v12  ;;  %998 = vmatprep.mubr.bf16.mxu1 %v1063_v13 }
  0x35   : > { %983 = vmatmul.mubr.bf16.gmra.mxu0 %v1064_v14  ;;  %999 = vmatmul.mubr.bf16.gmra.mxu1 %v1065_v15 }
  0x36   : > { %986 = vmatprep.mubr.bf16.mxu0 %v1066_v16  ;;  %1002 = vmatprep.mubr.bf16.mxu1 %v1067_v17 }
  0x3d   : > { %987 = vmatmul.mubr.bf16.gmra.mxu0 %v1068_v18  ;;  %1003 = vmatmul.mubr.bf16.gmra.mxu1 %v1069_v19 }
  0x3e   : > { %990 = vmatprep.mubr.bf16.mxu0 %v1070_v20  ;;  %1006 = vmatprep.mubr.bf16.mxu1 %v1071_v21 }
  0x45   : > { %991 = vmatmul.mubr.bf16.gmra.mxu0 %v1072_v22  ;;  %1007 = vmatmul.mubr.bf16.gmra.mxu1 %v1073_v23 }
  0xed   : > { %v980_v24 = vpop.f32.mrf.mxu0  ;;  %v996_v25 = vpop.f32.mrf.mxu1 }
  0xee   : > { %1074 = vtanh.f32 %v980_v24 }
  0xef   : > { %1076 = vtanh.f32 %v996_v25  ;;  %v513_v26 = vpop.f32.mrf.mxu0  ;;  %v577_v27 = vpop.f32.mrf.mxu1 }
  0xf0   : > { %1078 = vtanh.f32 %v513_v26 }
  0xf1   : > { %1080 = vtanh.f32 %v577_v27  ;;  %v981_v28 = vpop.f32.mrf.mxu0  ;;  %v997_v29 = vpop.f32.mrf.mxu1 }
  0xf2   : > { %1082 = vtanh.f32 %v981_v28 }
  0xf3   : > { %1084 = vtanh.f32 %v997_v29  ;;  %v516_v30 = vpop.f32.mrf.mxu0  ;;  %v580_v31 = vpop.f32.mrf.mxu1 }
  0xf4   : > { %1086 = vtanh.f32 %v516_v30 }
  0xf5   : > { %1088 = vtanh.f32 %v580_v31  ;;  %v984_v32 = vpop.f32.mrf.mxu0  ;;  %v1000_v33 = vpop.f32.mrf.mxu1 }
  0xf6   : > { %1090 = vtanh.f32 %v984_v32 }
  0xf7   : > { %1092 = vtanh.f32 %v1000_v33  ;;  %v529_v34 = vpop.f32.mrf.mxu0  ;;  %v593_v35 = vpop.f32.mrf.mxu1 }
  0xf8   : > { %1094 = vtanh.f32 %v529_v34 }
  0xf9   : > { %1096 = vtanh.f32 %v593_v35  ;;  %v985_v36 = vpop.f32.mrf.mxu0  ;;  %v1001_v37 = vpop.f32.mrf.mxu1 }
  0xfa   : > { %1098 = vtanh.f32 %v985_v36 }
  0xfb   : > { %v1075_v38 = vpop.eup %1074  ;;  %1100 = vtanh.f32 %v1001_v37  ;;  %v532_v39 = vpop.f32.mrf.mxu0 }
  0xfc   : > { %v596_v40 = vpop.f32.mrf.mxu1  ;;  %v1077_v41 = vpop.eup %1076  ;;  %773 = vst [vmem:[%s1247_s9 + $0x10] sm:$0xff] %v1075_v38  ;;  %1102 = vtanh.f32 %v532_v39 }
  0xfd   : > { %v1079_v42 = vpop.eup %1078  ;;  %789 = vst [vmem:[%s1247_s9 + $0x90] sm:$0xff] %v1077_v41  ;;  %1104 = vtanh.f32 %v596_v40  ;;  %v988_v43 = vpop.f32.mrf.mxu0 }
  0xfe   : > { %v1004_v44 = vpop.f32.mrf.mxu1  ;;  %v1081_v45 = vpop.eup %1080  ;;  %771 = vst [vmem:[%s1247_s9] sm:$0xff] %v1079_v42  ;;  %1106 = vtanh.f32 %v988_v43 }
  0xff   : > { %v1083_v46 = vpop.eup %1082  ;;  %787 = vst [vmem:[%s1247_s9 + $0x80] sm:$0xff] %v1081_v45  ;;  %1108 = vtanh.f32 %v1004_v44  ;;  %v545_v47 = vpop.f32.mrf.mxu0 }
 0x100   : > { %v609_v48 = vpop.f32.mrf.mxu1  ;;  %v1085_v49 = vpop.eup %1084  ;;  %774 = vst [vmem:[%s1247_s9 + $0x18] sm:$0xff] %v1083_v46  ;;  %1110 = vtanh.f32 %v545_v47 }
 0x101   : > { %v1087_v50 = vpop.eup %1086  ;;  %790 = vst [vmem:[%s1247_s9 + $0x98] sm:$0xff] %v1085_v49  ;;  %1112 = vtanh.f32 %v609_v48  ;;  %v989_v51 = vpop.f32.mrf.mxu0 }
 0x102   : > { %v1005_v52 = vpop.f32.mrf.mxu1  ;;  %v1089_v53 = vpop.eup %1088  ;;  %772 = vst [vmem:[%s1247_s9 + $0x8] sm:$0xff] %v1087_v50  ;;  %1114 = vtanh.f32 %v989_v51 }
 0x103   : > { %v1091_v54 = vpop.eup %1090  ;;  %788 = vst [vmem:[%s1247_s9 + $0x88] sm:$0xff] %v1089_v53  ;;  %1116 = vtanh.f32 %v1005_v52  ;;  %v548_v55 = vpop.f32.mrf.mxu0 }
 0x104   : > { %v612_v56 = vpop.f32.mrf.mxu1  ;;  %v1093_v57 = vpop.eup %1092  ;;  %777 = vst [vmem:[%s1247_s9 + $0x30] sm:$0xff] %v1091_v54  ;;  %1118 = vtanh.f32 %v548_v55 }
 0x105   : > { %v1095_v58 = vpop.eup %1094  ;;  %793 = vst [vmem:[%s1247_s9 + $0xb0] sm:$0xff] %v1093_v57  ;;  %1120 = vtanh.f32 %v612_v56  ;;  %v992_v59 = vpop.f32.mrf.mxu0 }
 0x106   : > { %v1008_v60 = vpop.f32.mrf.mxu1  ;;  %v1097_v61 = vpop.eup %1096  ;;  %775 = vst [vmem:[%s1247_s9 + $0x20] sm:$0xff] %v1095_v58  ;;  %1122 = vtanh.f32 %v992_v59 }
 0x107   : > { %v1099_v62 = vpop.eup %1098  ;;  %791 = vst [vmem:[%s1247_s9 + $0xa0] sm:$0xff] %v1097_v61  ;;  %1124 = vtanh.f32 %v1008_v60  ;;  %v561_v63 = vpop.f32.mrf.mxu0 }
 0x108   : > { %v625_v0 = vpop.f32.mrf.mxu1  ;;  %v1101_v1 = vpop.eup %1100  ;;  %778 = vst [vmem:[%s1247_s9 + $0x38] sm:$0xff] %v1099_v62  ;;  %1126 = vtanh.f32 %v561_v63 }
 0x109   : > { %v1103_v2 = vpop.eup %1102  ;;  %794 = vst [vmem:[%s1247_s9 + $0xb8] sm:$0xff] %v1101_v1  ;;  %1128 = vtanh.f32 %v625_v0  ;;  %v993_v3 = vpop.f32.mrf.mxu0 }
 0x10a   : > { %v1009_v4 = vpop.f32.mrf.mxu1  ;;  %v1105_v5 = vpop.eup %1104  ;;  %776 = vst [vmem:[%s1247_s9 + $0x28] sm:$0xff] %v1103_v2  ;;  %1130 = vtanh.f32 %v993_v3 }
 0x10b   : > { %v1107_v6 = vpop.eup %1106  ;;  %792 = vst [vmem:[%s1247_s9 + $0xa8] sm:$0xff] %v1105_v5  ;;  %1132 = vtanh.f32 %v1009_v4  ;;  %v564_v7 = vpop.f32.mrf.mxu0 }
 0x10c   : > { %v628_v8 = vpop.f32.mrf.mxu1  ;;  %v1109_v9 = vpop.eup %1108  ;;  %781 = vst [vmem:[%s1247_s9 + $0x50] sm:$0xff] %v1107_v6  ;;  %1134 = vtanh.f32 %v564_v7 }
 0x10d   : > { %v1111_v10 = vpop.eup %1110  ;;  %797 = vst [vmem:[%s1247_s9 + $0xd0] sm:$0xff] %v1109_v9  ;;  %1136 = vtanh.f32 %v628_v8 }
 0x10e   : > { %v1113_v11 = vpop.eup %1112  ;;  %779 = vst [vmem:[%s1247_s9 + $0x40] sm:$0xff] %v1111_v10 }
 0x10f   : > { %v1115_v12 = vpop.eup %1114  ;;  %795 = vst [vmem:[%s1247_s9 + $0xc0] sm:$0xff] %v1113_v11 }
 0x110   : > { %v1117_v13 = vpop.eup %1116  ;;  %782 = vst [vmem:[%s1247_s9 + $0x58] sm:$0xff] %v1115_v12 }
 0x111   : > { %v1119_v14 = vpop.eup %1118  ;;  %798 = vst [vmem:[%s1247_s9 + $0xd8] sm:$0xff] %v1117_v13 }
 0x112   : > { %v1121_v15 = vpop.eup %1120  ;;  %780 = vst [vmem:[%s1247_s9 + $0x48] sm:$0xff] %v1119_v14 }
 0x113   : > { %v1123_v16 = vpop.eup %1122  ;;  %796 = vst [vmem:[%s1247_s9 + $0xc8] sm:$0xff] %v1121_v15 }
 0x114   : > { %v1125_v17 = vpop.eup %1124  ;;  %785 = vst [vmem:[%s1247_s9 + $0x70] sm:$0xff] %v1123_v16 }
 0x115   : > { %v1127_v18 = vpop.eup %1126  ;;  %801 = vst [vmem:[%s1247_s9 + $0xf0] sm:$0xff] %v1125_v17 }
 0x116   : > { %v1129_v19 = vpop.eup %1128  ;;  %783 = vst [vmem:[%s1247_s9 + $0x60] sm:$0xff] %v1127_v18 }
 0x117   : > { %v1131_v20 = vpop.eup %1130  ;;  %799 = vst [vmem:[%s1247_s9 + $0xe0] sm:$0xff] %v1129_v19 }
 0x118   : > { %v1133_v21 = vpop.eup %1132  ;;  %786 = vst [vmem:[%s1247_s9 + $0x78] sm:$0xff] %v1131_v20 }
 0x119   : > { %v1135_v22 = vpop.eup %1134  ;;  %802 = vst [vmem:[%s1247_s9 + $0xf8] sm:$0xff] %v1133_v21 }
 0x11a   : > { %v1137_v23 = vpop.eup %1136  ;;  %784 = vst [vmem:[%s1247_s9 + $0x68] sm:$0xff] %v1135_v22 }
 0x11b   : > { %800 = vst [vmem:[%s1247_s9 + $0xe8] sm:$0xff] %v1137_v23 }
 0x11c PF: > { %s12_s11 = sadd.s32 1, %s1160_s11   ;;  %s1293_s9 = smov %s1156_s10 }
 0x11d   : > { %p9_p5 = scmp.ge.s32.totalorder %s12_s11, 10   ;;  %s1294_s10 = smov %s1296_s12 }
 0x11f   :  { %11 = sbr.rel (!%p9_p5) target bundleno = 2 (0x2), region = 69 }

</bundles_post_ra>
